<compile_context>
chip_gen: v7x
topology: tpu7x:2x2x1
jax: 0.10.0
libtpu: 0.0.40
codegen_flags: <defaults>
</compile_context>

<pallas_src>
import jax
import jax.numpy as jnp
from jax.experimental import pallas as pl
from jax.experimental.pallas import tpu as pltpu

# ----------------------- model hyperparameters (small) ----------------------
B = 2                 # batch (kernel is latency-bound; raise B to fill the MXU)
T = 8                 # max sequence length (padded)
N_VOCAB = 8           # chars + '<$>' + '<#>' + '<pad>'
D_EMB = N_VOCAB       # vector = torch.eye(len(c2i))  -> d_emb == n_vocab
ENC_HIDDEN = 32       # ENC_HIDDEN
DEC_HIDDEN = 32       # DEC_HIDDEN (must equal ENC_HIDDEN in this layout)
D_Z = 128             # d_z = 128 (fixed in the module)
PAD_IDX = N_VOCAB - 1 # '<pad>'
EOS_IDX = N_VOCAB - 2 # '<#>'
BOS_IDX = N_VOCAB - 3 # '<$>'

H = ENC_HIDDEN        # hidden width used throughout (== DEC_HIDDEN)
GPACK = 128           # packed gate tile: r|z|n at 32-lane offsets, 96:128 zero
# TODO(synk): multi-layer GRU stacks + inter-layer dropout (only active when
#             ENC_LAYERS/DEC_LAYERS > 1 in the reference) are not implemented.


def _sigmoid(x):
    # numerically stable sigmoid via tanh (single EUP op, no exp overflow)
    return 0.5 * (jnp.tanh(0.5 * x) + 1.0)


def _gru_cell(gi, h, whh, bhh):
    """PyTorch-convention GRU cell (gate order r, z, n), packed-gate layout.

    gi : (B, GPACK)  precomputed x @ W_ih + b_ih (decoder z-part folded in)
    h  : (B, H)      hidden state (exactly H lanes, no padding)
    whh: (H, GPACK), bhh: (1, GPACK)   (columns 3H:GPACK are zero, never read)
    """
    gh = jnp.dot(h, whh, preferred_element_type=jnp.float32) + bhh
    g = gi + gh
    r = _sigmoid(g[:, 0:H])
    zg = _sigmoid(g[:, H:2 * H])
    n = jnp.tanh(gi[:, 2 * H:3 * H] + r * gh[:, 2 * H:3 * H])
    return (1.0 - zg) * n + zg * h


def vae_kernel(gi_f_ref, gi_b_ref, gi_dx_ref, mask_ref, onehot_ref, valid_ref,
               eps_ref,
               whh_f_ref, bhh_f_ref, whh_b_ref, bhh_b_ref,
               wmulv_f_ref, wmulv_b_ref, bmulv_ref,
               wdec0_ref, bdec0_ref,
               whh_d_ref, bhh_d_ref,
               wfc_ref, bfc_ref,
               out_ref):
    f32 = jnp.float32
    mask = mask_ref[...]                      # (T, B, H) float {0, 1}

    # ------------------- encoder (bi-GRU, fused fwd/bwd loop) ----------------
    whh_f = whh_f_ref[...]; bhh_f = bhh_f_ref[...]
    whh_b = whh_b_ref[...]; bhh_b = bhh_b_ref[...]

    h_f = jnp.zeros((B, H), f32)
    h_b = jnp.zeros((B, H), f32)
    for t in range(T):                        # static trip count -> unrolled
        tb = T - 1 - t
        hf_new = _gru_cell(gi_f_ref[t], h_f, whh_f, bhh_f)
        hb_new = _gru_cell(gi_b_ref[tb], h_b, whh_b, bhh_b)
        h_f = jnp.where(mask[t] != 0.0, hf_new, h_f)    # pack_sequence emu
        h_b = jnp.where(mask[tb] != 0.0, hb_new, h_b)

    # fused q_mu | q_logvar: one (B, 256) result, 128-aligned slices
    mulv = (jnp.dot(h_f, wmulv_f_ref[...], preferred_element_type=f32)
            + jnp.dot(h_b, wmulv_b_ref[...], preferred_element_type=f32)
            + bmulv_ref[...])
    mu = mulv[:, 0:D_Z]
    logvar = mulv[:, D_Z:2 * D_Z]
    z = mu + jnp.exp(0.5 * logvar) * eps_ref[...]                      # (B, D_Z)

    kl_term = jnp.exp(logvar) + mu * mu - 1.0 - logvar
    kl = 0.5 * jnp.mean(jnp.sum(kl_term, axis=1, keepdims=True),
                        axis=0, keepdims=True)                         # (1, 1)

    # ------------------- decoder (GRU, deferred cross-entropy) ---------------
    # fused decoder_latent | decoder W_ih(z-part): one z @ (128, 256) dot
    dec0 = jnp.dot(z, wdec0_ref[...], preferred_element_type=f32) + bdec0_ref[...]
    h = dec0[:, 0:H]                      # h0 = decoder_latent(z)
    gi_z = dec0[:, GPACK:2 * GPACK]       # z @ W_ih_z (no bias; hoisted)

    whh_d = whh_d_ref[...]; bhh_d = bhh_d_ref[...]
    gi_dec = gi_dx_ref[...] + gi_z[None, :, :]   # (T, B, GPACK), hoisted add

    hs = []
    for t in range(T - 1):                # static trip count -> unrolled
        h_new = _gru_cell(gi_dec[t], h, whh_d, bhh_d)
        # NOTE: h also updates at the step whose input is EOS (t == len-1);
        # that step's target is <pad> and excluded from the loss, so the
        # returned losses match the reference exactly.
        h = jnp.where(mask[t] != 0.0, h_new, h)
        hs.append(h)

    # cross-entropy off the serial chain: one batched matmul + log-softmax
    hs_all = jnp.concatenate(hs, axis=0)                          # ((T-1)*B, H)
    logits = (jnp.dot(hs_all, wfc_ref[...], preferred_element_type=f32)
              + bfc_ref[...])                                     # ((T-1)*B, V)
    mx = jnp.max(logits, axis=-1, keepdims=True)
    lse = mx + jnp.log(jnp.sum(jnp.exp(logits - mx), axis=-1, keepdims=True))
    tgt_logit = jnp.sum(onehot_ref[...] * logits, axis=-1, keepdims=True)
    valid = valid_ref[...]                                        # ((T-1)*B, 1)
    loss_sum = jnp.sum(valid * (lse - tgt_logit), axis=0, keepdims=True)
    cnt = jnp.maximum(jnp.sum(valid, axis=0, keepdims=True), 1.0)
    recon = loss_sum / cnt                                        # (1, 1)

    out_ref[...] = jnp.concatenate([kl, recon], axis=1)           # (1, 2)


# --------------------------- wrapper-side layout glue ------------------------
def _pad_gates(w):
    """(in, 3H) -> (in, GPACK): gates r|z|n stay contiguous at 32-lane offsets,
    zero-padded to a single 128-lane tile."""
    return jnp.pad(w, ((0, 0), (0, GPACK - w.shape[1])))


def vae_forward(tokens, lengths, eps, params):
    """tokens: (B, T) int32 (sorted by decreasing length), lengths: (B,) int32,
    eps: (B, D_Z) f32."""
    f32 = jnp.float32

    # packed-gate weight layouts (one 128-lane tile per gate group)
    wih_f_p = _pad_gates(params['wih_f']); bih_f_p = _pad_gates(params['bih_f'])
    whh_f_p = _pad_gates(params['whh_f']); bhh_f_p = _pad_gates(params['bhh_f'])
    wih_b_p = _pad_gates(params['wih_b']); bih_b_p = _pad_gates(params['bih_b'])
    whh_b_p = _pad_gates(params['whh_b']); bhh_b_p = _pad_gates(params['bhh_b'])
    wih_dx_p = _pad_gates(params['wih_dx']); bih_d_p = _pad_gates(params['bih_d'])
    wih_dz_p = _pad_gates(params['wih_dz'])
    whh_d_p = _pad_gates(params['whh_d']); bhh_d_p = _pad_gates(params['bhh_d'])

    # fused q_mu | q_logvar weights, split into fwd/bwd halves (no lane concat
    # of [h_fwd | h_bwd] in the kernel)
    wmulv_f = jnp.concatenate([params['wmu'][:ENC_HIDDEN],
                               params['wlv'][:ENC_HIDDEN]], axis=1)   # (H, 2*D_Z)
    wmulv_b = jnp.concatenate([params['wmu'][ENC_HIDDEN:],
                               params['wlv'][ENC_HIDDEN:]], axis=1)
    bmulv = jnp.concatenate([params['bmu'], params['blv']], axis=1)   # (1, 2*D_Z)

    # fused decoder_latent | decoder W_ih(z-part): (D_Z, 2*GPACK)
    wdl_pad = jnp.pad(params['wdl'], ((0, 0), (0, GPACK - DEC_HIDDEN)))
    bdl_pad = jnp.pad(params['bdl'], ((0, 0), (0, GPACK - DEC_HIDDEN)))
    wdec0 = jnp.concatenate([wdl_pad, wih_dz_p], axis=1)
    bdec0 = jnp.concatenate([bdl_pad, jnp.zeros((1, GPACK), f32)], axis=1)

    # hoisted input projections: x_emb is the identity matrix, so
    # x_t @ W_ih == W_ih[token]; gathered directly in time-major order.
    tok_tm = tokens.T                                                  # (T, B)
    gi_f = (wih_f_p[tok_tm] + bih_f_p).astype(f32)                     # (T,B,GPACK)
    gi_b = (wih_b_p[tok_tm] + bih_b_p).astype(f32)
    gi_dx = (wih_dx_p[tok_tm] + bih_d_p).astype(f32)

    # length masks (pre-broadcast over hidden lanes -> one vsel per step),
    # target one-hots and validity mask (ignore_index=<pad>), all time-major.
    pos = jnp.arange(T, dtype=jnp.int32)[:, None]                      # (T, 1)
    step_mask = (pos < lengths[None, :]).astype(f32)                   # (T, B)
    mask3 = jnp.broadcast_to(step_mask[:, :, None], (T, B, H))
    tgt_tm = tok_tm[1:]                                                # (T-1, B)
    onehot = (tgt_tm[:, :, None]
              == jnp.arange(N_VOCAB, dtype=jnp.int32)[None, None, :]).astype(f32)
    onehot = onehot.reshape((T - 1) * B, N_VOCAB)
    valid = (tgt_tm != PAD_IDX).astype(f32).reshape((T - 1) * B, 1)

    vmem = pltpu.MemorySpace.VMEM
    args = (gi_f, gi_b, gi_dx, mask3, onehot, valid, eps,
            whh_f_p, bhh_f_p, whh_b_p, bhh_b_p,
            wmulv_f, wmulv_b, bmulv,
            wdec0, bdec0,
            whh_d_p, bhh_d_p,
            params['wfc'], params['bfc'])
    out = pl.pallas_call(
        vae_kernel,
        out_shape=jax.ShapeDtypeStruct((1, 2), jnp.float32),
        in_specs=[pl.BlockSpec(memory_space=vmem)] * len(args),
        out_specs=pl.BlockSpec(memory_space=vmem),
    )(*args)
    return out[0, 0], out[0, 1]


def init_params(key):
    """Deterministic synthetic parameters matching the PyTorch module's shapes,
    stored pre-transposed as (in_features, out_features)."""
    ks = iter(jax.random.split(key, 32))

    def u(k, shape, fan):
        bound = 1.0 / jnp.sqrt(jnp.float32(fan))
        return jax.random.uniform(k, shape, jnp.float32, -bound, bound)

    p = {}
    # encoder GRU (bidirectional), weight_ih: (3H, E) -> stored (E, 3H)
    p['wih_f'] = u(next(ks), (D_EMB, 3 * ENC_HIDDEN), ENC_HIDDEN)
    p['whh_f'] = u(next(ks), (ENC_HIDDEN, 3 * ENC_HIDDEN), ENC_HIDDEN)
    p['bih_f'] = u(next(ks), (1, 3 * ENC_HIDDEN), ENC_HIDDEN)
    p['bhh_f'] = u(next(ks), (1, 3 * ENC_HIDDEN), ENC_HIDDEN)
    p['wih_b'] = u(next(ks), (D_EMB, 3 * ENC_HIDDEN), ENC_HIDDEN)
    p['whh_b'] = u(next(ks), (ENC_HIDDEN, 3 * ENC_HIDDEN), ENC_HIDDEN)
    p['bih_b'] = u(next(ks), (1, 3 * ENC_HIDDEN), ENC_HIDDEN)
    p['bhh_b'] = u(next(ks), (1, 3 * ENC_HIDDEN), ENC_HIDDEN)
    # q_mu / q_logvar : Linear(2H -> d_z)
    p['wmu'] = u(next(ks), (2 * ENC_HIDDEN, D_Z), 2 * ENC_HIDDEN)
    p['bmu'] = u(next(ks), (1, D_Z), 2 * ENC_HIDDEN)
    p['wlv'] = u(next(ks), (2 * ENC_HIDDEN, D_Z), 2 * ENC_HIDDEN)
    p['blv'] = u(next(ks), (1, D_Z), 2 * ENC_HIDDEN)
    # decoder_latent : Linear(d_z -> dec_hidden)
    p['wdl'] = u(next(ks), (D_Z, DEC_HIDDEN), D_Z)
    p['bdl'] = u(next(ks), (1, DEC_HIDDEN), D_Z)
    # decoder GRU, input = d_emb + d_z; weight_ih split into emb / z parts
    p['wih_dx'] = u(next(ks), (D_EMB, 3 * DEC_HIDDEN), DEC_HIDDEN)
    p['wih_dz'] = u(next(ks), (D_Z, 3 * DEC_HIDDEN), DEC_HIDDEN)
    p['whh_d'] = u(next(ks), (DEC_HIDDEN, 3 * DEC_HIDDEN), DEC_HIDDEN)
    p['bih_d'] = u(next(ks), (1, 3 * DEC_HIDDEN), DEC_HIDDEN)
    p['bhh_d'] = u(next(ks), (1, 3 * DEC_HIDDEN), DEC_HIDDEN)
    # decoder_fullyc : Linear(dec_hidden -> n_vocab)
    p['wfc'] = u(next(ks), (DEC_HIDDEN, N_VOCAB), DEC_HIDDEN)
    p['bfc'] = u(next(ks), (1, N_VOCAB), DEC_HIDDEN)
    return p


if __name__ == "__main__":
    key = jax.random.PRNGKey(0)
    k_tok, k_eps, k_par = jax.random.split(key, 3)

    # synthetic token sequences: <$> ... <#>, padded with <pad>, sorted by
    # decreasing length (pack_sequence / pack_padded_sequence requirement).
    lens = jnp.array([T, 6], dtype=jnp.int32)            # (B,)
    body = jax.random.randint(k_tok, (B, T), 0, BOS_IDX, dtype=jnp.int32)
    pos = jnp.arange(T, dtype=jnp.int32)[None, :]        # (1, T)
    tokens = jnp.where(pos == 0, BOS_IDX, body)
    tokens = jnp.where(pos == (lens[:, None] - 1), EOS_IDX, tokens)
    tokens = jnp.where(pos >= lens[:, None], PAD_IDX, tokens)   # (B, T) int32

    eps = jax.random.normal(k_eps, (B, D_Z), jnp.float32)  # "randn_like(mu)"
    params = init_params(k_par)

    kl_loss, recon_loss = vae_forward(tokens, lens, eps, params)
    jax.block_until_ready((kl_loss, recon_loss))
    assert jnp.isfinite(kl_loss) and jnp.isfinite(recon_loss)
    print("KERNEL_OK")
</pallas_src>

<mosaic_0001>
module attributes {stable_mosaic.version = 11 : i64} {
  func.func @vae_kernel(%arg0: memref<8x2x128xf32, #tpu.memory_space<vmem>>, %arg1: memref<8x2x128xf32, #tpu.memory_space<vmem>>, %arg2: memref<8x2x128xf32, #tpu.memory_space<vmem>>, %arg3: memref<8x2x32xf32, #tpu.memory_space<vmem>>, %arg4: memref<14x8xf32, #tpu.memory_space<vmem>>, %arg5: memref<14x1xf32, #tpu.memory_space<vmem>>, %arg6: memref<2x128xf32, #tpu.memory_space<vmem>>, %arg7: memref<32x128xf32, #tpu.memory_space<vmem>>, %arg8: memref<1x128xf32, #tpu.memory_space<vmem>>, %arg9: memref<32x128xf32, #tpu.memory_space<vmem>>, %arg10: memref<1x128xf32, #tpu.memory_space<vmem>>, %arg11: memref<32x256xf32, #tpu.memory_space<vmem>>, %arg12: memref<32x256xf32, #tpu.memory_space<vmem>>, %arg13: memref<1x256xf32, #tpu.memory_space<vmem>>, %arg14: memref<128x256xf32, #tpu.memory_space<vmem>>, %arg15: memref<1x256xf32, #tpu.memory_space<vmem>>, %arg16: memref<32x128xf32, #tpu.memory_space<vmem>>, %arg17: memref<1x128xf32, #tpu.memory_space<vmem>>, %arg18: memref<32x8xf32, #tpu.memory_space<vmem>>, %arg19: memref<1x8xf32, #tpu.memory_space<vmem>>, %arg20: memref<1x2xf32, #tpu.memory_space<vmem>>) attributes {dimension_semantics = [], scalar_prefetch = 0 : i64, scratch_operands = 0 : i64, tpu.core_type = #tpu.core_type<tc>} {
    %c0 = arith.constant 0 : index
    %c0_0 = arith.constant 0 : index
    %c0_1 = arith.constant 0 : index
    %0 = vector.load %arg3[%c0, %c0_0, %c0_1] : memref<8x2x32xf32, #tpu.memory_space<vmem>>, vector<8x2x32xf32>
    %c0_2 = arith.constant 0 : index
    %c0_3 = arith.constant 0 : index
    %1 = vector.load %arg7[%c0_2, %c0_3] : memref<32x128xf32, #tpu.memory_space<vmem>>, vector<32x128xf32>
    %c0_4 = arith.constant 0 : index
    %c0_5 = arith.constant 0 : index
    %2 = vector.load %arg8[%c0_4, %c0_5] : memref<1x128xf32, #tpu.memory_space<vmem>>, vector<1x128xf32>
    %c0_6 = arith.constant 0 : index
    %c0_7 = arith.constant 0 : index
    %3 = vector.load %arg9[%c0_6, %c0_7] : memref<32x128xf32, #tpu.memory_space<vmem>>, vector<32x128xf32>
    %c0_8 = arith.constant 0 : index
    %c0_9 = arith.constant 0 : index
    %4 = vector.load %arg10[%c0_8, %c0_9] : memref<1x128xf32, #tpu.memory_space<vmem>>, vector<1x128xf32>
    %cst = arith.constant 0.000000e+00 : f32
    %5 = vector.broadcast %cst : f32 to vector<2x32xf32>
    %cst_10 = arith.constant 0.000000e+00 : f32
    %6 = vector.broadcast %cst_10 : f32 to vector<2x32xf32>
    %c0_11 = arith.constant 0 : index
    %c0_12 = arith.constant 0 : index
    %c0_13 = arith.constant 0 : index
    %7 = vector.load %arg0[%c0_11, %c0_12, %c0_13] : memref<8x2x128xf32, #tpu.memory_space<vmem>>, vector<1x2x128xf32>
    %8 = vector.shape_cast %7 : vector<1x2x128xf32> to vector<2x128xf32>
    %cst_14 = arith.constant dense<0.000000e+00> : vector<2x128xf32>
    %9 = tpu.matmul %5, %1, %cst_14 {dimension_numbers = #tpu.dot_dimension_numbers<[1], [0], [0], [1], [0, 0, 1, 1], [], []>} : vector<2x32xf32>, vector<32x128xf32>, vector<2x128xf32> -> vector<2x128xf32>
    %10 = vector.broadcast %2 : vector<1x128xf32> to vector<2x128xf32>
    %11 = arith.addf %9, %10 : vector<2x128xf32>
    %12 = arith.addf %8, %11 : vector<2x128xf32>
    %13 = vector.extract_strided_slice %12 {offsets = [0, 0], sizes = [2, 32], strides = [1, 1]} : vector<2x128xf32> to vector<2x32xf32>
    %cst_15 = arith.constant 5.000000e-01 : f32
    %14 = vector.broadcast %cst_15 : f32 to vector<2x32xf32>
    %15 = arith.mulf %14, %13 : vector<2x32xf32>
    %16 = math.tanh %15 : vector<2x32xf32>
    %cst_16 = arith.constant 1.000000e+00 : f32
    %17 = vector.broadcast %cst_16 : f32 to vector<2x32xf32>
    %18 = arith.addf %16, %17 : vector<2x32xf32>
    %cst_17 = arith.constant 5.000000e-01 : f32
    %19 = vector.broadcast %cst_17 : f32 to vector<2x32xf32>
    %20 = arith.mulf %19, %18 : vector<2x32xf32>
    %21 = vector.extract_strided_slice %12 {offsets = [0, 32], sizes = [2, 32], strides = [1, 1]} : vector<2x128xf32> to vector<2x32xf32>
    %cst_18 = arith.constant 5.000000e-01 : f32
    %22 = vector.broadcast %cst_18 : f32 to vector<2x32xf32>
    %23 = arith.mulf %22, %21 : vector<2x32xf32>
    %24 = math.tanh %23 : vector<2x32xf32>
    %cst_19 = arith.constant 1.000000e+00 : f32
    %25 = vector.broadcast %cst_19 : f32 to vector<2x32xf32>
    %26 = arith.addf %24, %25 : vector<2x32xf32>
    %cst_20 = arith.constant 5.000000e-01 : f32
    %27 = vector.broadcast %cst_20 : f32 to vector<2x32xf32>
    %28 = arith.mulf %27, %26 : vector<2x32xf32>
    %29 = vector.extract_strided_slice %8 {offsets = [0, 64], sizes = [2, 32], strides = [1, 1]} : vector<2x128xf32> to vector<2x32xf32>
    %30 = vector.extract_strided_slice %11 {offsets = [0, 64], sizes = [2, 32], strides = [1, 1]} : vector<2x128xf32> to vector<2x32xf32>
    %31 = arith.mulf %20, %30 : vector<2x32xf32>
    %32 = arith.addf %29, %31 : vector<2x32xf32>
    %33 = math.tanh %32 : vector<2x32xf32>
    %cst_21 = arith.constant 1.000000e+00 : f32
    %34 = vector.broadcast %cst_21 : f32 to vector<2x32xf32>
    %35 = arith.subf %34, %28 : vector<2x32xf32>
    %36 = arith.mulf %35, %33 : vector<2x32xf32>
    %37 = arith.mulf %28, %5 : vector<2x32xf32>
    %38 = arith.addf %36, %37 : vector<2x32xf32>
    %c7 = arith.constant 7 : index
    %c0_22 = arith.constant 0 : index
    %c0_23 = arith.constant 0 : index
    %39 = vector.load %arg1[%c7, %c0_22, %c0_23] : memref<8x2x128xf32, #tpu.memory_space<vmem>>, vector<1x2x128xf32>
    %40 = vector.shape_cast %39 : vector<1x2x128xf32> to vector<2x128xf32>
    %cst_24 = arith.constant dense<0.000000e+00> : vector<2x128xf32>
    %41 = tpu.matmul %6, %3, %cst_24 {dimension_numbers = #tpu.dot_dimension_numbers<[1], [0], [0], [1], [0, 0, 1, 1], [], []>} : vector<2x32xf32>, vector<32x128xf32>, vector<2x128xf32> -> vector<2x128xf32>
    %42 = vector.broadcast %4 : vector<1x128xf32> to vector<2x128xf32>
    %43 = arith.addf %41, %42 : vector<2x128xf32>
    %44 = arith.addf %40, %43 : vector<2x128xf32>
    %45 = vector.extract_strided_slice %44 {offsets = [0, 0], sizes = [2, 32], strides = [1, 1]} : vector<2x128xf32> to vector<2x32xf32>
    %cst_25 = arith.constant 5.000000e-01 : f32
    %46 = vector.broadcast %cst_25 : f32 to vector<2x32xf32>
    %47 = arith.mulf %46, %45 : vector<2x32xf32>
    %48 = math.tanh %47 : vector<2x32xf32>
    %cst_26 = arith.constant 1.000000e+00 : f32
    %49 = vector.broadcast %cst_26 : f32 to vector<2x32xf32>
    %50 = arith.addf %48, %49 : vector<2x32xf32>
    %cst_27 = arith.constant 5.000000e-01 : f32
    %51 = vector.broadcast %cst_27 : f32 to vector<2x32xf32>
    %52 = arith.mulf %51, %50 : vector<2x32xf32>
    %53 = vector.extract_strided_slice %44 {offsets = [0, 32], sizes = [2, 32], strides = [1, 1]} : vector<2x128xf32> to vector<2x32xf32>
    %cst_28 = arith.constant 5.000000e-01 : f32
    %54 = vector.broadcast %cst_28 : f32 to vector<2x32xf32>
    %55 = arith.mulf %54, %53 : vector<2x32xf32>
    %56 = math.tanh %55 : vector<2x32xf32>
    %cst_29 = arith.constant 1.000000e+00 : f32
    %57 = vector.broadcast %cst_29 : f32 to vector<2x32xf32>
    %58 = arith.addf %56, %57 : vector<2x32xf32>
    %cst_30 = arith.constant 5.000000e-01 : f32
    %59 = vector.broadcast %cst_30 : f32 to vector<2x32xf32>
    %60 = arith.mulf %59, %58 : vector<2x32xf32>
    %61 = vector.extract_strided_slice %40 {offsets = [0, 64], sizes = [2, 32], strides = [1, 1]} : vector<2x128xf32> to vector<2x32xf32>
    %62 = vector.extract_strided_slice %43 {offsets = [0, 64], sizes = [2, 32], strides = [1, 1]} : vector<2x128xf32> to vector<2x32xf32>
    %63 = arith.mulf %52, %62 : vector<2x32xf32>
    %64 = arith.addf %61, %63 : vector<2x32xf32>
    %65 = math.tanh %64 : vector<2x32xf32>
    %cst_31 = arith.constant 1.000000e+00 : f32
    %66 = vector.broadcast %cst_31 : f32 to vector<2x32xf32>
    %67 = arith.subf %66, %60 : vector<2x32xf32>
    %68 = arith.mulf %67, %65 : vector<2x32xf32>
    %69 = arith.mulf %60, %6 : vector<2x32xf32>
    %70 = arith.addf %68, %69 : vector<2x32xf32>
    %71 = vector.extract_strided_slice %0 {offsets = [0, 0, 0], sizes = [1, 2, 32], strides = [1, 1, 1]} : vector<8x2x32xf32> to vector<1x2x32xf32>
    %72 = vector.shape_cast %71 : vector<1x2x32xf32> to vector<2x32xf32>
    %cst_32 = arith.constant 0.000000e+00 : f32
    %73 = vector.broadcast %cst_32 : f32 to vector<2x32xf32>
    %74 = arith.cmpf one, %72, %73 : vector<2x32xf32>
    %75 = arith.select %74, %38, %5 : vector<2x32xi1>, vector<2x32xf32>
    %76 = vector.extract_strided_slice %0 {offsets = [7, 0, 0], sizes = [1, 2, 32], strides = [1, 1, 1]} : vector<8x2x32xf32> to vector<1x2x32xf32>
    %77 = vector.shape_cast %76 : vector<1x2x32xf32> to vector<2x32xf32>
    %cst_33 = arith.constant 0.000000e+00 : f32
    %78 = vector.broadcast %cst_33 : f32 to vector<2x32xf32>
    %79 = arith.cmpf one, %77, %78 : vector<2x32xf32>
    %80 = arith.select %79, %70, %6 : vector<2x32xi1>, vector<2x32xf32>
    %c1 = arith.constant 1 : index
    %c0_34 = arith.constant 0 : index
    %c0_35 = arith.constant 0 : index
    %81 = vector.load %arg0[%c1, %c0_34, %c0_35] : memref<8x2x128xf32, #tpu.memory_space<vmem>>, vector<1x2x128xf32>
    %82 = vector.shape_cast %81 : vector<1x2x128xf32> to vector<2x128xf32>
    %cst_36 = arith.constant dense<0.000000e+00> : vector<2x128xf32>
    %83 = tpu.matmul %75, %1, %cst_36 {dimension_numbers = #tpu.dot_dimension_numbers<[1], [0], [0], [1], [0, 0, 1, 1], [], []>} : vector<2x32xf32>, vector<32x128xf32>, vector<2x128xf32> -> vector<2x128xf32>
    %84 = vector.broadcast %2 : vector<1x128xf32> to vector<2x128xf32>
    %85 = arith.addf %83, %84 : vector<2x128xf32>
    %86 = arith.addf %82, %85 : vector<2x128xf32>
    %87 = vector.extract_strided_slice %86 {offsets = [0, 0], sizes = [2, 32], strides = [1, 1]} : vector<2x128xf32> to vector<2x32xf32>
    %cst_37 = arith.constant 5.000000e-01 : f32
    %88 = vector.broadcast %cst_37 : f32 to vector<2x32xf32>
    %89 = arith.mulf %88, %87 : vector<2x32xf32>
    %90 = math.tanh %89 : vector<2x32xf32>
    %cst_38 = arith.constant 1.000000e+00 : f32
    %91 = vector.broadcast %cst_38 : f32 to vector<2x32xf32>
    %92 = arith.addf %90, %91 : vector<2x32xf32>
    %cst_39 = arith.constant 5.000000e-01 : f32
    %93 = vector.broadcast %cst_39 : f32 to vector<2x32xf32>
    %94 = arith.mulf %93, %92 : vector<2x32xf32>
    %95 = vector.extract_strided_slice %86 {offsets = [0, 32], sizes = [2, 32], strides = [1, 1]} : vector<2x128xf32> to vector<2x32xf32>
    %cst_40 = arith.constant 5.000000e-01 : f32
    %96 = vector.broadcast %cst_40 : f32 to vector<2x32xf32>
    %97 = arith.mulf %96, %95 : vector<2x32xf32>
    %98 = math.tanh %97 : vector<2x32xf32>
    %cst_41 = arith.constant 1.000000e+00 : f32
    %99 = vector.broadcast %cst_41 : f32 to vector<2x32xf32>
    %100 = arith.addf %98, %99 : vector<2x32xf32>
    %cst_42 = arith.constant 5.000000e-01 : f32
    %101 = vector.broadcast %cst_42 : f32 to vector<2x32xf32>
    %102 = arith.mulf %101, %100 : vector<2x32xf32>
    %103 = vector.extract_strided_slice %82 {offsets = [0, 64], sizes = [2, 32], strides = [1, 1]} : vector<2x128xf32> to vector<2x32xf32>
    %104 = vector.extract_strided_slice %85 {offsets = [0, 64], sizes = [2, 32], strides = [1, 1]} : vector<2x128xf32> to vector<2x32xf32>
    %105 = arith.mulf %94, %104 : vector<2x32xf32>
    %106 = arith.addf %103, %105 : vector<2x32xf32>
    %107 = math.tanh %106 : vector<2x32xf32>
    %cst_43 = arith.constant 1.000000e+00 : f32
    %108 = vector.broadcast %cst_43 : f32 to vector<2x32xf32>
    %109 = arith.subf %108, %102 : vector<2x32xf32>
    %110 = arith.mulf %109, %107 : vector<2x32xf32>
    %111 = arith.mulf %102, %75 : vector<2x32xf32>
    %112 = arith.addf %110, %111 : vector<2x32xf32>
    %c6 = arith.constant 6 : index
    %c0_44 = arith.constant 0 : index
    %c0_45 = arith.constant 0 : index
    %113 = vector.load %arg1[%c6, %c0_44, %c0_45] : memref<8x2x128xf32, #tpu.memory_space<vmem>>, vector<1x2x128xf32>
    %114 = vector.shape_cast %113 : vector<1x2x128xf32> to vector<2x128xf32>
    %cst_46 = arith.constant dense<0.000000e+00> : vector<2x128xf32>
    %115 = tpu.matmul %80, %3, %cst_46 {dimension_numbers = #tpu.dot_dimension_numbers<[1], [0], [0], [1], [0, 0, 1, 1], [], []>} : vector<2x32xf32>, vector<32x128xf32>, vector<2x128xf32> -> vector<2x128xf32>
    %116 = vector.broadcast %4 : vector<1x128xf32> to vector<2x128xf32>
    %117 = arith.addf %115, %116 : vector<2x128xf32>
    %118 = arith.addf %114, %117 : vector<2x128xf32>
    %119 = vector.extract_strided_slice %118 {offsets = [0, 0], sizes = [2, 32], strides = [1, 1]} : vector<2x128xf32> to vector<2x32xf32>
    %cst_47 = arith.constant 5.000000e-01 : f32
    %120 = vector.broadcast %cst_47 : f32 to vector<2x32xf32>
    %121 = arith.mulf %120, %119 : vector<2x32xf32>
    %122 = math.tanh %121 : vector<2x32xf32>
    %cst_48 = arith.constant 1.000000e+00 : f32
    %123 = vector.broadcast %cst_48 : f32 to vector<2x32xf32>
    %124 = arith.addf %122, %123 : vector<2x32xf32>
    %cst_49 = arith.constant 5.000000e-01 : f32
    %125 = vector.broadcast %cst_49 : f32 to vector<2x32xf32>
    %126 = arith.mulf %125, %124 : vector<2x32xf32>
    %127 = vector.extract_strided_slice %118 {offsets = [0, 32], sizes = [2, 32], strides = [1, 1]} : vector<2x128xf32> to vector<2x32xf32>
    %cst_50 = arith.constant 5.000000e-01 : f32
    %128 = vector.broadcast %cst_50 : f32 to vector<2x32xf32>
    %129 = arith.mulf %128, %127 : vector<2x32xf32>
    %130 = math.tanh %129 : vector<2x32xf32>
    %cst_51 = arith.constant 1.000000e+00 : f32
    %131 = vector.broadcast %cst_51 : f32 to vector<2x32xf32>
    %132 = arith.addf %130, %131 : vector<2x32xf32>
    %cst_52 = arith.constant 5.000000e-01 : f32
    %133 = vector.broadcast %cst_52 : f32 to vector<2x32xf32>
    %134 = arith.mulf %133, %132 : vector<2x32xf32>
    %135 = vector.extract_strided_slice %114 {offsets = [0, 64], sizes = [2, 32], strides = [1, 1]} : vector<2x128xf32> to vector<2x32xf32>
    %136 = vector.extract_strided_slice %117 {offsets = [0, 64], sizes = [2, 32], strides = [1, 1]} : vector<2x128xf32> to vector<2x32xf32>
    %137 = arith.mulf %126, %136 : vector<2x32xf32>
    %138 = arith.addf %135, %137 : vector<2x32xf32>
    %139 = math.tanh %138 : vector<2x32xf32>
    %cst_53 = arith.constant 1.000000e+00 : f32
    %140 = vector.broadcast %cst_53 : f32 to vector<2x32xf32>
    %141 = arith.subf %140, %134 : vector<2x32xf32>
    %142 = arith.mulf %141, %139 : vector<2x32xf32>
    %143 = arith.mulf %134, %80 : vector<2x32xf32>
    %144 = arith.addf %142, %143 : vector<2x32xf32>
    %145 = vector.extract_strided_slice %0 {offsets = [1, 0, 0], sizes = [1, 2, 32], strides = [1, 1, 1]} : vector<8x2x32xf32> to vector<1x2x32xf32>
    %146 = vector.shape_cast %145 : vector<1x2x32xf32> to vector<2x32xf32>
    %cst_54 = arith.constant 0.000000e+00 : f32
    %147 = vector.broadcast %cst_54 : f32 to vector<2x32xf32>
    %148 = arith.cmpf one, %146, %147 : vector<2x32xf32>
    %149 = arith.select %148, %112, %75 : vector<2x32xi1>, vector<2x32xf32>
    %150 = vector.extract_strided_slice %0 {offsets = [6, 0, 0], sizes = [1, 2, 32], strides = [1, 1, 1]} : vector<8x2x32xf32> to vector<1x2x32xf32>
    %151 = vector.shape_cast %150 : vector<1x2x32xf32> to vector<2x32xf32>
    %cst_55 = arith.constant 0.000000e+00 : f32
    %152 = vector.broadcast %cst_55 : f32 to vector<2x32xf32>
    %153 = arith.cmpf one, %151, %152 : vector<2x32xf32>
    %154 = arith.select %153, %144, %80 : vector<2x32xi1>, vector<2x32xf32>
    %c2 = arith.constant 2 : index
    %c0_56 = arith.constant 0 : index
    %c0_57 = arith.constant 0 : index
    %155 = vector.load %arg0[%c2, %c0_56, %c0_57] : memref<8x2x128xf32, #tpu.memory_space<vmem>>, vector<1x2x128xf32>
    %156 = vector.shape_cast %155 : vector<1x2x128xf32> to vector<2x128xf32>
    %cst_58 = arith.constant dense<0.000000e+00> : vector<2x128xf32>
    %157 = tpu.matmul %149, %1, %cst_58 {dimension_numbers = #tpu.dot_dimension_numbers<[1], [0], [0], [1], [0, 0, 1, 1], [], []>} : vector<2x32xf32>, vector<32x128xf32>, vector<2x128xf32> -> vector<2x128xf32>
    %158 = vector.broadcast %2 : vector<1x128xf32> to vector<2x128xf32>
    %159 = arith.addf %157, %158 : vector<2x128xf32>
    %160 = arith.addf %156, %159 : vector<2x128xf32>
    %161 = vector.extract_strided_slice %160 {offsets = [0, 0], sizes = [2, 32], strides = [1, 1]} : vector<2x128xf32> to vector<2x32xf32>
    %cst_59 = arith.constant 5.000000e-01 : f32
    %162 = vector.broadcast %cst_59 : f32 to vector<2x32xf32>
    %163 = arith.mulf %162, %161 : vector<2x32xf32>
    %164 = math.tanh %163 : vector<2x32xf32>
    %cst_60 = arith.constant 1.000000e+00 : f32
    %165 = vector.broadcast %cst_60 : f32 to vector<2x32xf32>
    %166 = arith.addf %164, %165 : vector<2x32xf32>
    %cst_61 = arith.constant 5.000000e-01 : f32
    %167 = vector.broadcast %cst_61 : f32 to vector<2x32xf32>
    %168 = arith.mulf %167, %166 : vector<2x32xf32>
    %169 = vector.extract_strided_slice %160 {offsets = [0, 32], sizes = [2, 32], strides = [1, 1]} : vector<2x128xf32> to vector<2x32xf32>
    %cst_62 = arith.constant 5.000000e-01 : f32
    %170 = vector.broadcast %cst_62 : f32 to vector<2x32xf32>
    %171 = arith.mulf %170, %169 : vector<2x32xf32>
    %172 = math.tanh %171 : vector<2x32xf32>
    %cst_63 = arith.constant 1.000000e+00 : f32
    %173 = vector.broadcast %cst_63 : f32 to vector<2x32xf32>
    %174 = arith.addf %172, %173 : vector<2x32xf32>
    %cst_64 = arith.constant 5.000000e-01 : f32
    %175 = vector.broadcast %cst_64 : f32 to vector<2x32xf32>
    %176 = arith.mulf %175, %174 : vector<2x32xf32>
    %177 = vector.extract_strided_slice %156 {offsets = [0, 64], sizes = [2, 32], strides = [1, 1]} : vector<2x128xf32> to vector<2x32xf32>
    %178 = vector.extract_strided_slice %159 {offsets = [0, 64], sizes = [2, 32], strides = [1, 1]} : vector<2x128xf32> to vector<2x32xf32>
    %179 = arith.mulf %168, %178 : vector<2x32xf32>
    %180 = arith.addf %177, %179 : vector<2x32xf32>
    %181 = math.tanh %180 : vector<2x32xf32>
    %cst_65 = arith.constant 1.000000e+00 : f32
    %182 = vector.broadcast %cst_65 : f32 to vector<2x32xf32>
    %183 = arith.subf %182, %176 : vector<2x32xf32>
    %184 = arith.mulf %183, %181 : vector<2x32xf32>
    %185 = arith.mulf %176, %149 : vector<2x32xf32>
    %186 = arith.addf %184, %185 : vector<2x32xf32>
    %c5 = arith.constant 5 : index
    %c0_66 = arith.constant 0 : index
    %c0_67 = arith.constant 0 : index
    %187 = vector.load %arg1[%c5, %c0_66, %c0_67] : memref<8x2x128xf32, #tpu.memory_space<vmem>>, vector<1x2x128xf32>
    %188 = vector.shape_cast %187 : vector<1x2x128xf32> to vector<2x128xf32>
    %cst_68 = arith.constant dense<0.000000e+00> : vector<2x128xf32>
    %189 = tpu.matmul %154, %3, %cst_68 {dimension_numbers = #tpu.dot_dimension_numbers<[1], [0], [0], [1], [0, 0, 1, 1], [], []>} : vector<2x32xf32>, vector<32x128xf32>, vector<2x128xf32> -> vector<2x128xf32>
    %190 = vector.broadcast %4 : vector<1x128xf32> to vector<2x128xf32>
    %191 = arith.addf %189, %190 : vector<2x128xf32>
    %192 = arith.addf %188, %191 : vector<2x128xf32>
    %193 = vector.extract_strided_slice %192 {offsets = [0, 0], sizes = [2, 32], strides = [1, 1]} : vector<2x128xf32> to vector<2x32xf32>
    %cst_69 = arith.constant 5.000000e-01 : f32
    %194 = vector.broadcast %cst_69 : f32 to vector<2x32xf32>
    %195 = arith.mulf %194, %193 : vector<2x32xf32>
    %196 = math.tanh %195 : vector<2x32xf32>
    %cst_70 = arith.constant 1.000000e+00 : f32
    %197 = vector.broadcast %cst_70 : f32 to vector<2x32xf32>
    %198 = arith.addf %196, %197 : vector<2x32xf32>
    %cst_71 = arith.constant 5.000000e-01 : f32
    %199 = vector.broadcast %cst_71 : f32 to vector<2x32xf32>
    %200 = arith.mulf %199, %198 : vector<2x32xf32>
    %201 = vector.extract_strided_slice %192 {offsets = [0, 32], sizes = [2, 32], strides = [1, 1]} : vector<2x128xf32> to vector<2x32xf32>
    %cst_72 = arith.constant 5.000000e-01 : f32
    %202 = vector.broadcast %cst_72 : f32 to vector<2x32xf32>
    %203 = arith.mulf %202, %201 : vector<2x32xf32>
    %204 = math.tanh %203 : vector<2x32xf32>
    %cst_73 = arith.constant 1.000000e+00 : f32
    %205 = vector.broadcast %cst_73 : f32 to vector<2x32xf32>
    %206 = arith.addf %204, %205 : vector<2x32xf32>
    %cst_74 = arith.constant 5.000000e-01 : f32
    %207 = vector.broadcast %cst_74 : f32 to vector<2x32xf32>
    %208 = arith.mulf %207, %206 : vector<2x32xf32>
    %209 = vector.extract_strided_slice %188 {offsets = [0, 64], sizes = [2, 32], strides = [1, 1]} : vector<2x128xf32> to vector<2x32xf32>
    %210 = vector.extract_strided_slice %191 {offsets = [0, 64], sizes = [2, 32], strides = [1, 1]} : vector<2x128xf32> to vector<2x32xf32>
    %211 = arith.mulf %200, %210 : vector<2x32xf32>
    %212 = arith.addf %209, %211 : vector<2x32xf32>
    %213 = math.tanh %212 : vector<2x32xf32>
    %cst_75 = arith.constant 1.000000e+00 : f32
    %214 = vector.broadcast %cst_75 : f32 to vector<2x32xf32>
    %215 = arith.subf %214, %208 : vector<2x32xf32>
    %216 = arith.mulf %215, %213 : vector<2x32xf32>
    %217 = arith.mulf %208, %154 : vector<2x32xf32>
    %218 = arith.addf %216, %217 : vector<2x32xf32>
    %219 = vector.extract_strided_slice %0 {offsets = [2, 0, 0], sizes = [1, 2, 32], strides = [1, 1, 1]} : vector<8x2x32xf32> to vector<1x2x32xf32>
    %220 = vector.shape_cast %219 : vector<1x2x32xf32> to vector<2x32xf32>
    %cst_76 = arith.constant 0.000000e+00 : f32
    %221 = vector.broadcast %cst_76 : f32 to vector<2x32xf32>
    %222 = arith.cmpf one, %220, %221 : vector<2x32xf32>
    %223 = arith.select %222, %186, %149 : vector<2x32xi1>, vector<2x32xf32>
    %224 = vector.extract_strided_slice %0 {offsets = [5, 0, 0], sizes = [1, 2, 32], strides = [1, 1, 1]} : vector<8x2x32xf32> to vector<1x2x32xf32>
    %225 = vector.shape_cast %224 : vector<1x2x32xf32> to vector<2x32xf32>
    %cst_77 = arith.constant 0.000000e+00 : f32
    %226 = vector.broadcast %cst_77 : f32 to vector<2x32xf32>
    %227 = arith.cmpf one, %225, %226 : vector<2x32xf32>
    %228 = arith.select %227, %218, %154 : vector<2x32xi1>, vector<2x32xf32>
    %c3 = arith.constant 3 : index
    %c0_78 = arith.constant 0 : index
    %c0_79 = arith.constant 0 : index
    %229 = vector.load %arg0[%c3, %c0_78, %c0_79] : memref<8x2x128xf32, #tpu.memory_space<vmem>>, vector<1x2x128xf32>
    %230 = vector.shape_cast %229 : vector<1x2x128xf32> to vector<2x128xf32>
    %cst_80 = arith.constant dense<0.000000e+00> : vector<2x128xf32>
    %231 = tpu.matmul %223, %1, %cst_80 {dimension_numbers = #tpu.dot_dimension_numbers<[1], [0], [0], [1], [0, 0, 1, 1], [], []>} : vector<2x32xf32>, vector<32x128xf32>, vector<2x128xf32> -> vector<2x128xf32>
    %232 = vector.broadcast %2 : vector<1x128xf32> to vector<2x128xf32>
    %233 = arith.addf %231, %232 : vector<2x128xf32>
    %234 = arith.addf %230, %233 : vector<2x128xf32>
    %235 = vector.extract_strided_slice %234 {offsets = [0, 0], sizes = [2, 32], strides = [1, 1]} : vector<2x128xf32> to vector<2x32xf32>
    %cst_81 = arith.constant 5.000000e-01 : f32
    %236 = vector.broadcast %cst_81 : f32 to vector<2x32xf32>
    %237 = arith.mulf %236, %235 : vector<2x32xf32>
    %238 = math.tanh %237 : vector<2x32xf32>
    %cst_82 = arith.constant 1.000000e+00 : f32
    %239 = vector.broadcast %cst_82 : f32 to vector<2x32xf32>
    %240 = arith.addf %238, %239 : vector<2x32xf32>
    %cst_83 = arith.constant 5.000000e-01 : f32
    %241 = vector.broadcast %cst_83 : f32 to vector<2x32xf32>
    %242 = arith.mulf %241, %240 : vector<2x32xf32>
    %243 = vector.extract_strided_slice %234 {offsets = [0, 32], sizes = [2, 32], strides = [1, 1]} : vector<2x128xf32> to vector<2x32xf32>
    %cst_84 = arith.constant 5.000000e-01 : f32
    %244 = vector.broadcast %cst_84 : f32 to vector<2x32xf32>
    %245 = arith.mulf %244, %243 : vector<2x32xf32>
    %246 = math.tanh %245 : vector<2x32xf32>
    %cst_85 = arith.constant 1.000000e+00 : f32
    %247 = vector.broadcast %cst_85 : f32 to vector<2x32xf32>
    %248 = arith.addf %246, %247 : vector<2x32xf32>
    %cst_86 = arith.constant 5.000000e-01 : f32
    %249 = vector.broadcast %cst_86 : f32 to vector<2x32xf32>
    %250 = arith.mulf %249, %248 : vector<2x32xf32>
    %251 = vector.extract_strided_slice %230 {offsets = [0, 64], sizes = [2, 32], strides = [1, 1]} : vector<2x128xf32> to vector<2x32xf32>
    %252 = vector.extract_strided_slice %233 {offsets = [0, 64], sizes = [2, 32], strides = [1, 1]} : vector<2x128xf32> to vector<2x32xf32>
    %253 = arith.mulf %242, %252 : vector<2x32xf32>
    %254 = arith.addf %251, %253 : vector<2x32xf32>
    %255 = math.tanh %254 : vector<2x32xf32>
    %cst_87 = arith.constant 1.000000e+00 : f32
    %256 = vector.broadcast %cst_87 : f32 to vector<2x32xf32>
    %257 = arith.subf %256, %250 : vector<2x32xf32>
    %258 = arith.mulf %257, %255 : vector<2x32xf32>
    %259 = arith.mulf %250, %223 : vector<2x32xf32>
    %260 = arith.addf %258, %259 : vector<2x32xf32>
    %c4 = arith.constant 4 : index
    %c0_88 = arith.constant 0 : index
    %c0_89 = arith.constant 0 : index
    %261 = vector.load %arg1[%c4, %c0_88, %c0_89] : memref<8x2x128xf32, #tpu.memory_space<vmem>>, vector<1x2x128xf32>
    %262 = vector.shape_cast %261 : vector<1x2x128xf32> to vector<2x128xf32>
    %cst_90 = arith.constant dense<0.000000e+00> : vector<2x128xf32>
    %263 = tpu.matmul %228, %3, %cst_90 {dimension_numbers = #tpu.dot_dimension_numbers<[1], [0], [0], [1], [0, 0, 1, 1], [], []>} : vector<2x32xf32>, vector<32x128xf32>, vector<2x128xf32> -> vector<2x128xf32>
    %264 = vector.broadcast %4 : vector<1x128xf32> to vector<2x128xf32>
    %265 = arith.addf %263, %264 : vector<2x128xf32>
    %266 = arith.addf %262, %265 : vector<2x128xf32>
    %267 = vector.extract_strided_slice %266 {offsets = [0, 0], sizes = [2, 32], strides = [1, 1]} : vector<2x128xf32> to vector<2x32xf32>
    %cst_91 = arith.constant 5.000000e-01 : f32
    %268 = vector.broadcast %cst_91 : f32 to vector<2x32xf32>
    %269 = arith.mulf %268, %267 : vector<2x32xf32>
    %270 = math.tanh %269 : vector<2x32xf32>
    %cst_92 = arith.constant 1.000000e+00 : f32
    %271 = vector.broadcast %cst_92 : f32 to vector<2x32xf32>
    %272 = arith.addf %270, %271 : vector<2x32xf32>
    %cst_93 = arith.constant 5.000000e-01 : f32
    %273 = vector.broadcast %cst_93 : f32 to vector<2x32xf32>
    %274 = arith.mulf %273, %272 : vector<2x32xf32>
    %275 = vector.extract_strided_slice %266 {offsets = [0, 32], sizes = [2, 32], strides = [1, 1]} : vector<2x128xf32> to vector<2x32xf32>
    %cst_94 = arith.constant 5.000000e-01 : f32
    %276 = vector.broadcast %cst_94 : f32 to vector<2x32xf32>
    %277 = arith.mulf %276, %275 : vector<2x32xf32>
    %278 = math.tanh %277 : vector<2x32xf32>
    %cst_95 = arith.constant 1.000000e+00 : f32
    %279 = vector.broadcast %cst_95 : f32 to vector<2x32xf32>
    %280 = arith.addf %278, %279 : vector<2x32xf32>
    %cst_96 = arith.constant 5.000000e-01 : f32
    %281 = vector.broadcast %cst_96 : f32 to vector<2x32xf32>
    %282 = arith.mulf %281, %280 : vector<2x32xf32>
    %283 = vector.extract_strided_slice %262 {offsets = [0, 64], sizes = [2, 32], strides = [1, 1]} : vector<2x128xf32> to vector<2x32xf32>
    %284 = vector.extract_strided_slice %265 {offsets = [0, 64], sizes = [2, 32], strides = [1, 1]} : vector<2x128xf32> to vector<2x32xf32>
    %285 = arith.mulf %274, %284 : vector<2x32xf32>
    %286 = arith.addf %283, %285 : vector<2x32xf32>
    %287 = math.tanh %286 : vector<2x32xf32>
    %cst_97 = arith.constant 1.000000e+00 : f32
    %288 = vector.broadcast %cst_97 : f32 to vector<2x32xf32>
    %289 = arith.subf %288, %282 : vector<2x32xf32>
    %290 = arith.mulf %289, %287 : vector<2x32xf32>
    %291 = arith.mulf %282, %228 : vector<2x32xf32>
    %292 = arith.addf %290, %291 : vector<2x32xf32>
    %293 = vector.extract_strided_slice %0 {offsets = [3, 0, 0], sizes = [1, 2, 32], strides = [1, 1, 1]} : vector<8x2x32xf32> to vector<1x2x32xf32>
    %294 = vector.shape_cast %293 : vector<1x2x32xf32> to vector<2x32xf32>
    %cst_98 = arith.constant 0.000000e+00 : f32
    %295 = vector.broadcast %cst_98 : f32 to vector<2x32xf32>
    %296 = arith.cmpf one, %294, %295 : vector<2x32xf32>
    %297 = arith.select %296, %260, %223 : vector<2x32xi1>, vector<2x32xf32>
    %298 = vector.extract_strided_slice %0 {offsets = [4, 0, 0], sizes = [1, 2, 32], strides = [1, 1, 1]} : vector<8x2x32xf32> to vector<1x2x32xf32>
    %299 = vector.shape_cast %298 : vector<1x2x32xf32> to vector<2x32xf32>
    %cst_99 = arith.constant 0.000000e+00 : f32
    %300 = vector.broadcast %cst_99 : f32 to vector<2x32xf32>
    %301 = arith.cmpf one, %299, %300 : vector<2x32xf32>
    %302 = arith.select %301, %292, %228 : vector<2x32xi1>, vector<2x32xf32>
    %c4_100 = arith.constant 4 : index
    %c0_101 = arith.constant 0 : index
    %c0_102 = arith.constant 0 : index
    %303 = vector.load %arg0[%c4_100, %c0_101, %c0_102] : memref<8x2x128xf32, #tpu.memory_space<vmem>>, vector<1x2x128xf32>
    %304 = vector.shape_cast %303 : vector<1x2x128xf32> to vector<2x128xf32>
    %cst_103 = arith.constant dense<0.000000e+00> : vector<2x128xf32>
    %305 = tpu.matmul %297, %1, %cst_103 {dimension_numbers = #tpu.dot_dimension_numbers<[1], [0], [0], [1], [0, 0, 1, 1], [], []>} : vector<2x32xf32>, vector<32x128xf32>, vector<2x128xf32> -> vector<2x128xf32>
    %306 = vector.broadcast %2 : vector<1x128xf32> to vector<2x128xf32>
    %307 = arith.addf %305, %306 : vector<2x128xf32>
    %308 = arith.addf %304, %307 : vector<2x128xf32>
    %309 = vector.extract_strided_slice %308 {offsets = [0, 0], sizes = [2, 32], strides = [1, 1]} : vector<2x128xf32> to vector<2x32xf32>
    %cst_104 = arith.constant 5.000000e-01 : f32
    %310 = vector.broadcast %cst_104 : f32 to vector<2x32xf32>
    %311 = arith.mulf %310, %309 : vector<2x32xf32>
    %312 = math.tanh %311 : vector<2x32xf32>
    %cst_105 = arith.constant 1.000000e+00 : f32
    %313 = vector.broadcast %cst_105 : f32 to vector<2x32xf32>
    %314 = arith.addf %312, %313 : vector<2x32xf32>
    %cst_106 = arith.constant 5.000000e-01 : f32
    %315 = vector.broadcast %cst_106 : f32 to vector<2x32xf32>
    %316 = arith.mulf %315, %314 : vector<2x32xf32>
    %317 = vector.extract_strided_slice %308 {offsets = [0, 32], sizes = [2, 32], strides = [1, 1]} : vector<2x128xf32> to vector<2x32xf32>
    %cst_107 = arith.constant 5.000000e-01 : f32
    %318 = vector.broadcast %cst_107 : f32 to vector<2x32xf32>
    %319 = arith.mulf %318, %317 : vector<2x32xf32>
    %320 = math.tanh %319 : vector<2x32xf32>
    %cst_108 = arith.constant 1.000000e+00 : f32
    %321 = vector.broadcast %cst_108 : f32 to vector<2x32xf32>
    %322 = arith.addf %320, %321 : vector<2x32xf32>
    %cst_109 = arith.constant 5.000000e-01 : f32
    %323 = vector.broadcast %cst_109 : f32 to vector<2x32xf32>
    %324 = arith.mulf %323, %322 : vector<2x32xf32>
    %325 = vector.extract_strided_slice %304 {offsets = [0, 64], sizes = [2, 32], strides = [1, 1]} : vector<2x128xf32> to vector<2x32xf32>
    %326 = vector.extract_strided_slice %307 {offsets = [0, 64], sizes = [2, 32], strides = [1, 1]} : vector<2x128xf32> to vector<2x32xf32>
    %327 = arith.mulf %316, %326 : vector<2x32xf32>
    %328 = arith.addf %325, %327 : vector<2x32xf32>
    %329 = math.tanh %328 : vector<2x32xf32>
    %cst_110 = arith.constant 1.000000e+00 : f32
    %330 = vector.broadcast %cst_110 : f32 to vector<2x32xf32>
    %331 = arith.subf %330, %324 : vector<2x32xf32>
    %332 = arith.mulf %331, %329 : vector<2x32xf32>
    %333 = arith.mulf %324, %297 : vector<2x32xf32>
    %334 = arith.addf %332, %333 : vector<2x32xf32>
    %c3_111 = arith.constant 3 : index
    %c0_112 = arith.constant 0 : index
    %c0_113 = arith.constant 0 : index
    %335 = vector.load %arg1[%c3_111, %c0_112, %c0_113] : memref<8x2x128xf32, #tpu.memory_space<vmem>>, vector<1x2x128xf32>
    %336 = vector.shape_cast %335 : vector<1x2x128xf32> to vector<2x128xf32>
    %cst_114 = arith.constant dense<0.000000e+00> : vector<2x128xf32>
    %337 = tpu.matmul %302, %3, %cst_114 {dimension_numbers = #tpu.dot_dimension_numbers<[1], [0], [0], [1], [0, 0, 1, 1], [], []>} : vector<2x32xf32>, vector<32x128xf32>, vector<2x128xf32> -> vector<2x128xf32>
    %338 = vector.broadcast %4 : vector<1x128xf32> to vector<2x128xf32>
    %339 = arith.addf %337, %338 : vector<2x128xf32>
    %340 = arith.addf %336, %339 : vector<2x128xf32>
    %341 = vector.extract_strided_slice %340 {offsets = [0, 0], sizes = [2, 32], strides = [1, 1]} : vector<2x128xf32> to vector<2x32xf32>
    %cst_115 = arith.constant 5.000000e-01 : f32
    %342 = vector.broadcast %cst_115 : f32 to vector<2x32xf32>
    %343 = arith.mulf %342, %341 : vector<2x32xf32>
    %344 = math.tanh %343 : vector<2x32xf32>
    %cst_116 = arith.constant 1.000000e+00 : f32
    %345 = vector.broadcast %cst_116 : f32 to vector<2x32xf32>
    %346 = arith.addf %344, %345 : vector<2x32xf32>
    %cst_117 = arith.constant 5.000000e-01 : f32
    %347 = vector.broadcast %cst_117 : f32 to vector<2x32xf32>
    %348 = arith.mulf %347, %346 : vector<2x32xf32>
    %349 = vector.extract_strided_slice %340 {offsets = [0, 32], sizes = [2, 32], strides = [1, 1]} : vector<2x128xf32> to vector<2x32xf32>
    %cst_118 = arith.constant 5.000000e-01 : f32
    %350 = vector.broadcast %cst_118 : f32 to vector<2x32xf32>
    %351 = arith.mulf %350, %349 : vector<2x32xf32>
    %352 = math.tanh %351 : vector<2x32xf32>
    %cst_119 = arith.constant 1.000000e+00 : f32
    %353 = vector.broadcast %cst_119 : f32 to vector<2x32xf32>
    %354 = arith.addf %352, %353 : vector<2x32xf32>
    %cst_120 = arith.constant 5.000000e-01 : f32
    %355 = vector.broadcast %cst_120 : f32 to vector<2x32xf32>
    %356 = arith.mulf %355, %354 : vector<2x32xf32>
    %357 = vector.extract_strided_slice %336 {offsets = [0, 64], sizes = [2, 32], strides = [1, 1]} : vector<2x128xf32> to vector<2x32xf32>
    %358 = vector.extract_strided_slice %339 {offsets = [0, 64], sizes = [2, 32], strides = [1, 1]} : vector<2x128xf32> to vector<2x32xf32>
    %359 = arith.mulf %348, %358 : vector<2x32xf32>
    %360 = arith.addf %357, %359 : vector<2x32xf32>
    %361 = math.tanh %360 : vector<2x32xf32>
    %cst_121 = arith.constant 1.000000e+00 : f32
    %362 = vector.broadcast %cst_121 : f32 to vector<2x32xf32>
    %363 = arith.subf %362, %356 : vector<2x32xf32>
    %364 = arith.mulf %363, %361 : vector<2x32xf32>
    %365 = arith.mulf %356, %302 : vector<2x32xf32>
    %366 = arith.addf %364, %365 : vector<2x32xf32>
    %367 = vector.extract_strided_slice %0 {offsets = [4, 0, 0], sizes = [1, 2, 32], strides = [1, 1, 1]} : vector<8x2x32xf32> to vector<1x2x32xf32>
    %368 = vector.shape_cast %367 : vector<1x2x32xf32> to vector<2x32xf32>
    %cst_122 = arith.constant 0.000000e+00 : f32
    %369 = vector.broadcast %cst_122 : f32 to vector<2x32xf32>
    %370 = arith.cmpf one, %368, %369 : vector<2x32xf32>
    %371 = arith.select %370, %334, %297 : vector<2x32xi1>, vector<2x32xf32>
    %372 = vector.extract_strided_slice %0 {offsets = [3, 0, 0], sizes = [1, 2, 32], strides = [1, 1, 1]} : vector<8x2x32xf32> to vector<1x2x32xf32>
    %373 = vector.shape_cast %372 : vector<1x2x32xf32> to vector<2x32xf32>
    %cst_123 = arith.constant 0.000000e+00 : f32
    %374 = vector.broadcast %cst_123 : f32 to vector<2x32xf32>
    %375 = arith.cmpf one, %373, %374 : vector<2x32xf32>
    %376 = arith.select %375, %366, %302 : vector<2x32xi1>, vector<2x32xf32>
    %c5_124 = arith.constant 5 : index
    %c0_125 = arith.constant 0 : index
    %c0_126 = arith.constant 0 : index
    %377 = vector.load %arg0[%c5_124, %c0_125, %c0_126] : memref<8x2x128xf32, #tpu.memory_space<vmem>>, vector<1x2x128xf32>
    %378 = vector.shape_cast %377 : vector<1x2x128xf32> to vector<2x128xf32>
    %cst_127 = arith.constant dense<0.000000e+00> : vector<2x128xf32>
    %379 = tpu.matmul %371, %1, %cst_127 {dimension_numbers = #tpu.dot_dimension_numbers<[1], [0], [0], [1], [0, 0, 1, 1], [], []>} : vector<2x32xf32>, vector<32x128xf32>, vector<2x128xf32> -> vector<2x128xf32>
    %380 = vector.broadcast %2 : vector<1x128xf32> to vector<2x128xf32>
    %381 = arith.addf %379, %380 : vector<2x128xf32>
    %382 = arith.addf %378, %381 : vector<2x128xf32>
    %383 = vector.extract_strided_slice %382 {offsets = [0, 0], sizes = [2, 32], strides = [1, 1]} : vector<2x128xf32> to vector<2x32xf32>
    %cst_128 = arith.constant 5.000000e-01 : f32
    %384 = vector.broadcast %cst_128 : f32 to vector<2x32xf32>
    %385 = arith.mulf %384, %383 : vector<2x32xf32>
    %386 = math.tanh %385 : vector<2x32xf32>
    %cst_129 = arith.constant 1.000000e+00 : f32
    %387 = vector.broadcast %cst_129 : f32 to vector<2x32xf32>
    %388 = arith.addf %386, %387 : vector<2x32xf32>
    %cst_130 = arith.constant 5.000000e-01 : f32
    %389 = vector.broadcast %cst_130 : f32 to vector<2x32xf32>
    %390 = arith.mulf %389, %388 : vector<2x32xf32>
    %391 = vector.extract_strided_slice %382 {offsets = [0, 32], sizes = [2, 32], strides = [1, 1]} : vector<2x128xf32> to vector<2x32xf32>
    %cst_131 = arith.constant 5.000000e-01 : f32
    %392 = vector.broadcast %cst_131 : f32 to vector<2x32xf32>
    %393 = arith.mulf %392, %391 : vector<2x32xf32>
    %394 = math.tanh %393 : vector<2x32xf32>
    %cst_132 = arith.constant 1.000000e+00 : f32
    %395 = vector.broadcast %cst_132 : f32 to vector<2x32xf32>
    %396 = arith.addf %394, %395 : vector<2x32xf32>
    %cst_133 = arith.constant 5.000000e-01 : f32
    %397 = vector.broadcast %cst_133 : f32 to vector<2x32xf32>
    %398 = arith.mulf %397, %396 : vector<2x32xf32>
    %399 = vector.extract_strided_slice %378 {offsets = [0, 64], sizes = [2, 32], strides = [1, 1]} : vector<2x128xf32> to vector<2x32xf32>
    %400 = vector.extract_strided_slice %381 {offsets = [0, 64], sizes = [2, 32], strides = [1, 1]} : vector<2x128xf32> to vector<2x32xf32>
    %401 = arith.mulf %390, %400 : vector<2x32xf32>
    %402 = arith.addf %399, %401 : vector<2x32xf32>
    %403 = math.tanh %402 : vector<2x32xf32>
    %cst_134 = arith.constant 1.000000e+00 : f32
    %404 = vector.broadcast %cst_134 : f32 to vector<2x32xf32>
    %405 = arith.subf %404, %398 : vector<2x32xf32>
    %406 = arith.mulf %405, %403 : vector<2x32xf32>
    %407 = arith.mulf %398, %371 : vector<2x32xf32>
    %408 = arith.addf %406, %407 : vector<2x32xf32>
    %c2_135 = arith.constant 2 : index
    %c0_136 = arith.constant 0 : index
    %c0_137 = arith.constant 0 : index
    %409 = vector.load %arg1[%c2_135, %c0_136, %c0_137] : memref<8x2x128xf32, #tpu.memory_space<vmem>>, vector<1x2x128xf32>
    %410 = vector.shape_cast %409 : vector<1x2x128xf32> to vector<2x128xf32>
    %cst_138 = arith.constant dense<0.000000e+00> : vector<2x128xf32>
    %411 = tpu.matmul %376, %3, %cst_138 {dimension_numbers = #tpu.dot_dimension_numbers<[1], [0], [0], [1], [0, 0, 1, 1], [], []>} : vector<2x32xf32>, vector<32x128xf32>, vector<2x128xf32> -> vector<2x128xf32>
    %412 = vector.broadcast %4 : vector<1x128xf32> to vector<2x128xf32>
    %413 = arith.addf %411, %412 : vector<2x128xf32>
    %414 = arith.addf %410, %413 : vector<2x128xf32>
    %415 = vector.extract_strided_slice %414 {offsets = [0, 0], sizes = [2, 32], strides = [1, 1]} : vector<2x128xf32> to vector<2x32xf32>
    %cst_139 = arith.constant 5.000000e-01 : f32
    %416 = vector.broadcast %cst_139 : f32 to vector<2x32xf32>
    %417 = arith.mulf %416, %415 : vector<2x32xf32>
    %418 = math.tanh %417 : vector<2x32xf32>
    %cst_140 = arith.constant 1.000000e+00 : f32
    %419 = vector.broadcast %cst_140 : f32 to vector<2x32xf32>
    %420 = arith.addf %418, %419 : vector<2x32xf32>
    %cst_141 = arith.constant 5.000000e-01 : f32
    %421 = vector.broadcast %cst_141 : f32 to vector<2x32xf32>
    %422 = arith.mulf %421, %420 : vector<2x32xf32>
    %423 = vector.extract_strided_slice %414 {offsets = [0, 32], sizes = [2, 32], strides = [1, 1]} : vector<2x128xf32> to vector<2x32xf32>
    %cst_142 = arith.constant 5.000000e-01 : f32
    %424 = vector.broadcast %cst_142 : f32 to vector<2x32xf32>
    %425 = arith.mulf %424, %423 : vector<2x32xf32>
    %426 = math.tanh %425 : vector<2x32xf32>
    %cst_143 = arith.constant 1.000000e+00 : f32
    %427 = vector.broadcast %cst_143 : f32 to vector<2x32xf32>
    %428 = arith.addf %426, %427 : vector<2x32xf32>
    %cst_144 = arith.constant 5.000000e-01 : f32
    %429 = vector.broadcast %cst_144 : f32 to vector<2x32xf32>
    %430 = arith.mulf %429, %428 : vector<2x32xf32>
    %431 = vector.extract_strided_slice %410 {offsets = [0, 64], sizes = [2, 32], strides = [1, 1]} : vector<2x128xf32> to vector<2x32xf32>
    %432 = vector.extract_strided_slice %413 {offsets = [0, 64], sizes = [2, 32], strides = [1, 1]} : vector<2x128xf32> to vector<2x32xf32>
    %433 = arith.mulf %422, %432 : vector<2x32xf32>
    %434 = arith.addf %431, %433 : vector<2x32xf32>
    %435 = math.tanh %434 : vector<2x32xf32>
    %cst_145 = arith.constant 1.000000e+00 : f32
    %436 = vector.broadcast %cst_145 : f32 to vector<2x32xf32>
    %437 = arith.subf %436, %430 : vector<2x32xf32>
    %438 = arith.mulf %437, %435 : vector<2x32xf32>
    %439 = arith.mulf %430, %376 : vector<2x32xf32>
    %440 = arith.addf %438, %439 : vector<2x32xf32>
    %441 = vector.extract_strided_slice %0 {offsets = [5, 0, 0], sizes = [1, 2, 32], strides = [1, 1, 1]} : vector<8x2x32xf32> to vector<1x2x32xf32>
    %442 = vector.shape_cast %441 : vector<1x2x32xf32> to vector<2x32xf32>
    %cst_146 = arith.constant 0.000000e+00 : f32
    %443 = vector.broadcast %cst_146 : f32 to vector<2x32xf32>
    %444 = arith.cmpf one, %442, %443 : vector<2x32xf32>
    %445 = arith.select %444, %408, %371 : vector<2x32xi1>, vector<2x32xf32>
    %446 = vector.extract_strided_slice %0 {offsets = [2, 0, 0], sizes = [1, 2, 32], strides = [1, 1, 1]} : vector<8x2x32xf32> to vector<1x2x32xf32>
    %447 = vector.shape_cast %446 : vector<1x2x32xf32> to vector<2x32xf32>
    %cst_147 = arith.constant 0.000000e+00 : f32
    %448 = vector.broadcast %cst_147 : f32 to vector<2x32xf32>
    %449 = arith.cmpf one, %447, %448 : vector<2x32xf32>
    %450 = arith.select %449, %440, %376 : vector<2x32xi1>, vector<2x32xf32>
    %c6_148 = arith.constant 6 : index
    %c0_149 = arith.constant 0 : index
    %c0_150 = arith.constant 0 : index
    %451 = vector.load %arg0[%c6_148, %c0_149, %c0_150] : memref<8x2x128xf32, #tpu.memory_space<vmem>>, vector<1x2x128xf32>
    %452 = vector.shape_cast %451 : vector<1x2x128xf32> to vector<2x128xf32>
    %cst_151 = arith.constant dense<0.000000e+00> : vector<2x128xf32>
    %453 = tpu.matmul %445, %1, %cst_151 {dimension_numbers = #tpu.dot_dimension_numbers<[1], [0], [0], [1], [0, 0, 1, 1], [], []>} : vector<2x32xf32>, vector<32x128xf32>, vector<2x128xf32> -> vector<2x128xf32>
    %454 = vector.broadcast %2 : vector<1x128xf32> to vector<2x128xf32>
    %455 = arith.addf %453, %454 : vector<2x128xf32>
    %456 = arith.addf %452, %455 : vector<2x128xf32>
    %457 = vector.extract_strided_slice %456 {offsets = [0, 0], sizes = [2, 32], strides = [1, 1]} : vector<2x128xf32> to vector<2x32xf32>
    %cst_152 = arith.constant 5.000000e-01 : f32
    %458 = vector.broadcast %cst_152 : f32 to vector<2x32xf32>
    %459 = arith.mulf %458, %457 : vector<2x32xf32>
    %460 = math.tanh %459 : vector<2x32xf32>
    %cst_153 = arith.constant 1.000000e+00 : f32
    %461 = vector.broadcast %cst_153 : f32 to vector<2x32xf32>
    %462 = arith.addf %460, %461 : vector<2x32xf32>
    %cst_154 = arith.constant 5.000000e-01 : f32
    %463 = vector.broadcast %cst_154 : f32 to vector<2x32xf32>
    %464 = arith.mulf %463, %462 : vector<2x32xf32>
    %465 = vector.extract_strided_slice %456 {offsets = [0, 32], sizes = [2, 32], strides = [1, 1]} : vector<2x128xf32> to vector<2x32xf32>
    %cst_155 = arith.constant 5.000000e-01 : f32
    %466 = vector.broadcast %cst_155 : f32 to vector<2x32xf32>
    %467 = arith.mulf %466, %465 : vector<2x32xf32>
    %468 = math.tanh %467 : vector<2x32xf32>
    %cst_156 = arith.constant 1.000000e+00 : f32
    %469 = vector.broadcast %cst_156 : f32 to vector<2x32xf32>
    %470 = arith.addf %468, %469 : vector<2x32xf32>
    %cst_157 = arith.constant 5.000000e-01 : f32
    %471 = vector.broadcast %cst_157 : f32 to vector<2x32xf32>
    %472 = arith.mulf %471, %470 : vector<2x32xf32>
    %473 = vector.extract_strided_slice %452 {offsets = [0, 64], sizes = [2, 32], strides = [1, 1]} : vector<2x128xf32> to vector<2x32xf32>
    %474 = vector.extract_strided_slice %455 {offsets = [0, 64], sizes = [2, 32], strides = [1, 1]} : vector<2x128xf32> to vector<2x32xf32>
    %475 = arith.mulf %464, %474 : vector<2x32xf32>
    %476 = arith.addf %473, %475 : vector<2x32xf32>
    %477 = math.tanh %476 : vector<2x32xf32>
    %cst_158 = arith.constant 1.000000e+00 : f32
    %478 = vector.broadcast %cst_158 : f32 to vector<2x32xf32>
    %479 = arith.subf %478, %472 : vector<2x32xf32>
    %480 = arith.mulf %479, %477 : vector<2x32xf32>
    %481 = arith.mulf %472, %445 : vector<2x32xf32>
    %482 = arith.addf %480, %481 : vector<2x32xf32>
    %c1_159 = arith.constant 1 : index
    %c0_160 = arith.constant 0 : index
    %c0_161 = arith.constant 0 : index
    %483 = vector.load %arg1[%c1_159, %c0_160, %c0_161] : memref<8x2x128xf32, #tpu.memory_space<vmem>>, vector<1x2x128xf32>
    %484 = vector.shape_cast %483 : vector<1x2x128xf32> to vector<2x128xf32>
    %cst_162 = arith.constant dense<0.000000e+00> : vector<2x128xf32>
    %485 = tpu.matmul %450, %3, %cst_162 {dimension_numbers = #tpu.dot_dimension_numbers<[1], [0], [0], [1], [0, 0, 1, 1], [], []>} : vector<2x32xf32>, vector<32x128xf32>, vector<2x128xf32> -> vector<2x128xf32>
    %486 = vector.broadcast %4 : vector<1x128xf32> to vector<2x128xf32>
    %487 = arith.addf %485, %486 : vector<2x128xf32>
    %488 = arith.addf %484, %487 : vector<2x128xf32>
    %489 = vector.extract_strided_slice %488 {offsets = [0, 0], sizes = [2, 32], strides = [1, 1]} : vector<2x128xf32> to vector<2x32xf32>
    %cst_163 = arith.constant 5.000000e-01 : f32
    %490 = vector.broadcast %cst_163 : f32 to vector<2x32xf32>
    %491 = arith.mulf %490, %489 : vector<2x32xf32>
    %492 = math.tanh %491 : vector<2x32xf32>
    %cst_164 = arith.constant 1.000000e+00 : f32
    %493 = vector.broadcast %cst_164 : f32 to vector<2x32xf32>
    %494 = arith.addf %492, %493 : vector<2x32xf32>
    %cst_165 = arith.constant 5.000000e-01 : f32
    %495 = vector.broadcast %cst_165 : f32 to vector<2x32xf32>
    %496 = arith.mulf %495, %494 : vector<2x32xf32>
    %497 = vector.extract_strided_slice %488 {offsets = [0, 32], sizes = [2, 32], strides = [1, 1]} : vector<2x128xf32> to vector<2x32xf32>
    %cst_166 = arith.constant 5.000000e-01 : f32
    %498 = vector.broadcast %cst_166 : f32 to vector<2x32xf32>
    %499 = arith.mulf %498, %497 : vector<2x32xf32>
    %500 = math.tanh %499 : vector<2x32xf32>
    %cst_167 = arith.constant 1.000000e+00 : f32
    %501 = vector.broadcast %cst_167 : f32 to vector<2x32xf32>
    %502 = arith.addf %500, %501 : vector<2x32xf32>
    %cst_168 = arith.constant 5.000000e-01 : f32
    %503 = vector.broadcast %cst_168 : f32 to vector<2x32xf32>
    %504 = arith.mulf %503, %502 : vector<2x32xf32>
    %505 = vector.extract_strided_slice %484 {offsets = [0, 64], sizes = [2, 32], strides = [1, 1]} : vector<2x128xf32> to vector<2x32xf32>
    %506 = vector.extract_strided_slice %487 {offsets = [0, 64], sizes = [2, 32], strides = [1, 1]} : vector<2x128xf32> to vector<2x32xf32>
    %507 = arith.mulf %496, %506 : vector<2x32xf32>
    %508 = arith.addf %505, %507 : vector<2x32xf32>
    %509 = math.tanh %508 : vector<2x32xf32>
    %cst_169 = arith.constant 1.000000e+00 : f32
    %510 = vector.broadcast %cst_169 : f32 to vector<2x32xf32>
    %511 = arith.subf %510, %504 : vector<2x32xf32>
    %512 = arith.mulf %511, %509 : vector<2x32xf32>
    %513 = arith.mulf %504, %450 : vector<2x32xf32>
    %514 = arith.addf %512, %513 : vector<2x32xf32>
    %515 = vector.extract_strided_slice %0 {offsets = [6, 0, 0], sizes = [1, 2, 32], strides = [1, 1, 1]} : vector<8x2x32xf32> to vector<1x2x32xf32>
    %516 = vector.shape_cast %515 : vector<1x2x32xf32> to vector<2x32xf32>
    %cst_170 = arith.constant 0.000000e+00 : f32
    %517 = vector.broadcast %cst_170 : f32 to vector<2x32xf32>
    %518 = arith.cmpf one, %516, %517 : vector<2x32xf32>
    %519 = arith.select %518, %482, %445 : vector<2x32xi1>, vector<2x32xf32>
    %520 = vector.extract_strided_slice %0 {offsets = [1, 0, 0], sizes = [1, 2, 32], strides = [1, 1, 1]} : vector<8x2x32xf32> to vector<1x2x32xf32>
    %521 = vector.shape_cast %520 : vector<1x2x32xf32> to vector<2x32xf32>
    %cst_171 = arith.constant 0.000000e+00 : f32
    %522 = vector.broadcast %cst_171 : f32 to vector<2x32xf32>
    %523 = arith.cmpf one, %521, %522 : vector<2x32xf32>
    %524 = arith.select %523, %514, %450 : vector<2x32xi1>, vector<2x32xf32>
    %c7_172 = arith.constant 7 : index
    %c0_173 = arith.constant 0 : index
    %c0_174 = arith.constant 0 : index
    %525 = vector.load %arg0[%c7_172, %c0_173, %c0_174] : memref<8x2x128xf32, #tpu.memory_space<vmem>>, vector<1x2x128xf32>
    %526 = vector.shape_cast %525 : vector<1x2x128xf32> to vector<2x128xf32>
    %cst_175 = arith.constant dense<0.000000e+00> : vector<2x128xf32>
    %527 = tpu.matmul %519, %1, %cst_175 {dimension_numbers = #tpu.dot_dimension_numbers<[1], [0], [0], [1], [0, 0, 1, 1], [], []>} : vector<2x32xf32>, vector<32x128xf32>, vector<2x128xf32> -> vector<2x128xf32>
    %528 = vector.broadcast %2 : vector<1x128xf32> to vector<2x128xf32>
    %529 = arith.addf %527, %528 : vector<2x128xf32>
    %530 = arith.addf %526, %529 : vector<2x128xf32>
    %531 = vector.extract_strided_slice %530 {offsets = [0, 0], sizes = [2, 32], strides = [1, 1]} : vector<2x128xf32> to vector<2x32xf32>
    %cst_176 = arith.constant 5.000000e-01 : f32
    %532 = vector.broadcast %cst_176 : f32 to vector<2x32xf32>
    %533 = arith.mulf %532, %531 : vector<2x32xf32>
    %534 = math.tanh %533 : vector<2x32xf32>
    %cst_177 = arith.constant 1.000000e+00 : f32
    %535 = vector.broadcast %cst_177 : f32 to vector<2x32xf32>
    %536 = arith.addf %534, %535 : vector<2x32xf32>
    %cst_178 = arith.constant 5.000000e-01 : f32
    %537 = vector.broadcast %cst_178 : f32 to vector<2x32xf32>
    %538 = arith.mulf %537, %536 : vector<2x32xf32>
    %539 = vector.extract_strided_slice %530 {offsets = [0, 32], sizes = [2, 32], strides = [1, 1]} : vector<2x128xf32> to vector<2x32xf32>
    %cst_179 = arith.constant 5.000000e-01 : f32
    %540 = vector.broadcast %cst_179 : f32 to vector<2x32xf32>
    %541 = arith.mulf %540, %539 : vector<2x32xf32>
    %542 = math.tanh %541 : vector<2x32xf32>
    %cst_180 = arith.constant 1.000000e+00 : f32
    %543 = vector.broadcast %cst_180 : f32 to vector<2x32xf32>
    %544 = arith.addf %542, %543 : vector<2x32xf32>
    %cst_181 = arith.constant 5.000000e-01 : f32
    %545 = vector.broadcast %cst_181 : f32 to vector<2x32xf32>
    %546 = arith.mulf %545, %544 : vector<2x32xf32>
    %547 = vector.extract_strided_slice %526 {offsets = [0, 64], sizes = [2, 32], strides = [1, 1]} : vector<2x128xf32> to vector<2x32xf32>
    %548 = vector.extract_strided_slice %529 {offsets = [0, 64], sizes = [2, 32], strides = [1, 1]} : vector<2x128xf32> to vector<2x32xf32>
    %549 = arith.mulf %538, %548 : vector<2x32xf32>
    %550 = arith.addf %547, %549 : vector<2x32xf32>
    %551 = math.tanh %550 : vector<2x32xf32>
    %cst_182 = arith.constant 1.000000e+00 : f32
    %552 = vector.broadcast %cst_182 : f32 to vector<2x32xf32>
    %553 = arith.subf %552, %546 : vector<2x32xf32>
    %554 = arith.mulf %553, %551 : vector<2x32xf32>
    %555 = arith.mulf %546, %519 : vector<2x32xf32>
    %556 = arith.addf %554, %555 : vector<2x32xf32>
    %c0_183 = arith.constant 0 : index
    %c0_184 = arith.constant 0 : index
    %c0_185 = arith.constant 0 : index
    %557 = vector.load %arg1[%c0_183, %c0_184, %c0_185] : memref<8x2x128xf32, #tpu.memory_space<vmem>>, vector<1x2x128xf32>
    %558 = vector.shape_cast %557 : vector<1x2x128xf32> to vector<2x128xf32>
    %cst_186 = arith.constant dense<0.000000e+00> : vector<2x128xf32>
    %559 = tpu.matmul %524, %3, %cst_186 {dimension_numbers = #tpu.dot_dimension_numbers<[1], [0], [0], [1], [0, 0, 1, 1], [], []>} : vector<2x32xf32>, vector<32x128xf32>, vector<2x128xf32> -> vector<2x128xf32>
    %560 = vector.broadcast %4 : vector<1x128xf32> to vector<2x128xf32>
    %561 = arith.addf %559, %560 : vector<2x128xf32>
    %562 = arith.addf %558, %561 : vector<2x128xf32>
    %563 = vector.extract_strided_slice %562 {offsets = [0, 0], sizes = [2, 32], strides = [1, 1]} : vector<2x128xf32> to vector<2x32xf32>
    %cst_187 = arith.constant 5.000000e-01 : f32
    %564 = vector.broadcast %cst_187 : f32 to vector<2x32xf32>
    %565 = arith.mulf %564, %563 : vector<2x32xf32>
    %566 = math.tanh %565 : vector<2x32xf32>
    %cst_188 = arith.constant 1.000000e+00 : f32
    %567 = vector.broadcast %cst_188 : f32 to vector<2x32xf32>
    %568 = arith.addf %566, %567 : vector<2x32xf32>
    %cst_189 = arith.constant 5.000000e-01 : f32
    %569 = vector.broadcast %cst_189 : f32 to vector<2x32xf32>
    %570 = arith.mulf %569, %568 : vector<2x32xf32>
    %571 = vector.extract_strided_slice %562 {offsets = [0, 32], sizes = [2, 32], strides = [1, 1]} : vector<2x128xf32> to vector<2x32xf32>
    %cst_190 = arith.constant 5.000000e-01 : f32
    %572 = vector.broadcast %cst_190 : f32 to vector<2x32xf32>
    %573 = arith.mulf %572, %571 : vector<2x32xf32>
    %574 = math.tanh %573 : vector<2x32xf32>
    %cst_191 = arith.constant 1.000000e+00 : f32
    %575 = vector.broadcast %cst_191 : f32 to vector<2x32xf32>
    %576 = arith.addf %574, %575 : vector<2x32xf32>
    %cst_192 = arith.constant 5.000000e-01 : f32
    %577 = vector.broadcast %cst_192 : f32 to vector<2x32xf32>
    %578 = arith.mulf %577, %576 : vector<2x32xf32>
    %579 = vector.extract_strided_slice %558 {offsets = [0, 64], sizes = [2, 32], strides = [1, 1]} : vector<2x128xf32> to vector<2x32xf32>
    %580 = vector.extract_strided_slice %561 {offsets = [0, 64], sizes = [2, 32], strides = [1, 1]} : vector<2x128xf32> to vector<2x32xf32>
    %581 = arith.mulf %570, %580 : vector<2x32xf32>
    %582 = arith.addf %579, %581 : vector<2x32xf32>
    %583 = math.tanh %582 : vector<2x32xf32>
    %cst_193 = arith.constant 1.000000e+00 : f32
    %584 = vector.broadcast %cst_193 : f32 to vector<2x32xf32>
    %585 = arith.subf %584, %578 : vector<2x32xf32>
    %586 = arith.mulf %585, %583 : vector<2x32xf32>
    %587 = arith.mulf %578, %524 : vector<2x32xf32>
    %588 = arith.addf %586, %587 : vector<2x32xf32>
    %589 = vector.extract_strided_slice %0 {offsets = [7, 0, 0], sizes = [1, 2, 32], strides = [1, 1, 1]} : vector<8x2x32xf32> to vector<1x2x32xf32>
    %590 = vector.shape_cast %589 : vector<1x2x32xf32> to vector<2x32xf32>
    %cst_194 = arith.constant 0.000000e+00 : f32
    %591 = vector.broadcast %cst_194 : f32 to vector<2x32xf32>
    %592 = arith.cmpf one, %590, %591 : vector<2x32xf32>
    %593 = arith.select %592, %556, %519 : vector<2x32xi1>, vector<2x32xf32>
    %594 = vector.extract_strided_slice %0 {offsets = [0, 0, 0], sizes = [1, 2, 32], strides = [1, 1, 1]} : vector<8x2x32xf32> to vector<1x2x32xf32>
    %595 = vector.shape_cast %594 : vector<1x2x32xf32> to vector<2x32xf32>
    %cst_195 = arith.constant 0.000000e+00 : f32
    %596 = vector.broadcast %cst_195 : f32 to vector<2x32xf32>
    %597 = arith.cmpf one, %595, %596 : vector<2x32xf32>
    %598 = arith.select %597, %588, %524 : vector<2x32xi1>, vector<2x32xf32>
    %c0_196 = arith.constant 0 : index
    %c0_197 = arith.constant 0 : index
    %599 = vector.load %arg11[%c0_196, %c0_197] : memref<32x256xf32, #tpu.memory_space<vmem>>, vector<32x256xf32>
    %cst_198 = arith.constant dense<0.000000e+00> : vector<2x256xf32>
    %600 = tpu.matmul %593, %599, %cst_198 {dimension_numbers = #tpu.dot_dimension_numbers<[1], [0], [0], [1], [0, 0, 1, 1], [], []>} : vector<2x32xf32>, vector<32x256xf32>, vector<2x256xf32> -> vector<2x256xf32>
    %c0_199 = arith.constant 0 : index
    %c0_200 = arith.constant 0 : index
    %601 = vector.load %arg12[%c0_199, %c0_200] : memref<32x256xf32, #tpu.memory_space<vmem>>, vector<32x256xf32>
    %cst_201 = arith.constant dense<0.000000e+00> : vector<2x256xf32>
    %602 = tpu.matmul %598, %601, %cst_201 {dimension_numbers = #tpu.dot_dimension_numbers<[1], [0], [0], [1], [0, 0, 1, 1], [], []>} : vector<2x32xf32>, vector<32x256xf32>, vector<2x256xf32> -> vector<2x256xf32>
    %603 = arith.addf %600, %602 : vector<2x256xf32>
    %c0_202 = arith.constant 0 : index
    %c0_203 = arith.constant 0 : index
    %604 = vector.load %arg13[%c0_202, %c0_203] : memref<1x256xf32, #tpu.memory_space<vmem>>, vector<1x256xf32>
    %605 = vector.broadcast %604 : vector<1x256xf32> to vector<2x256xf32>
    %606 = arith.addf %603, %605 : vector<2x256xf32>
    %607 = vector.extract_strided_slice %606 {offsets = [0, 0], sizes = [2, 128], strides = [1, 1]} : vector<2x256xf32> to vector<2x128xf32>
    %608 = vector.extract_strided_slice %606 {offsets = [0, 128], sizes = [2, 128], strides = [1, 1]} : vector<2x256xf32> to vector<2x128xf32>
    %cst_204 = arith.constant 5.000000e-01 : f32
    %609 = vector.broadcast %cst_204 : f32 to vector<2x128xf32>
    %610 = arith.mulf %609, %608 : vector<2x128xf32>
    %611 = math.exp %610 : vector<2x128xf32>
    %c0_205 = arith.constant 0 : index
    %c0_206 = arith.constant 0 : index
    %612 = vector.load %arg6[%c0_205, %c0_206] : memref<2x128xf32, #tpu.memory_space<vmem>>, vector<2x128xf32>
    %613 = arith.mulf %611, %612 : vector<2x128xf32>
    %614 = arith.addf %607, %613 : vector<2x128xf32>
    %615 = math.exp %608 : vector<2x128xf32>
    %616 = arith.mulf %607, %607 : vector<2x128xf32>
    %617 = arith.addf %615, %616 : vector<2x128xf32>
    %cst_207 = arith.constant 1.000000e+00 : f32
    %618 = vector.broadcast %cst_207 : f32 to vector<2x128xf32>
    %619 = arith.subf %617, %618 : vector<2x128xf32>
    %620 = arith.subf %619, %608 : vector<2x128xf32>
    %cst_208 = arith.constant dense<0.000000e+00> : vector<2xf32>
    %621 = vector.multi_reduction <add>, %620, %cst_208 [1] : vector<2x128xf32> to vector<2xf32>
    %622 = vector.shape_cast %621 : vector<2xf32> to vector<2x1xf32>
    %cst_209 = arith.constant dense<0.000000e+00> : vector<1xf32>
    %623 = vector.multi_reduction <add>, %622, %cst_209 [0] : vector<2x1xf32> to vector<1xf32>
    %624 = vector.shape_cast %623 : vector<1xf32> to vector<1x1xf32>
    %cst_210 = arith.constant 2.000000e+00 : f32
    %625 = vector.broadcast %cst_210 : f32 to vector<1x1xf32>
    %626 = arith.divf %624, %625 : vector<1x1xf32>
    %cst_211 = arith.constant 5.000000e-01 : f32
    %627 = vector.broadcast %cst_211 : f32 to vector<1x1xf32>
    %628 = arith.mulf %627, %626 : vector<1x1xf32>
    %c0_212 = arith.constant 0 : index
    %c0_213 = arith.constant 0 : index
    %629 = vector.load %arg14[%c0_212, %c0_213] : memref<128x256xf32, #tpu.memory_space<vmem>>, vector<128x256xf32>
    %cst_214 = arith.constant dense<0.000000e+00> : vector<2x256xf32>
    %630 = tpu.matmul %614, %629, %cst_214 {dimension_numbers = #tpu.dot_dimension_numbers<[1], [0], [0], [1], [0, 0, 1, 1], [], []>} : vector<2x128xf32>, vector<128x256xf32>, vector<2x256xf32> -> vector<2x256xf32>
    %c0_215 = arith.constant 0 : index
    %c0_216 = arith.constant 0 : index
    %631 = vector.load %arg15[%c0_215, %c0_216] : memref<1x256xf32, #tpu.memory_space<vmem>>, vector<1x256xf32>
    %632 = vector.broadcast %631 : vector<1x256xf32> to vector<2x256xf32>
    %633 = arith.addf %630, %632 : vector<2x256xf32>
    %634 = vector.extract_strided_slice %633 {offsets = [0, 0], sizes = [2, 32], strides = [1, 1]} : vector<2x256xf32> to vector<2x32xf32>
    %635 = vector.extract_strided_slice %633 {offsets = [0, 128], sizes = [2, 128], strides = [1, 1]} : vector<2x256xf32> to vector<2x128xf32>
    %c0_217 = arith.constant 0 : index
    %c0_218 = arith.constant 0 : index
    %636 = vector.load %arg16[%c0_217, %c0_218] : memref<32x128xf32, #tpu.memory_space<vmem>>, vector<32x128xf32>
    %c0_219 = arith.constant 0 : index
    %c0_220 = arith.constant 0 : index
    %637 = vector.load %arg17[%c0_219, %c0_220] : memref<1x128xf32, #tpu.memory_space<vmem>>, vector<1x128xf32>
    %c0_221 = arith.constant 0 : index
    %c0_222 = arith.constant 0 : index
    %c0_223 = arith.constant 0 : index
    %638 = vector.load %arg2[%c0_221, %c0_222, %c0_223] : memref<8x2x128xf32, #tpu.memory_space<vmem>>, vector<8x2x128xf32>
    %639 = vector.shape_cast %635 : vector<2x128xf32> to vector<1x2x128xf32>
    %640 = vector.broadcast %639 : vector<1x2x128xf32> to vector<8x2x128xf32>
    %641 = arith.addf %638, %640 : vector<8x2x128xf32>
    %642 = vector.extract_strided_slice %641 {offsets = [0, 0, 0], sizes = [1, 2, 128], strides = [1, 1, 1]} : vector<8x2x128xf32> to vector<1x2x128xf32>
    %643 = vector.shape_cast %642 : vector<1x2x128xf32> to vector<2x128xf32>
    %cst_224 = arith.constant dense<0.000000e+00> : vector<2x128xf32>
    %644 = tpu.matmul %634, %636, %cst_224 {dimension_numbers = #tpu.dot_dimension_numbers<[1], [0], [0], [1], [0, 0, 1, 1], [], []>} : vector<2x32xf32>, vector<32x128xf32>, vector<2x128xf32> -> vector<2x128xf32>
    %645 = vector.broadcast %637 : vector<1x128xf32> to vector<2x128xf32>
    %646 = arith.addf %644, %645 : vector<2x128xf32>
    %647 = arith.addf %643, %646 : vector<2x128xf32>
    %648 = vector.extract_strided_slice %647 {offsets = [0, 0], sizes = [2, 32], strides = [1, 1]} : vector<2x128xf32> to vector<2x32xf32>
    %cst_225 = arith.constant 5.000000e-01 : f32
    %649 = vector.broadcast %cst_225 : f32 to vector<2x32xf32>
    %650 = arith.mulf %649, %648 : vector<2x32xf32>
    %651 = math.tanh %650 : vector<2x32xf32>
    %cst_226 = arith.constant 1.000000e+00 : f32
    %652 = vector.broadcast %cst_226 : f32 to vector<2x32xf32>
    %653 = arith.addf %651, %652 : vector<2x32xf32>
    %cst_227 = arith.constant 5.000000e-01 : f32
    %654 = vector.broadcast %cst_227 : f32 to vector<2x32xf32>
    %655 = arith.mulf %654, %653 : vector<2x32xf32>
    %656 = vector.extract_strided_slice %647 {offsets = [0, 32], sizes = [2, 32], strides = [1, 1]} : vector<2x128xf32> to vector<2x32xf32>
    %cst_228 = arith.constant 5.000000e-01 : f32
    %657 = vector.broadcast %cst_228 : f32 to vector<2x32xf32>
    %658 = arith.mulf %657, %656 : vector<2x32xf32>
    %659 = math.tanh %658 : vector<2x32xf32>
    %cst_229 = arith.constant 1.000000e+00 : f32
    %660 = vector.broadcast %cst_229 : f32 to vector<2x32xf32>
    %661 = arith.addf %659, %660 : vector<2x32xf32>
    %cst_230 = arith.constant 5.000000e-01 : f32
    %662 = vector.broadcast %cst_230 : f32 to vector<2x32xf32>
    %663 = arith.mulf %662, %661 : vector<2x32xf32>
    %664 = vector.extract_strided_slice %643 {offsets = [0, 64], sizes = [2, 32], strides = [1, 1]} : vector<2x128xf32> to vector<2x32xf32>
    %665 = vector.extract_strided_slice %646 {offsets = [0, 64], sizes = [2, 32], strides = [1, 1]} : vector<2x128xf32> to vector<2x32xf32>
    %666 = arith.mulf %655, %665 : vector<2x32xf32>
    %667 = arith.addf %664, %666 : vector<2x32xf32>
    %668 = math.tanh %667 : vector<2x32xf32>
    %cst_231 = arith.constant 1.000000e+00 : f32
    %669 = vector.broadcast %cst_231 : f32 to vector<2x32xf32>
    %670 = arith.subf %669, %663 : vector<2x32xf32>
    %671 = arith.mulf %670, %668 : vector<2x32xf32>
    %672 = arith.mulf %663, %634 : vector<2x32xf32>
    %673 = arith.addf %671, %672 : vector<2x32xf32>
    %674 = vector.extract_strided_slice %0 {offsets = [0, 0, 0], sizes = [1, 2, 32], strides = [1, 1, 1]} : vector<8x2x32xf32> to vector<1x2x32xf32>
    %675 = vector.shape_cast %674 : vector<1x2x32xf32> to vector<2x32xf32>
    %cst_232 = arith.constant 0.000000e+00 : f32
    %676 = vector.broadcast %cst_232 : f32 to vector<2x32xf32>
    %677 = arith.cmpf one, %675, %676 : vector<2x32xf32>
    %678 = arith.select %677, %673, %634 : vector<2x32xi1>, vector<2x32xf32>
    %679 = vector.extract_strided_slice %641 {offsets = [1, 0, 0], sizes = [1, 2, 128], strides = [1, 1, 1]} : vector<8x2x128xf32> to vector<1x2x128xf32>
    %680 = vector.shape_cast %679 : vector<1x2x128xf32> to vector<2x128xf32>
    %cst_233 = arith.constant dense<0.000000e+00> : vector<2x128xf32>
    %681 = tpu.matmul %678, %636, %cst_233 {dimension_numbers = #tpu.dot_dimension_numbers<[1], [0], [0], [1], [0, 0, 1, 1], [], []>} : vector<2x32xf32>, vector<32x128xf32>, vector<2x128xf32> -> vector<2x128xf32>
    %682 = vector.broadcast %637 : vector<1x128xf32> to vector<2x128xf32>
    %683 = arith.addf %681, %682 : vector<2x128xf32>
    %684 = arith.addf %680, %683 : vector<2x128xf32>
    %685 = vector.extract_strided_slice %684 {offsets = [0, 0], sizes = [2, 32], strides = [1, 1]} : vector<2x128xf32> to vector<2x32xf32>
    %cst_234 = arith.constant 5.000000e-01 : f32
    %686 = vector.broadcast %cst_234 : f32 to vector<2x32xf32>
    %687 = arith.mulf %686, %685 : vector<2x32xf32>
    %688 = math.tanh %687 : vector<2x32xf32>
    %cst_235 = arith.constant 1.000000e+00 : f32
    %689 = vector.broadcast %cst_235 : f32 to vector<2x32xf32>
    %690 = arith.addf %688, %689 : vector<2x32xf32>
    %cst_236 = arith.constant 5.000000e-01 : f32
    %691 = vector.broadcast %cst_236 : f32 to vector<2x32xf32>
    %692 = arith.mulf %691, %690 : vector<2x32xf32>
    %693 = vector.extract_strided_slice %684 {offsets = [0, 32], sizes = [2, 32], strides = [1, 1]} : vector<2x128xf32> to vector<2x32xf32>
    %cst_237 = arith.constant 5.000000e-01 : f32
    %694 = vector.broadcast %cst_237 : f32 to vector<2x32xf32>
    %695 = arith.mulf %694, %693 : vector<2x32xf32>
    %696 = math.tanh %695 : vector<2x32xf32>
    %cst_238 = arith.constant 1.000000e+00 : f32
    %697 = vector.broadcast %cst_238 : f32 to vector<2x32xf32>
    %698 = arith.addf %696, %697 : vector<2x32xf32>
    %cst_239 = arith.constant 5.000000e-01 : f32
    %699 = vector.broadcast %cst_239 : f32 to vector<2x32xf32>
    %700 = arith.mulf %699, %698 : vector<2x32xf32>
    %701 = vector.extract_strided_slice %680 {offsets = [0, 64], sizes = [2, 32], strides = [1, 1]} : vector<2x128xf32> to vector<2x32xf32>
    %702 = vector.extract_strided_slice %683 {offsets = [0, 64], sizes = [2, 32], strides = [1, 1]} : vector<2x128xf32> to vector<2x32xf32>
    %703 = arith.mulf %692, %702 : vector<2x32xf32>
    %704 = arith.addf %701, %703 : vector<2x32xf32>
    %705 = math.tanh %704 : vector<2x32xf32>
    %cst_240 = arith.constant 1.000000e+00 : f32
    %706 = vector.broadcast %cst_240 : f32 to vector<2x32xf32>
    %707 = arith.subf %706, %700 : vector<2x32xf32>
    %708 = arith.mulf %707, %705 : vector<2x32xf32>
    %709 = arith.mulf %700, %678 : vector<2x32xf32>
    %710 = arith.addf %708, %709 : vector<2x32xf32>
    %711 = vector.extract_strided_slice %0 {offsets = [1, 0, 0], sizes = [1, 2, 32], strides = [1, 1, 1]} : vector<8x2x32xf32> to vector<1x2x32xf32>
    %712 = vector.shape_cast %711 : vector<1x2x32xf32> to vector<2x32xf32>
    %cst_241 = arith.constant 0.000000e+00 : f32
    %713 = vector.broadcast %cst_241 : f32 to vector<2x32xf32>
    %714 = arith.cmpf one, %712, %713 : vector<2x32xf32>
    %715 = arith.select %714, %710, %678 : vector<2x32xi1>, vector<2x32xf32>
    %716 = vector.extract_strided_slice %641 {offsets = [2, 0, 0], sizes = [1, 2, 128], strides = [1, 1, 1]} : vector<8x2x128xf32> to vector<1x2x128xf32>
    %717 = vector.shape_cast %716 : vector<1x2x128xf32> to vector<2x128xf32>
    %cst_242 = arith.constant dense<0.000000e+00> : vector<2x128xf32>
    %718 = tpu.matmul %715, %636, %cst_242 {dimension_numbers = #tpu.dot_dimension_numbers<[1], [0], [0], [1], [0, 0, 1, 1], [], []>} : vector<2x32xf32>, vector<32x128xf32>, vector<2x128xf32> -> vector<2x128xf32>
    %719 = vector.broadcast %637 : vector<1x128xf32> to vector<2x128xf32>
    %720 = arith.addf %718, %719 : vector<2x128xf32>
    %721 = arith.addf %717, %720 : vector<2x128xf32>
    %722 = vector.extract_strided_slice %721 {offsets = [0, 0], sizes = [2, 32], strides = [1, 1]} : vector<2x128xf32> to vector<2x32xf32>
    %cst_243 = arith.constant 5.000000e-01 : f32
    %723 = vector.broadcast %cst_243 : f32 to vector<2x32xf32>
    %724 = arith.mulf %723, %722 : vector<2x32xf32>
    %725 = math.tanh %724 : vector<2x32xf32>
    %cst_244 = arith.constant 1.000000e+00 : f32
    %726 = vector.broadcast %cst_244 : f32 to vector<2x32xf32>
    %727 = arith.addf %725, %726 : vector<2x32xf32>
    %cst_245 = arith.constant 5.000000e-01 : f32
    %728 = vector.broadcast %cst_245 : f32 to vector<2x32xf32>
    %729 = arith.mulf %728, %727 : vector<2x32xf32>
    %730 = vector.extract_strided_slice %721 {offsets = [0, 32], sizes = [2, 32], strides = [1, 1]} : vector<2x128xf32> to vector<2x32xf32>
    %cst_246 = arith.constant 5.000000e-01 : f32
    %731 = vector.broadcast %cst_246 : f32 to vector<2x32xf32>
    %732 = arith.mulf %731, %730 : vector<2x32xf32>
    %733 = math.tanh %732 : vector<2x32xf32>
    %cst_247 = arith.constant 1.000000e+00 : f32
    %734 = vector.broadcast %cst_247 : f32 to vector<2x32xf32>
    %735 = arith.addf %733, %734 : vector<2x32xf32>
    %cst_248 = arith.constant 5.000000e-01 : f32
    %736 = vector.broadcast %cst_248 : f32 to vector<2x32xf32>
    %737 = arith.mulf %736, %735 : vector<2x32xf32>
    %738 = vector.extract_strided_slice %717 {offsets = [0, 64], sizes = [2, 32], strides = [1, 1]} : vector<2x128xf32> to vector<2x32xf32>
    %739 = vector.extract_strided_slice %720 {offsets = [0, 64], sizes = [2, 32], strides = [1, 1]} : vector<2x128xf32> to vector<2x32xf32>
    %740 = arith.mulf %729, %739 : vector<2x32xf32>
    %741 = arith.addf %738, %740 : vector<2x32xf32>
    %742 = math.tanh %741 : vector<2x32xf32>
    %cst_249 = arith.constant 1.000000e+00 : f32
    %743 = vector.broadcast %cst_249 : f32 to vector<2x32xf32>
    %744 = arith.subf %743, %737 : vector<2x32xf32>
    %745 = arith.mulf %744, %742 : vector<2x32xf32>
    %746 = arith.mulf %737, %715 : vector<2x32xf32>
    %747 = arith.addf %745, %746 : vector<2x32xf32>
    %748 = vector.extract_strided_slice %0 {offsets = [2, 0, 0], sizes = [1, 2, 32], strides = [1, 1, 1]} : vector<8x2x32xf32> to vector<1x2x32xf32>
    %749 = vector.shape_cast %748 : vector<1x2x32xf32> to vector<2x32xf32>
    %cst_250 = arith.constant 0.000000e+00 : f32
    %750 = vector.broadcast %cst_250 : f32 to vector<2x32xf32>
    %751 = arith.cmpf one, %749, %750 : vector<2x32xf32>
    %752 = arith.select %751, %747, %715 : vector<2x32xi1>, vector<2x32xf32>
    %753 = vector.extract_strided_slice %641 {offsets = [3, 0, 0], sizes = [1, 2, 128], strides = [1, 1, 1]} : vector<8x2x128xf32> to vector<1x2x128xf32>
    %754 = vector.shape_cast %753 : vector<1x2x128xf32> to vector<2x128xf32>
    %cst_251 = arith.constant dense<0.000000e+00> : vector<2x128xf32>
    %755 = tpu.matmul %752, %636, %cst_251 {dimension_numbers = #tpu.dot_dimension_numbers<[1], [0], [0], [1], [0, 0, 1, 1], [], []>} : vector<2x32xf32>, vector<32x128xf32>, vector<2x128xf32> -> vector<2x128xf32>
    %756 = vector.broadcast %637 : vector<1x128xf32> to vector<2x128xf32>
    %757 = arith.addf %755, %756 : vector<2x128xf32>
    %758 = arith.addf %754, %757 : vector<2x128xf32>
    %759 = vector.extract_strided_slice %758 {offsets = [0, 0], sizes = [2, 32], strides = [1, 1]} : vector<2x128xf32> to vector<2x32xf32>
    %cst_252 = arith.constant 5.000000e-01 : f32
    %760 = vector.broadcast %cst_252 : f32 to vector<2x32xf32>
    %761 = arith.mulf %760, %759 : vector<2x32xf32>
    %762 = math.tanh %761 : vector<2x32xf32>
    %cst_253 = arith.constant 1.000000e+00 : f32
    %763 = vector.broadcast %cst_253 : f32 to vector<2x32xf32>
    %764 = arith.addf %762, %763 : vector<2x32xf32>
    %cst_254 = arith.constant 5.000000e-01 : f32
    %765 = vector.broadcast %cst_254 : f32 to vector<2x32xf32>
    %766 = arith.mulf %765, %764 : vector<2x32xf32>
    %767 = vector.extract_strided_slice %758 {offsets = [0, 32], sizes = [2, 32], strides = [1, 1]} : vector<2x128xf32> to vector<2x32xf32>
    %cst_255 = arith.constant 5.000000e-01 : f32
    %768 = vector.broadcast %cst_255 : f32 to vector<2x32xf32>
    %769 = arith.mulf %768, %767 : vector<2x32xf32>
    %770 = math.tanh %769 : vector<2x32xf32>
    %cst_256 = arith.constant 1.000000e+00 : f32
    %771 = vector.broadcast %cst_256 : f32 to vector<2x32xf32>
    %772 = arith.addf %770, %771 : vector<2x32xf32>
    %cst_257 = arith.constant 5.000000e-01 : f32
    %773 = vector.broadcast %cst_257 : f32 to vector<2x32xf32>
    %774 = arith.mulf %773, %772 : vector<2x32xf32>
    %775 = vector.extract_strided_slice %754 {offsets = [0, 64], sizes = [2, 32], strides = [1, 1]} : vector<2x128xf32> to vector<2x32xf32>
    %776 = vector.extract_strided_slice %757 {offsets = [0, 64], sizes = [2, 32], strides = [1, 1]} : vector<2x128xf32> to vector<2x32xf32>
    %777 = arith.mulf %766, %776 : vector<2x32xf32>
    %778 = arith.addf %775, %777 : vector<2x32xf32>
    %779 = math.tanh %778 : vector<2x32xf32>
    %cst_258 = arith.constant 1.000000e+00 : f32
    %780 = vector.broadcast %cst_258 : f32 to vector<2x32xf32>
    %781 = arith.subf %780, %774 : vector<2x32xf32>
    %782 = arith.mulf %781, %779 : vector<2x32xf32>
    %783 = arith.mulf %774, %752 : vector<2x32xf32>
    %784 = arith.addf %782, %783 : vector<2x32xf32>
    %785 = vector.extract_strided_slice %0 {offsets = [3, 0, 0], sizes = [1, 2, 32], strides = [1, 1, 1]} : vector<8x2x32xf32> to vector<1x2x32xf32>
    %786 = vector.shape_cast %785 : vector<1x2x32xf32> to vector<2x32xf32>
    %cst_259 = arith.constant 0.000000e+00 : f32
    %787 = vector.broadcast %cst_259 : f32 to vector<2x32xf32>
    %788 = arith.cmpf one, %786, %787 : vector<2x32xf32>
    %789 = arith.select %788, %784, %752 : vector<2x32xi1>, vector<2x32xf32>
    %790 = vector.extract_strided_slice %641 {offsets = [4, 0, 0], sizes = [1, 2, 128], strides = [1, 1, 1]} : vector<8x2x128xf32> to vector<1x2x128xf32>
    %791 = vector.shape_cast %790 : vector<1x2x128xf32> to vector<2x128xf32>
    %cst_260 = arith.constant dense<0.000000e+00> : vector<2x128xf32>
    %792 = tpu.matmul %789, %636, %cst_260 {dimension_numbers = #tpu.dot_dimension_numbers<[1], [0], [0], [1], [0, 0, 1, 1], [], []>} : vector<2x32xf32>, vector<32x128xf32>, vector<2x128xf32> -> vector<2x128xf32>
    %793 = vector.broadcast %637 : vector<1x128xf32> to vector<2x128xf32>
    %794 = arith.addf %792, %793 : vector<2x128xf32>
    %795 = arith.addf %791, %794 : vector<2x128xf32>
    %796 = vector.extract_strided_slice %795 {offsets = [0, 0], sizes = [2, 32], strides = [1, 1]} : vector<2x128xf32> to vector<2x32xf32>
    %cst_261 = arith.constant 5.000000e-01 : f32
    %797 = vector.broadcast %cst_261 : f32 to vector<2x32xf32>
    %798 = arith.mulf %797, %796 : vector<2x32xf32>
    %799 = math.tanh %798 : vector<2x32xf32>
    %cst_262 = arith.constant 1.000000e+00 : f32
    %800 = vector.broadcast %cst_262 : f32 to vector<2x32xf32>
    %801 = arith.addf %799, %800 : vector<2x32xf32>
    %cst_263 = arith.constant 5.000000e-01 : f32
    %802 = vector.broadcast %cst_263 : f32 to vector<2x32xf32>
    %803 = arith.mulf %802, %801 : vector<2x32xf32>
    %804 = vector.extract_strided_slice %795 {offsets = [0, 32], sizes = [2, 32], strides = [1, 1]} : vector<2x128xf32> to vector<2x32xf32>
    %cst_264 = arith.constant 5.000000e-01 : f32
    %805 = vector.broadcast %cst_264 : f32 to vector<2x32xf32>
    %806 = arith.mulf %805, %804 : vector<2x32xf32>
    %807 = math.tanh %806 : vector<2x32xf32>
    %cst_265 = arith.constant 1.000000e+00 : f32
    %808 = vector.broadcast %cst_265 : f32 to vector<2x32xf32>
    %809 = arith.addf %807, %808 : vector<2x32xf32>
    %cst_266 = arith.constant 5.000000e-01 : f32
    %810 = vector.broadcast %cst_266 : f32 to vector<2x32xf32>
    %811 = arith.mulf %810, %809 : vector<2x32xf32>
    %812 = vector.extract_strided_slice %791 {offsets = [0, 64], sizes = [2, 32], strides = [1, 1]} : vector<2x128xf32> to vector<2x32xf32>
    %813 = vector.extract_strided_slice %794 {offsets = [0, 64], sizes = [2, 32], strides = [1, 1]} : vector<2x128xf32> to vector<2x32xf32>
    %814 = arith.mulf %803, %813 : vector<2x32xf32>
    %815 = arith.addf %812, %814 : vector<2x32xf32>
    %816 = math.tanh %815 : vector<2x32xf32>
    %cst_267 = arith.constant 1.000000e+00 : f32
    %817 = vector.broadcast %cst_267 : f32 to vector<2x32xf32>
    %818 = arith.subf %817, %811 : vector<2x32xf32>
    %819 = arith.mulf %818, %816 : vector<2x32xf32>
    %820 = arith.mulf %811, %789 : vector<2x32xf32>
    %821 = arith.addf %819, %820 : vector<2x32xf32>
    %822 = vector.extract_strided_slice %0 {offsets = [4, 0, 0], sizes = [1, 2, 32], strides = [1, 1, 1]} : vector<8x2x32xf32> to vector<1x2x32xf32>
    %823 = vector.shape_cast %822 : vector<1x2x32xf32> to vector<2x32xf32>
    %cst_268 = arith.constant 0.000000e+00 : f32
    %824 = vector.broadcast %cst_268 : f32 to vector<2x32xf32>
    %825 = arith.cmpf one, %823, %824 : vector<2x32xf32>
    %826 = arith.select %825, %821, %789 : vector<2x32xi1>, vector<2x32xf32>
    %827 = vector.extract_strided_slice %641 {offsets = [5, 0, 0], sizes = [1, 2, 128], strides = [1, 1, 1]} : vector<8x2x128xf32> to vector<1x2x128xf32>
    %828 = vector.shape_cast %827 : vector<1x2x128xf32> to vector<2x128xf32>
    %cst_269 = arith.constant dense<0.000000e+00> : vector<2x128xf32>
    %829 = tpu.matmul %826, %636, %cst_269 {dimension_numbers = #tpu.dot_dimension_numbers<[1], [0], [0], [1], [0, 0, 1, 1], [], []>} : vector<2x32xf32>, vector<32x128xf32>, vector<2x128xf32> -> vector<2x128xf32>
    %830 = vector.broadcast %637 : vector<1x128xf32> to vector<2x128xf32>
    %831 = arith.addf %829, %830 : vector<2x128xf32>
    %832 = arith.addf %828, %831 : vector<2x128xf32>
    %833 = vector.extract_strided_slice %832 {offsets = [0, 0], sizes = [2, 32], strides = [1, 1]} : vector<2x128xf32> to vector<2x32xf32>
    %cst_270 = arith.constant 5.000000e-01 : f32
    %834 = vector.broadcast %cst_270 : f32 to vector<2x32xf32>
    %835 = arith.mulf %834, %833 : vector<2x32xf32>
    %836 = math.tanh %835 : vector<2x32xf32>
    %cst_271 = arith.constant 1.000000e+00 : f32
    %837 = vector.broadcast %cst_271 : f32 to vector<2x32xf32>
    %838 = arith.addf %836, %837 : vector<2x32xf32>
    %cst_272 = arith.constant 5.000000e-01 : f32
    %839 = vector.broadcast %cst_272 : f32 to vector<2x32xf32>
    %840 = arith.mulf %839, %838 : vector<2x32xf32>
    %841 = vector.extract_strided_slice %832 {offsets = [0, 32], sizes = [2, 32], strides = [1, 1]} : vector<2x128xf32> to vector<2x32xf32>
    %cst_273 = arith.constant 5.000000e-01 : f32
    %842 = vector.broadcast %cst_273 : f32 to vector<2x32xf32>
    %843 = arith.mulf %842, %841 : vector<2x32xf32>
    %844 = math.tanh %843 : vector<2x32xf32>
    %cst_274 = arith.constant 1.000000e+00 : f32
    %845 = vector.broadcast %cst_274 : f32 to vector<2x32xf32>
    %846 = arith.addf %844, %845 : vector<2x32xf32>
    %cst_275 = arith.constant 5.000000e-01 : f32
    %847 = vector.broadcast %cst_275 : f32 to vector<2x32xf32>
    %848 = arith.mulf %847, %846 : vector<2x32xf32>
    %849 = vector.extract_strided_slice %828 {offsets = [0, 64], sizes = [2, 32], strides = [1, 1]} : vector<2x128xf32> to vector<2x32xf32>
    %850 = vector.extract_strided_slice %831 {offsets = [0, 64], sizes = [2, 32], strides = [1, 1]} : vector<2x128xf32> to vector<2x32xf32>
    %851 = arith.mulf %840, %850 : vector<2x32xf32>
    %852 = arith.addf %849, %851 : vector<2x32xf32>
    %853 = math.tanh %852 : vector<2x32xf32>
    %cst_276 = arith.constant 1.000000e+00 : f32
    %854 = vector.broadcast %cst_276 : f32 to vector<2x32xf32>
    %855 = arith.subf %854, %848 : vector<2x32xf32>
    %856 = arith.mulf %855, %853 : vector<2x32xf32>
    %857 = arith.mulf %848, %826 : vector<2x32xf32>
    %858 = arith.addf %856, %857 : vector<2x32xf32>
    %859 = vector.extract_strided_slice %0 {offsets = [5, 0, 0], sizes = [1, 2, 32], strides = [1, 1, 1]} : vector<8x2x32xf32> to vector<1x2x32xf32>
    %860 = vector.shape_cast %859 : vector<1x2x32xf32> to vector<2x32xf32>
    %cst_277 = arith.constant 0.000000e+00 : f32
    %861 = vector.broadcast %cst_277 : f32 to vector<2x32xf32>
    %862 = arith.cmpf one, %860, %861 : vector<2x32xf32>
    %863 = arith.select %862, %858, %826 : vector<2x32xi1>, vector<2x32xf32>
    %864 = vector.extract_strided_slice %641 {offsets = [6, 0, 0], sizes = [1, 2, 128], strides = [1, 1, 1]} : vector<8x2x128xf32> to vector<1x2x128xf32>
    %865 = vector.shape_cast %864 : vector<1x2x128xf32> to vector<2x128xf32>
    %cst_278 = arith.constant dense<0.000000e+00> : vector<2x128xf32>
    %866 = tpu.matmul %863, %636, %cst_278 {dimension_numbers = #tpu.dot_dimension_numbers<[1], [0], [0], [1], [0, 0, 1, 1], [], []>} : vector<2x32xf32>, vector<32x128xf32>, vector<2x128xf32> -> vector<2x128xf32>
    %867 = vector.broadcast %637 : vector<1x128xf32> to vector<2x128xf32>
    %868 = arith.addf %866, %867 : vector<2x128xf32>
    %869 = arith.addf %865, %868 : vector<2x128xf32>
    %870 = vector.extract_strided_slice %869 {offsets = [0, 0], sizes = [2, 32], strides = [1, 1]} : vector<2x128xf32> to vector<2x32xf32>
    %cst_279 = arith.constant 5.000000e-01 : f32
    %871 = vector.broadcast %cst_279 : f32 to vector<2x32xf32>
    %872 = arith.mulf %871, %870 : vector<2x32xf32>
    %873 = math.tanh %872 : vector<2x32xf32>
    %cst_280 = arith.constant 1.000000e+00 : f32
    %874 = vector.broadcast %cst_280 : f32 to vector<2x32xf32>
    %875 = arith.addf %873, %874 : vector<2x32xf32>
    %cst_281 = arith.constant 5.000000e-01 : f32
    %876 = vector.broadcast %cst_281 : f32 to vector<2x32xf32>
    %877 = arith.mulf %876, %875 : vector<2x32xf32>
    %878 = vector.extract_strided_slice %869 {offsets = [0, 32], sizes = [2, 32], strides = [1, 1]} : vector<2x128xf32> to vector<2x32xf32>
    %cst_282 = arith.constant 5.000000e-01 : f32
    %879 = vector.broadcast %cst_282 : f32 to vector<2x32xf32>
    %880 = arith.mulf %879, %878 : vector<2x32xf32>
    %881 = math.tanh %880 : vector<2x32xf32>
    %cst_283 = arith.constant 1.000000e+00 : f32
    %882 = vector.broadcast %cst_283 : f32 to vector<2x32xf32>
    %883 = arith.addf %881, %882 : vector<2x32xf32>
    %cst_284 = arith.constant 5.000000e-01 : f32
    %884 = vector.broadcast %cst_284 : f32 to vector<2x32xf32>
    %885 = arith.mulf %884, %883 : vector<2x32xf32>
    %886 = vector.extract_strided_slice %865 {offsets = [0, 64], sizes = [2, 32], strides = [1, 1]} : vector<2x128xf32> to vector<2x32xf32>
    %887 = vector.extract_strided_slice %868 {offsets = [0, 64], sizes = [2, 32], strides = [1, 1]} : vector<2x128xf32> to vector<2x32xf32>
    %888 = arith.mulf %877, %887 : vector<2x32xf32>
    %889 = arith.addf %886, %888 : vector<2x32xf32>
    %890 = math.tanh %889 : vector<2x32xf32>
    %cst_285 = arith.constant 1.000000e+00 : f32
    %891 = vector.broadcast %cst_285 : f32 to vector<2x32xf32>
    %892 = arith.subf %891, %885 : vector<2x32xf32>
    %893 = arith.mulf %892, %890 : vector<2x32xf32>
    %894 = arith.mulf %885, %863 : vector<2x32xf32>
    %895 = arith.addf %893, %894 : vector<2x32xf32>
    %896 = vector.extract_strided_slice %0 {offsets = [6, 0, 0], sizes = [1, 2, 32], strides = [1, 1, 1]} : vector<8x2x32xf32> to vector<1x2x32xf32>
    %897 = vector.shape_cast %896 : vector<1x2x32xf32> to vector<2x32xf32>
    %cst_286 = arith.constant 0.000000e+00 : f32
    %898 = vector.broadcast %cst_286 : f32 to vector<2x32xf32>
    %899 = arith.cmpf one, %897, %898 : vector<2x32xf32>
    %900 = arith.select %899, %895, %863 : vector<2x32xi1>, vector<2x32xf32>
    %901 = tpu.concatenate %678, %715, %752, %789, %826, %863, %900 in 0 : vector<2x32xf32>, vector<2x32xf32>, vector<2x32xf32>, vector<2x32xf32>, vector<2x32xf32>, vector<2x32xf32>, vector<2x32xf32> -> vector<14x32xf32>
    %c0_287 = arith.constant 0 : index
    %c0_288 = arith.constant 0 : index
    %902 = vector.load %arg18[%c0_287, %c0_288] : memref<32x8xf32, #tpu.memory_space<vmem>>, vector<32x8xf32>
    %cst_289 = arith.constant dense<0.000000e+00> : vector<14x8xf32>
    %903 = tpu.matmul %901, %902, %cst_289 {dimension_numbers = #tpu.dot_dimension_numbers<[1], [0], [0], [1], [0, 0, 1, 1], [], []>} : vector<14x32xf32>, vector<32x8xf32>, vector<14x8xf32> -> vector<14x8xf32>
    %c0_290 = arith.constant 0 : index
    %c0_291 = arith.constant 0 : index
    %904 = vector.load %arg19[%c0_290, %c0_291] : memref<1x8xf32, #tpu.memory_space<vmem>>, vector<1x8xf32>
    %905 = vector.broadcast %904 : vector<1x8xf32> to vector<14x8xf32>
    %906 = arith.addf %903, %905 : vector<14x8xf32>
    %cst_292 = arith.constant dense<0xFF800000> : vector<14xf32>
    %907 = vector.multi_reduction <maximumf>, %906, %cst_292 [1] : vector<14x8xf32> to vector<14xf32>
    %908 = vector.shape_cast %907 : vector<14xf32> to vector<14x1xf32>
    %909 = vector.broadcast %908 : vector<14x1xf32> to vector<14x8xf32>
    %910 = arith.subf %906, %909 : vector<14x8xf32>
    %911 = math.exp %910 : vector<14x8xf32>
    %cst_293 = arith.constant dense<0.000000e+00> : vector<14xf32>
    %912 = vector.multi_reduction <add>, %911, %cst_293 [1] : vector<14x8xf32> to vector<14xf32>
    %913 = vector.shape_cast %912 : vector<14xf32> to vector<14x1xf32>
    %914 = math.log %913 : vector<14x1xf32>
    %915 = arith.addf %908, %914 : vector<14x1xf32>
    %c0_294 = arith.constant 0 : index
    %c0_295 = arith.constant 0 : index
    %916 = vector.load %arg4[%c0_294, %c0_295] : memref<14x8xf32, #tpu.memory_space<vmem>>, vector<14x8xf32>
    %917 = arith.mulf %916, %906 : vector<14x8xf32>
    %cst_296 = arith.constant dense<0.000000e+00> : vector<14xf32>
    %918 = vector.multi_reduction <add>, %917, %cst_296 [1] : vector<14x8xf32> to vector<14xf32>
    %919 = vector.shape_cast %918 : vector<14xf32> to vector<14x1xf32>
    %c0_297 = arith.constant 0 : index
    %c0_298 = arith.constant 0 : index
    %920 = vector.load %arg5[%c0_297, %c0_298] : memref<14x1xf32, #tpu.memory_space<vmem>>, vector<14x1xf32>
    %921 = arith.subf %915, %919 : vector<14x1xf32>
    %922 = arith.mulf %920, %921 : vector<14x1xf32>
    %cst_299 = arith.constant dense<0.000000e+00> : vector<1xf32>
    %923 = vector.multi_reduction <add>, %922, %cst_299 [0] : vector<14x1xf32> to vector<1xf32>
    %924 = vector.shape_cast %923 : vector<1xf32> to vector<1x1xf32>
    %cst_300 = arith.constant dense<0.000000e+00> : vector<1xf32>
    %925 = vector.multi_reduction <add>, %920, %cst_300 [0] : vector<14x1xf32> to vector<1xf32>
    %926 = vector.shape_cast %925 : vector<1xf32> to vector<1x1xf32>
    %cst_301 = arith.constant 1.000000e+00 : f32
    %927 = vector.broadcast %cst_301 : f32 to vector<1x1xf32>
    %928 = arith.maximumf %926, %927 : vector<1x1xf32>
    %929 = arith.divf %924, %928 : vector<1x1xf32>
    %930 = tpu.concatenate %628, %929 in 1 : vector<1x1xf32>, vector<1x1xf32> -> vector<1x2xf32>
    %c0_302 = arith.constant 0 : index
    %c0_303 = arith.constant 0 : index
    %931 = vector.load %arg20[%c0_302, %c0_303] : memref<1x2xf32, #tpu.memory_space<vmem>>, vector<1x2xf32>
    tpu.vector_store %arg20[%c0_302, %c0_303], %930 {strides = array<i32>} : memref<1x2xf32, #tpu.memory_space<vmem>>, vector<1x2xf32>,
    return
  }
}

</mosaic_0001>

<bundles_post_ra>
// kernel: tpu_custom_call.1
= control target key start
LH: loop header
LB: loop body
LE: loop exit
PB: predicated region body
PF: predicated region fallthrough
CT: control target
= control target key end

     0   :  { %s5150_s0 = inlined_call_operand.hbm [shape: f32[8,2,128], index: 0, kind: input, shape index: {}]   ;;  %s5151_s1 = inlined_call_operand.hbm [shape: f32[8,2,128], index: 1, kind: input, shape index: {}]   ;;  %s5152_s2 = inlined_call_operand.hbm [shape: f32[8,2,128], index: 2, kind: input, shape index: {}]   ;;  %s5153_s3 = inlined_call_operand.hbm [shape: f32[8,2,32], index: 3, kind: input, shape index: {}]   ;;  %s5154_s4 = inlined_call_operand.vmem [shape: f32[14,8], index: 4, kind: input, shape index: {}]   ;;  %s5155_s5 = inlined_call_operand.vmem [shape: f32[14,1], index: 5, kind: input, shape index: {}]   ;;  %s5156_s6 = inlined_call_operand.hbm [shape: f32[2,128], index: 6, kind: input, shape index: {}]   ;;  %s5157_s7 = inlined_call_operand.vmem [shape: f32[32,128], index: 7, kind: input, shape index: {}]   ;;  %s5158_s8 = inlined_call_operand.vmem [shape: f32[1,128], index: 8, kind: input, shape index: {}]   ;;  %s5159_s9 = inlined_call_operand.hbm [shape: f32[32,128], index: 9, kind: input, shape index: {}]   ;;  %s5160_s10 = inlined_call_operand.hbm [shape: f32[1,128], index: 10, kind: input, shape index: {}]   ;;  %s5161_s11 = inlined_call_operand.vmem [shape: f32[32,256], index: 11, kind: input, shape index: {}]   ;;  %s5162_s12 = inlined_call_operand.hbm [shape: f32[32,256], index: 12, kind: input, shape index: {}]   ;;  %s5163_s13 = inlined_call_operand.hbm [shape: f32[1,256], index: 13, kind: input, shape index: {}]   ;;  %s5164_s14 = inlined_call_operand.hbm [shape: f32[128,256], index: 14, kind: input, shape index: {}]   ;;  %s5165_s15 = inlined_call_operand.hbm [shape: f32[1,256], index: 15, kind: input, shape index: {}]   ;;  %s5166_s16 = inlined_call_operand.vmem [shape: f32[32,128], index: 16, kind: input, shape index: {}]   ;;  %s5167_s17 = inlined_call_operand.vmem [shape: f32[1,128], index: 17, kind: input, shape index: {}]   ;;  %s5168_s18 = inlined_call_operand.vmem [shape: f32[32,8], index: 18, kind: input, shape index: {}]   ;;  %s5169_s19 = inlined_call_operand.vmem [shape: f32[1,8], index: 19, kind: input, shape index: {}]   ;;  %s5170_s20 = inlined_call_operand.hbm [shape: f32[1,2], index: 20, kind: output, shape index: {}]  }
   0x1   :  { %5179 = sst [smem:[#allocation28_spill]] %s5150_s0 }
   0x2   :  { %5180 = sst [smem:[#allocation29_spill]] %s5151_s1 }
   0x3   :  { %5181 = sst [smem:[#allocation30_spill]] %s5152_s2 }
   0x4   :  { %5182 = sst [smem:[#allocation31_spill]] %s5153_s3 }
   0x5   :  { %5183 = sst [smem:[#allocation32_spill]] %s5154_s4 }
   0x6   :  { %5184 = sst [smem:[#allocation33_spill]] %s5170_s20 }
   0x7   :  { %25 = vsyncpa [#allocation3], 0 }
   0x8   :  { %26 = vsyncpa [#allocation6], 0 }
   0x9   :  { %27 = vsyncpa [#allocation9], 0 }
   0xa   :  { %28 = vsyncpa [#allocation12], 0 }
   0xb   :  { %29 = vsyncpa [#allocation15], 0 }
   0xc   :  { %30 = vsyncpa [#allocation18], 0 }
   0xd   :  { %31 = vsyncpa [#allocation4], 0  ;;  %s4247_s1 = smov [#allocation5]   ;;  %s4248_s23 = smov [#allocation8]  }
   0xe   :  { %s49_s22 = sshll.u32 %s4247_s1, 4  ;;  %s73_s24 = sshll.u32 %s4248_s23, 4  ;;  %s50_s22 = int_to_ptr.vmem [resolvable:$true] %s49_s22  ;;  %s4376_s24 = int_to_ptr.vmem [resolvable:$true] %s73_s24 }
   0xf   :  { %s5185_s3 = sld [smem:[#allocation29_spill]] }
  0x15   :  { %s3969_s26 = scalar_lea.hbm %s5185_s3, 256 }
  0x16   :  { %p3970_p0 = scmp.ne.s32.totalorder %s5185_s3, %s3969_s26  ;;  %p3973_p1 = scmp.lt.u32.totalorder %s3969_s26, %s5185_s3 }
  0x18   :  { %p3975_p2 = pnand %p3973_p1, %p3970_p0 }
  0x1a   :  { %3978 = shalt.err (!%p3975_p2)
}
  0x1b   :  { %s3979_s30 = scalar_lea.vmem %s50_s22, 256  ;;  %p3984_p4 = scmp.lt.s32.totalorder %s50_s22, %s50_s22 }
  0x1c   :  { %p3980_p3 = scmp.ne.s32.totalorder %s50_s22, %s3979_s30  ;;  %p3985_p5 = scmp.lt.s32.totalorder %s3979_s30, %s3979_s30 }
  0x1e   :  { %p3986_p6 = por %p3985_p5, %p3984_p4 }
  0x20   :  { %p3987_p7 = pnand %p3986_p6, %p3980_p3 }
  0x22   :  { %3990 = shalt.err (!%p3987_p7)
}
  0x23   :  { %s5177_s0 = smov 32   ;;  %s4250_s21 = smov 2  }
  0x24   :  { %55 = dma.hbm_to_vmem [thread:$0]  %s5185_s3, 256, %s50_s22, [#allocation6], %s5177_s0, %s5177_s0, %s4250_s21  }
  0x25   :  { %s5186_s26 = sld [smem:[#allocation31_spill]] }
  0x2b   :  { %s3991_s27 = scalar_lea.hbm %s5186_s26, 256 }
  0x2c   :  { %p3992_p8 = scmp.ne.s32.totalorder %s5186_s26, %s3991_s27  ;;  %p3995_p9 = scmp.lt.u32.totalorder %s3991_s27, %s5186_s26 }
  0x2e   :  { %p3997_p10 = pnand %p3995_p9, %p3992_p8 }
  0x30   :  { %4000 = shalt.err (!%p3997_p10)
}
  0x31   :  { %s4001_s20 = scalar_lea.vmem %s4376_s24, 256  ;;  %p4006_p12 = scmp.lt.s32.totalorder %s4376_s24, %s4376_s24 }
  0x32   :  { %p4002_p11 = scmp.ne.s32.totalorder %s4376_s24, %s4001_s20  ;;  %p4007_p13 = scmp.lt.s32.totalorder %s4001_s20, %s4001_s20 }
  0x34   :  { %p4008_p0 = por %p4007_p13, %p4006_p12 }
  0x36   :  { %p4009_p1 = pnand %p4008_p0, %p4002_p11 }
  0x38   :  { %4012 = shalt.err (!%p4009_p1)
}
  0x39   :  { %79 = dma.hbm_to_vmem [thread:$0]  %s5186_s26, 256, %s4376_s24, [#allocation9], %s5177_s0, %s5177_s0, %s4250_s21  }
  0x3a   :  { %s4251_s1 = smov [#allocation11]   ;;  %s4013_s27 = scalar_lea.hbm %s5159_s9, 512 }
  0x3b   :  { %s103_s23 = sshll.u32 %s4251_s1, 4  ;;  %p4014_p2 = scmp.ne.s32.totalorder %s5159_s9, %s4013_s27  ;;  %s104_s23 = int_to_ptr.vmem [resolvable:$true] %s103_s23 }
  0x3c   :  { %p4017_p3 = scmp.lt.u32.totalorder %s4013_s27, %s5159_s9 }
  0x3e   :  { %p4019_p4 = pnand %p4017_p3, %p4014_p2 }
  0x40   :  { %4022 = shalt.err (!%p4019_p4)
}
  0x41   :  { %s4023_s30 = scalar_lea.vmem %s104_s23, 512  ;;  %p4028_p6 = scmp.lt.s32.totalorder %s104_s23, %s104_s23 }
  0x42   :  { %p4024_p5 = scmp.ne.s32.totalorder %s104_s23, %s4023_s30  ;;  %p4029_p7 = scmp.lt.s32.totalorder %s4023_s30, %s4023_s30 }
  0x44   :  { %p4030_p8 = por %p4029_p7, %p4028_p6 }
  0x46   :  { %p4031_p9 = pnand %p4030_p8, %p4024_p5 }
  0x48   :  { %4034 = shalt.err (!%p4031_p9)
}
  0x49   :  { %s4252_s24 = smov 128   ;;  %s4253_s26 = smov 8  }
  0x4a   :  { %109 = dma.hbm_to_vmem [thread:$0]  %s5159_s9, 512, %s104_s23, [#allocation12], %s4252_s24, %s4252_s24, %s4253_s26  }
  0x4b   :  { %s4254_s1 = smov [#allocation14]   ;;  %s4035_s28 = scalar_lea.hbm %s5162_s12, 1024 }
  0x4c   :  { %s127_s2 = sshll.u32 %s4254_s1, 4  ;;  %p4036_p10 = scmp.ne.s32.totalorder %s5162_s12, %s4035_s28  ;;  %s128_s2 = int_to_ptr.vmem [resolvable:$true] %s127_s2 }
  0x4d   :  { %p4039_p11 = scmp.lt.u32.totalorder %s4035_s28, %s5162_s12 }
  0x4f   :  { %p4041_p12 = pnand %p4039_p11, %p4036_p10 }
  0x51   :  { %4044 = shalt.err (!%p4041_p12)
}
  0x52   :  { %s4045_s0 = scalar_lea.vmem %s128_s2, 1024  ;;  %p4050_p0 = scmp.lt.s32.totalorder %s128_s2, %s128_s2 }
  0x53   :  { %p4046_p13 = scmp.ne.s32.totalorder %s128_s2, %s4045_s0  ;;  %p4051_p1 = scmp.lt.s32.totalorder %s4045_s0, %s4045_s0 }
  0x55   :  { %p4052_p2 = por %p4051_p1, %p4050_p0 }
  0x57   :  { %p4053_p3 = pnand %p4052_p2, %p4046_p13 }
  0x59   :  { %4056 = shalt.err (!%p4053_p3)
}
  0x5a   :  { %s4255_s9 = smov 256   ;;  %s4256_s23 = smov 16  }
  0x5b   :  { %133 = dma.hbm_to_vmem [thread:$0]  %s5162_s12, 1024, %s128_s2, [#allocation15], %s4255_s9, %s4255_s9, %s4256_s23  }
  0x5c   :  { %s4257_s22 = smov [#allocation17]   ;;  %s4258_s1 = smov [#allocation2]  }
  0x5d   :  { %s149_s3 = sshll.u32 %s4257_s22, 4  ;;  %s37_s25 = sshll.u32 %s4258_s1, 4  ;;  %s150_s3 = int_to_ptr.vmem [resolvable:$true] %s149_s3  ;;  %s4437_s25 = int_to_ptr.vmem [resolvable:$true] %s37_s25 }
  0x5e   :  { %s4057_s0 = scalar_lea.hbm %s5164_s14, 4096 }
  0x5f   :  { %p4058_p4 = scmp.ne.s32.totalorder %s5164_s14, %s4057_s0  ;;  %p4061_p5 = scmp.lt.u32.totalorder %s4057_s0, %s5164_s14 }
  0x61   :  { %p4063_p6 = pnand %p4061_p5, %p4058_p4 }
  0x63   :  { %4066 = shalt.err (!%p4063_p6)
}
  0x64   :  { %s4067_s12 = scalar_lea.vmem %s150_s3, 4096  ;;  %p4072_p8 = scmp.lt.s32.totalorder %s150_s3, %s150_s3 }
  0x65   :  { %p4068_p7 = scmp.ne.s32.totalorder %s150_s3, %s4067_s12  ;;  %p4073_p9 = scmp.lt.s32.totalorder %s4067_s12, %s4067_s12 }
  0x67   :  { %p4074_p10 = por %p4073_p9, %p4072_p8 }
  0x69   :  { %p4075_p11 = pnand %p4074_p10, %p4068_p7 }
  0x6b   :  { %4078 = shalt.err (!%p4075_p11)
}
  0x6c   :  { %155 = dma.hbm_to_vmem [thread:$0]  %s5164_s14, 4096, %s150_s3, [#allocation18], %s4255_s9, %s4255_s9, %s4256_s23  }
  0x6d   :  { %s5187_s1 = sld [smem:[#allocation28_spill]] }
  0x73   :  { %s4079_s27 = scalar_lea.hbm %s5187_s1, 256 }
  0x74   :  { %p4080_p12 = scmp.ne.s32.totalorder %s5187_s1, %s4079_s27  ;;  %p4083_p13 = scmp.lt.u32.totalorder %s4079_s27, %s5187_s1 }
  0x76   :  { %p4085_p0 = pnand %p4083_p13, %p4080_p12 }
  0x78   :  { %4088 = shalt.err (!%p4085_p0)
}
  0x79   :  { %s4089_s29 = scalar_lea.vmem %s4437_s25, 256  ;;  %p4094_p2 = scmp.lt.s32.totalorder %s4437_s25, %s4437_s25 }
  0x7a   :  { %p4090_p1 = scmp.ne.s32.totalorder %s4437_s25, %s4089_s29  ;;  %p4095_p3 = scmp.lt.s32.totalorder %s4089_s29, %s4089_s29 }
  0x7c   :  { %p4096_p4 = por %p4095_p3, %p4094_p2 }
  0x7e   :  { %p4097_p5 = pnand %p4096_p4, %p4090_p1 }
  0x80   :  { %4100 = shalt.err (!%p4097_p5)
}
  0x81   :  { %s5188_s14 = smov 32   ;;  %s4259_s3 = smov [#allocation7]  }
  0x82   :  { %43 = dma.hbm_to_vmem [thread:$0]  %s5187_s1, 256, %s4437_s25, [#allocation3], %s5188_s14, %s5188_s14, %s4250_s21  }
  0x83   :  { %s61_s30 = sshll.u32 %s4259_s3, 4  ;;  %s4260_s12 = smov [#allocation10]   ;;  %s62_s30 = int_to_ptr.vmem [resolvable:$true] %s61_s30 }
  0x84   :  { %s90_s2 = sshll.u32 %s4260_s12, 4  ;;  %s5189_s22 = sld [smem:[#allocation30_spill]]  ;;  %s91_s2 = int_to_ptr.vmem [resolvable:$true] %s90_s2 }
  0x8a   :  { %s4101_s27 = scalar_lea.hbm %s5189_s22, 256 }
  0x8b   :  { %p4102_p6 = scmp.ne.s32.totalorder %s5189_s22, %s4101_s27  ;;  %p4105_p7 = scmp.lt.u32.totalorder %s4101_s27, %s5189_s22 }
  0x8d   :  { %p4107_p8 = pnand %p4105_p7, %p4102_p6 }
  0x8f   :  { %4110 = shalt.err (!%p4107_p8)
}
  0x90   :  { %s4111_s25 = scalar_lea.vmem %s62_s30, 256  ;;  %p4116_p10 = scmp.lt.s32.totalorder %s62_s30, %s62_s30 }
  0x91   :  { %p4112_p9 = scmp.ne.s32.totalorder %s62_s30, %s4111_s25  ;;  %p4117_p11 = scmp.lt.s32.totalorder %s4111_s25, %s4111_s25 }
  0x93   :  { %p4118_p12 = por %p4117_p11, %p4116_p10 }
  0x95   :  { %p4119_p13 = pnand %p4118_p12, %p4112_p9 }
  0x97   :  { %4122 = shalt.err (!%p4119_p13)
}
  0x98   :  { %67 = dma.hbm_to_vmem [thread:$0]  %s5189_s22, 256, %s62_s30, [#allocation6], %s5188_s14, %s5188_s14, %s4250_s21  }
  0x99   :  { %s4123_s3 = scalar_lea.hbm %s5156_s6, 32 }
  0x9a   :  { %p4124_p0 = scmp.ne.s32.totalorder %s5156_s6, %s4123_s3  ;;  %p4127_p1 = scmp.lt.u32.totalorder %s4123_s3, %s5156_s6 }
  0x9c   :  { %p4129_p2 = pnand %p4127_p1, %p4124_p0 }
  0x9e   :  { %4132 = shalt.err (!%p4129_p2)
}
  0x9f   :  { %s4133_s28 = scalar_lea.vmem %s91_s2, 32  ;;  %p4138_p4 = scmp.lt.s32.totalorder %s91_s2, %s91_s2 }
  0xa0   :  { %p4134_p3 = scmp.ne.s32.totalorder %s91_s2, %s4133_s28  ;;  %p4139_p5 = scmp.lt.s32.totalorder %s4133_s28, %s4133_s28 }
  0xa2   :  { %p4140_p6 = por %p4139_p5, %p4138_p4 }
  0xa4   :  { %p4141_p7 = pnand %p4140_p6, %p4134_p3 }
  0xa6   :  { %4144 = shalt.err (!%p4141_p7)
}
  0xa7   :  { %93 = dma.hbm_to_vmem [thread:$0]  %s5156_s6, 32, %s91_s2, [#allocation9]  }
  0xa8   :  { %s4261_s22 = smov [#allocation13]   ;;  %s4262_s0 = smov [#allocation16]  }
  0xa9   :  { %s116_s20 = sshll.u32 %s4261_s22, 4  ;;  %s140_s4 = sshll.u32 %s4262_s0, 4  ;;  %s117_s20 = int_to_ptr.vmem [resolvable:$true] %s116_s20  ;;  %s141_s4 = int_to_ptr.vmem [resolvable:$true] %s140_s4 }
  0xaa   :  { %s4145_s29 = scalar_lea.hbm %s5160_s10, 16 }
  0xab   :  { %p4146_p8 = scmp.ne.s32.totalorder %s5160_s10, %s4145_s29  ;;  %p4149_p9 = scmp.lt.u32.totalorder %s4145_s29, %s5160_s10 }
  0xad   :  { %p4151_p10 = pnand %p4149_p9, %p4146_p8 }
  0xaf   :  { %4154 = shalt.err (!%p4151_p10)
}
  0xb0   :  { %s4155_s6 = scalar_lea.vmem %s117_s20, 16  ;;  %s4159_s2 = scalar_lea.vmem %s117_s20, 32 }
  0xb1   :  { %p4156_p11 = scmp.ne.s32.totalorder %s117_s20, %s4155_s6  ;;  %p4160_p12 = scmp.lt.s32.totalorder %s117_s20, %s117_s20 }
  0xb2   :  { %p4161_p13 = scmp.lt.s32.totalorder %s4159_s2, %s4155_s6 }
  0xb4   :  { %p4162_p0 = por %p4161_p13, %p4160_p12 }
  0xb6   :  { %p4163_p1 = pnand %p4162_p0, %p4156_p11 }
  0xb8   :  { %4166 = shalt.err (!%p4163_p1)
}
  0xb9   :  { %119 = dma.hbm_to_vmem [thread:$0]  %s5160_s10, 16, %s117_s20, [#allocation12]  }
  0xba   :  { %s4167_s21 = scalar_lea.hbm %s5163_s13, 32 }
  0xbb   :  { %p4168_p2 = scmp.ne.s32.totalorder %s5163_s13, %s4167_s21  ;;  %p4171_p3 = scmp.lt.u32.totalorder %s4167_s21, %s5163_s13 }
  0xbd   :  { %p4173_p4 = pnand %p4171_p3, %p4168_p2 }
  0xbf   :  { %4176 = shalt.err (!%p4173_p4)
}
  0xc0   :  { %s4177_s1 = scalar_lea.vmem %s141_s4, 32  ;;  %p4182_p6 = scmp.lt.s32.totalorder %s141_s4, %s141_s4 }
  0xc1   :  { %p4178_p5 = scmp.ne.s32.totalorder %s141_s4, %s4177_s1  ;;  %p4183_p7 = scmp.lt.s32.totalorder %s4177_s1, %s4177_s1 }
  0xc3   :  { %p4184_p8 = por %p4183_p7, %p4182_p6 }
  0xc5   :  { %p4185_p9 = pnand %p4184_p8, %p4178_p5 }
  0xc7   :  { %4188 = shalt.err (!%p4185_p9)
}
  0xc8   :  { %143 = dma.hbm_to_vmem [thread:$0]  %s5163_s13, 32, %s141_s4, [#allocation15]  }
  0xc9   :  { %s4263_s29 = smov [#allocation19]   ;;  %s4189_s12 = scalar_lea.hbm %s5165_s15, 32 }
  0xca   :  { %s162_s9 = sshll.u32 %s4263_s29, 4  ;;  %p4190_p10 = scmp.ne.s32.totalorder %s5165_s15, %s4189_s12  ;;  %s163_s9 = int_to_ptr.vmem [resolvable:$true] %s162_s9 }
  0xcb   :  { %p4193_p11 = scmp.lt.u32.totalorder %s4189_s12, %s5165_s15 }
  0xcd   :  { %p4195_p12 = pnand %p4193_p11, %p4190_p10 }
  0xcf   :  { %4198 = shalt.err (!%p4195_p12)
}
  0xd0   :  { %s4199_s27 = scalar_lea.vmem %s163_s9, 32  ;;  %p4204_p0 = scmp.lt.s32.totalorder %s163_s9, %s163_s9 }
  0xd1   :  { %p4200_p13 = scmp.ne.s32.totalorder %s163_s9, %s4199_s27  ;;  %p4205_p1 = scmp.lt.s32.totalorder %s4199_s27, %s4199_s27 }
  0xd3   :  { %p4206_p2 = por %p4205_p1, %p4204_p0 }
  0xd5   :  { %p4207_p3 = pnand %p4206_p2, %p4200_p13 }
  0xd7   :  { %4210 = shalt.err (!%p4207_p3)
}
  0xd8   :  { %165 = dma.hbm_to_vmem [thread:$0]  %s5165_s15, 32, %s163_s9, [#allocation18]  }
  0xd9   :  { %4233 = dma.done.wait [#allocation3], 256  }
  0xda   :  { %4234 = vsyncadd [#allocation3], 4294967040 }
  0xdb   :  { %4235 = dma.done.wait [#allocation6], 512  }
  0xdc   :  { %4236 = vsyncadd [#allocation6], 4294966784 }
  0xdd   :  { %4237 = dma.done.wait [#allocation9], 288  }
  0xde   :  { %4238 = vsyncadd [#allocation9], 4294967008 }
  0xdf   :  { %4239 = dma.done.wait [#allocation12], 528  }
  0xe0   :  { %4240 = vsyncadd [#allocation12], 4294966768 }
  0xe1   :  { %4241 = dma.done.wait [#allocation15], 1056  }
  0xe2   :  { %4242 = vsyncadd [#allocation15], 4294966240 }
  0xe3   :  { %4243 = dma.done.wait [#allocation18], 4128  }
  0xe4   :  { %4244 = vsyncadd [#allocation18], 4294963168  ;;  %v4264_v0 = vmov 0.0|0.0   ;;  %vm4265_vm0 = vmmov 0   ;;  %v4266_v1 = vmov 0.0   ;;  %v220_v2 = vld [vmem:[#allocation11] sm:$0xff] }
  0xe5   :  { %3649 = vmatprep.subr.bf16.mxu1 %v4264_v0  ;;  %3643 = vmatprep.subr.bf16.mxu0 %v4264_v0  ;;  %v221_v3 = vld [vmem:[#allocation11 + $0x8] sm:$0xff]  ;;  %v215_v4 = vld [vmem:[%s5157_s7] sm:$0xff]  ;;  %v222_v7 = vld [vmem:[#allocation11 + $0x10] sm:$0xff]  ;;  %s4267_s20 = smov 64   ;;  %vm232_vm2 = vcmask 261120   ;;  %vm3038_vm10 = vcmask 1043456  }
  0xe6   :  { %3398 = vmatprep.mubr.msk.f32.mxu1 %vm4265_vm0, %v4266_v1  ;;  %3387 = vmatprep.mubr.msk.f32.mxu0 %vm4265_vm0, %v4266_v1  ;;  %v4543_v5 = vpack.c.bf16 %v221_v3, %v220_v2  ;;  %v216_v6 = vld [vmem:[%s5157_s7 + $0x8] sm:$0xff]  ;;  %v223_v8 = vld [vmem:[#allocation11 + $0x18] sm:$0xff]  ;;  %v217_v10 = vld [vmem:[%s5157_s7 + $0x10] sm:$0xff]  ;;  %vm2137_vm11 = vcmask 1041408   ;;  %vm3040_vm12 = vcmask 1045504   ;;  %vm3140_vm13 = vcmask 62464  }
  0xe7   :  { %v4548_v9 = vpack.c.bf16 %v216_v6, %v215_v4  ;;  %v218_v11 = vld [vmem:[%s5157_s7 + $0x18] sm:$0xff]  ;;  %v4557_v12 = vpack.c.bf16 %v223_v8, %v222_v7  ;;  %v4582_v14 = vld [vmem:[#allocation13] ss:$0 sm:$0xff]  ;;  %v4587_v16 = vld [vmem:[%s5158_s8] ss:$0 sm:$0xff]  ;;  %s4268_s8 = smov 96  }
  0xe8   :  { %3651 = vmatpush3.bf16.msra.mxu1 %v4543_v5  ;;  %v4561_v13 = vpack.c.bf16 %v218_v11, %v217_v10  ;;  %v331_v22 = vld [vmem:[#allocation5 + $0xe] sm:$0x3]  ;;  %v225_v24 = vld [vmem:[#allocation2] sm:$0x3]  ;;  %v4602_v55 = vld [vmem:[#allocation8] sm:$0x3] }
  0xe9   :  { %3652 = vmatprep.subr.bf16.mxu1 %v4264_v0  ;;  %3645 = vmatpush3.bf16.msra.mxu0 %v4548_v9  ;;  %v4599_v54 = vld [vmem:[#allocation8 + $0xe] sm:$0x3]  ;;  %vm432_vm3 = vcmp.ne.f32.partialorder %v4602_v55, 0.0  ;;  %v547_v4 = vld [vmem:[#allocation5 + $0xc] sm:$0x3]  ;;  %vm3136_vm14 = vcmask 64512  }
  0xea   :  { %3646 = vmatprep.subr.bf16.mxu0 %v4264_v0  ;;  %vm438_vm1 = vcmp.ne.f32.partialorder %v4599_v54, 0.0  ;;  %v445_v7 = vld [vmem:[#allocation2 + $0x2] sm:$0x3]  ;;  %s5190_s26 = sld [smem:[#allocation32_spill]]  ;;  %vm3180_vm15 = vcmask 5120   ;;  %s4270_s30 = smov [#allocation20]  }
  0xeb   :  { %v2170_v54 = vld [vmem:[#allocation17 + $0x98] sm:$0xff] }
  0xec   :  { %3654 = vmatpush3.bf16.msra.mxu1 %v4557_v12 }
  0xed   :  { %3648 = vmatpush3.bf16.msra.mxu0 %v4561_v13  ;;  %3661 = vmatprep.subr.bf16.mxu1 %v4264_v0 }
  0xee   :  { %3655 = vmatprep.subr.bf16.mxu0 %v4264_v0 }
  0xef   :  { %3399 = vmatmul.mubr.f32.vlgmr.msra.gmra.mrb[0].mxu1 %v4266_v1 }
  0xf0   :  { %3388 = vmatmul.mubr.f32.vlgmr.msra.gmra.mrb[0].mxu0 %v4266_v1  ;;  %3663 = vmatpush3.bf16.msra.mxu1 %v4543_v5 }
  0xf1   :  { %3664 = vmatprep.subr.bf16.mxu1 %v4264_v0  ;;  %3657 = vmatpush3.bf16.msra.mxu0 %v4548_v9 }
  0xf2   :  { %3420 = vmatprep.mubr.msk.f32.mxu1 %vm4265_vm0, %v4266_v1  ;;  %3658 = vmatprep.subr.bf16.mxu0 %v4264_v0 }
  0xf3   :  { %3409 = vmatprep.mubr.msk.f32.mxu0 %vm4265_vm0, %v4266_v1 }
  0xf4   :  { %3666 = vmatpush3.bf16.msra.mxu1 %v4557_v12 }
  0xf5   :  { %3660 = vmatpush3.bf16.msra.mxu0 %v4561_v13  ;;  %3673 = vmatprep.subr.bf16.mxu1 %v4264_v0 }
  0xf6   :  { %3667 = vmatprep.subr.bf16.mxu0 %v4264_v0 }
 0x1c2   :  { %v404_v15 = vpop.f32.mrb[0].mxu1 }
 0x1c3   :  { %v405_v17 = vadd.f32 %v4582_v14, %v404_v15  ;;  %v3400_v18 = vpop.f32.mrb[1].mxu1  ;;  %v302_v19 = vpop.f32.mrb[0].mxu0 }
 0x1c4   :  { %v3389_v20 = vpop.f32.mrb[1].mxu0  ;;  %v303_v21 = vadd.f32 %v4587_v16, %v302_v19 }
 0x1c5   :  { %414 = vrot.lane.b32.xlu0 %v405_v17, %s4267_s20  ;;  %v408_v23 = vadd.f32 %v405_v17, %v331_v22 }
 0x1c6   :  { %v306_v26 = vadd.f32 %v303_v21, %v225_v24 }
 0x1c7   :  { %v409_v25 = vmul.f32 0.5, %v408_v23 }
 0x1c8   :  { %v307_v27 = vmul.f32 0.5, %v306_v26 }
 0x1c9   :  { %312 = vrot.lane.b32.xlu0 %v303_v21, %s4267_s20  ;;  %3863 = vtanh.f32 %v409_v25 }
 0x1ca   :  { %3865 = vtanh.f32 %v307_v27 }
 0x1d3   :  { %v3864_v28 = vpop.eup %3863 }
 0x1d4   :  { %v411_v29 = vadd.f32 1.0, %v3864_v28  ;;  %v3866_v30 = vpop.eup %3865 }
 0x1d5   :  { %v309_v31 = vadd.f32 1.0, %v3866_v30 }
 0x1d6   :  { %v412_v32 = vmul.f32 0.5, %v411_v29 }
 0x1d7   :  { %v310_v35 = vmul.f32 0.5, %v309_v31 }
 0x1d8   :  { %v424_v44 = vsub.f32 1.0, %v412_v32  ;;  %v430_v46 = vmul.f32 0.0, %v412_v32 }
 0x1d9   :  { %v322_v49 = vsub.f32 1.0, %v310_v35  ;;  %v328_v51 = vmul.f32 0.0, %v310_v35 }
 0x237   :  { %v415_v33 = vpop.permute.xlu0 %414 }
 0x238   :  { %v417_v34 = vmul.f32 %v415_v33, %v412_v32 }
 0x23a   :  { %419 = vrot.lane.b32.xlu1 %v417_v34, %s4267_s20 }
 0x23b   :  { %v313_v36 = vpop.permute.xlu0 %312 }
 0x23c   :  { %v315_v37 = vmul.f32 %v313_v36, %v310_v35 }
 0x23e   :  { %317 = vrot.lane.b32.xlu1 %v315_v37, %s4267_s20 }
 0x2ac   :  { %v420_v38 = vpop.permute.xlu1 %419 }
 0x2ad   :  { %v422_v39 = vadd.f32 %v420_v38, %v331_v22 }
 0x2af   :  { %3867 = vtanh.f32 %v422_v39 }
 0x2b0   :  { %v318_v40 = vpop.permute.xlu1 %317 }
 0x2b1   :  { %v320_v41 = vadd.f32 %v318_v40, %v225_v24 }
 0x2b3   :  { %3869 = vtanh.f32 %v320_v41 }
 0x2b9   :  { %v3868_v42 = vpop.eup %3867 }
 0x2ba   :  { %426 = vrot.lane.b32.xlu0 %v3868_v42, %s4268_s8 }
 0x2bd   :  { %v3870_v43 = vpop.eup %3869 }
 0x2be   :  { %324 = vrot.lane.b32.xlu1 %v3870_v43, %s4268_s8 }
 0x32c   :  { %v427_v45 = vpop.permute.xlu0 %426 }
 0x32d   :  { %v429_v47 = vmul.f32 %v427_v45, %v424_v44  ;;  %v4643_v44 = vld [vmem:[#allocation8 + $0xc] sm:$0x3]  ;;  %v4646_v45 = vld [vmem:[#allocation8 + $0x2] sm:$0x3] }
 0x32e   :  { %vm654_vm4 = vcmp.ne.f32.partialorder %v4643_v44, 0.0  ;;  %vm648_vm5 = vcmp.ne.f32.partialorder %v4646_v45, 0.0 }
 0x32f   :  { %v431_v48 = vadd.f32 %v430_v46, %v429_v47 }
 0x330   :  { %v325_v50 = vpop.permute.xlu1 %324 }
 0x331   :  { %v327_v52 = vmul.f32 %v325_v50, %v322_v49  ;;  %440 = vrot.lane.b32.xlu0 %v431_v48, %s4268_s8 }
 0x333   :  { %v329_v53 = vadd.f32 %v328_v51, %v327_v52 }
 0x335   :  { %434 = vrot.lane.b32.xlu1 %v329_v53, %s4268_s8 }
 0x3a3   :  { %v441_v56 = vpop.permute.xlu0 %440 }
 0x3a4   :  { %v4606_v57 = vsel %vm438_vm1, %v441_v56, 0.0 }
 0x3a5   :  { %3421 = vmatmul.mubr.msk.f32.vlgmr.msra.gmra.mrb[2].mxu1 %vm232_vm2, %v4606_v57 }
 0x3a6   :  { %3675 = vmatpush3.bf16.msra.mxu1 %v4543_v5  ;;  %3442 = vmatprep.mubr.msk.f32.mxu1 %vm4265_vm0, %v4266_v1 }
 0x3a7   :  { %v435_v58 = vpop.permute.xlu1 %434  ;;  %3676 = vmatprep.subr.bf16.mxu1 %v4264_v0 }
 0x3a8   :  { %v4617_v59 = vsel %vm432_vm3, %v435_v58, 0.0  ;;  %v763_v58 = vld [vmem:[#allocation5 + $0xa] sm:$0x3] }
 0x3a9   :  { %3410 = vmatmul.mubr.msk.f32.vlgmr.msra.gmra.mrb[2].mxu0 %vm232_vm2, %v4617_v59 }
 0x3aa   :  { %3669 = vmatpush3.bf16.msra.mxu0 %v4548_v9  ;;  %3678 = vmatpush3.bf16.msra.mxu1 %v4557_v12 }
 0x3ab   :  { %3670 = vmatprep.subr.bf16.mxu0 %v4264_v0  ;;  %3431 = vmatprep.mubr.msk.f32.mxu0 %vm4265_vm0, %v4266_v1 }
 0x3ac   :  { %3685 = vmatprep.subr.bf16.mxu1 %v4264_v0 }
 0x3ae   :  { %3672 = vmatpush3.bf16.msra.mxu0 %v4561_v13 }
 0x3af   :  { %3679 = vmatprep.subr.bf16.mxu0 %v4264_v0 }
 0x478   :  { %v617_v60 = vpop.f32.mrb[2].mxu1 }
 0x479   :  { %v618_v61 = vadd.f32 %v4582_v14, %v617_v60  ;;  %v3422_v62 = vpop.f32.mrb[3].mxu1  ;;  %v661_v60 = vld [vmem:[#allocation2 + $0x4] sm:$0x3] }
 0x47b   :  { %627 = vrot.lane.b32.xlu0 %v618_v61, %s4267_s20  ;;  %v621_v6 = vadd.f32 %v618_v61, %v547_v4 }
 0x47c   :  { %v515_v63 = vpop.f32.mrb[2].mxu0 }
 0x47d   :  { %v516_v2 = vadd.f32 %v4587_v16, %v515_v63  ;;  %v3411_v3 = vpop.f32.mrb[3].mxu0  ;;  %v622_v8 = vmul.f32 0.5, %v621_v6 }
 0x47f   :  { %525 = vrot.lane.b32.xlu1 %v516_v2, %s4267_s20  ;;  %v519_v10 = vadd.f32 %v516_v2, %v445_v7  ;;  %3871 = vtanh.f32 %v622_v8 }
 0x481   :  { %v520_v11 = vmul.f32 0.5, %v519_v10 }
 0x483   :  { %3873 = vtanh.f32 %v520_v11 }
 0x489   :  { %v3872_v15 = vpop.eup %3871 }
 0x48a   :  { %v624_v17 = vadd.f32 1.0, %v3872_v15 }
 0x48c   :  { %v625_v20 = vmul.f32 0.5, %v624_v17 }
 0x48d   :  { %v3874_v18 = vpop.eup %3873 }
 0x48e   :  { %v522_v19 = vadd.f32 1.0, %v3874_v18  ;;  %v637_v33 = vsub.f32 1.0, %v625_v20 }
 0x490   :  { %v523_v23 = vmul.f32 0.5, %v522_v19 }
 0x492   :  { %v535_v39 = vsub.f32 1.0, %v523_v23 }
 0x4ed   :  { %v628_v21 = vpop.permute.xlu0 %627 }
 0x4ee   :  { %v630_v22 = vmul.f32 %v628_v21, %v625_v20 }
 0x4f0   :  { %632 = vrot.lane.b32.xlu0 %v630_v22, %s4267_s20 }
 0x4f1   :  { %v526_v24 = vpop.permute.xlu1 %525 }
 0x4f2   :  { %v528_v25 = vmul.f32 %v526_v24, %v523_v23 }
 0x4f4   :  { %530 = vrot.lane.b32.xlu1 %v528_v25, %s4267_s20 }
 0x4f8   :  { %643 = vrot.lane.b32.xlu1 %v4606_v57, %s5188_s14 }
 0x4fc   :  { %541 = vrot.lane.b32.xlu1 %v4617_v59, %s5188_s14 }
 0x562   :  { %v633_v26 = vpop.permute.xlu0 %632 }
 0x563   :  { %v635_v27 = vadd.f32 %v633_v26, %v547_v4 }
 0x565   :  { %3875 = vtanh.f32 %v635_v27 }
 0x566   :  { %v531_v28 = vpop.permute.xlu1 %530 }
 0x567   :  { %v533_v29 = vadd.f32 %v531_v28, %v445_v7 }
 0x569   :  { %3877 = vtanh.f32 %v533_v29 }
 0x56a   :  { %v644_v32 = vpop.permute.xlu1 %643 }
 0x56b   :  { %v646_v35 = vmul.f32 %v644_v32, %v625_v20 }
 0x56e   :  { %v542_v37 = vpop.permute.xlu1 %541 }
 0x56f   :  { %v3876_v30 = vpop.eup %3875  ;;  %v544_v41 = vmul.f32 %v542_v37, %v523_v23  ;;  %v4692_v37 = vld [vmem:[#allocation8 + $0x4] sm:$0x3] }
 0x570   :  { %639 = vrot.lane.b32.xlu0 %v3876_v30, %s4268_s8  ;;  %vm864_vm7 = vcmp.ne.f32.partialorder %v4692_v37, 0.0  ;;  %v2274_v37 = vld [vmem:[#allocation7 + $0x6] sm:$0x3] }
 0x573   :  { %v3878_v31 = vpop.eup %3877 }
 0x574   :  { %537 = vrot.lane.b32.xlu0 %v3878_v31, %s4268_s8 }
 0x5e2   :  { %v640_v34 = vpop.permute.xlu0 %639 }
 0x5e3   :  { %v642_v36 = vmul.f32 %v640_v34, %v637_v33 }
 0x5e5   :  { %v647_v38 = vadd.f32 %v646_v35, %v642_v36  ;;  %v4689_v36 = vld [vmem:[#allocation8 + $0xa] sm:$0x3] }
 0x5e6   :  { %v538_v40 = vpop.permute.xlu0 %537  ;;  %vm870_vm6 = vcmp.ne.f32.partialorder %v4689_v36, 0.0 }
 0x5e7   :  { %v540_v42 = vmul.f32 %v538_v40, %v535_v39  ;;  %656 = vrot.lane.b32.xlu0 %v647_v38, %s4268_s8 }
 0x5e9   :  { %v545_v43 = vadd.f32 %v544_v41, %v540_v42 }
 0x5eb   :  { %650 = vrot.lane.b32.xlu1 %v545_v43, %s4268_s8 }
 0x659   :  { %v657_v46 = vpop.permute.xlu0 %656 }
 0x65a   :  { %v4651_v47 = vsel %vm654_vm4, %v657_v46, %v4606_v57 }
 0x65b   :  { %3443 = vmatmul.mubr.msk.f32.vlgmr.msra.gmra.mrb[4].mxu1 %vm232_vm2, %v4651_v47 }
 0x65c   :  { %3687 = vmatpush3.bf16.msra.mxu1 %v4543_v5  ;;  %3464 = vmatprep.mubr.msk.f32.mxu1 %vm4265_vm0, %v4266_v1 }
 0x65d   :  { %v651_v48 = vpop.permute.xlu1 %650  ;;  %3688 = vmatprep.subr.bf16.mxu1 %v4264_v0 }
 0x65e   :  { %v4663_v49 = vsel %vm648_vm5, %v651_v48, %v4617_v59 }
 0x65f   :  { %3432 = vmatmul.mubr.msk.f32.vlgmr.msra.gmra.mrb[4].mxu0 %vm232_vm2, %v4663_v49 }
 0x660   :  { %3681 = vmatpush3.bf16.msra.mxu0 %v4548_v9  ;;  %3690 = vmatpush3.bf16.msra.mxu1 %v4557_v12 }
 0x661   :  { %3682 = vmatprep.subr.bf16.mxu0 %v4264_v0  ;;  %3453 = vmatprep.mubr.msk.f32.mxu0 %vm4265_vm0, %v4266_v1 }
 0x662   :  { %3697 = vmatprep.subr.bf16.mxu1 %v4264_v0 }
 0x664   :  { %3684 = vmatpush3.bf16.msra.mxu0 %v4561_v13 }
 0x665   :  { %3691 = vmatprep.subr.bf16.mxu0 %v4264_v0 }
 0x72e   :  { %v833_v50 = vpop.f32.mrb[4].mxu1 }
 0x72f   :  { %v834_v51 = vadd.f32 %v4582_v14, %v833_v50  ;;  %v3444_v52 = vpop.f32.mrb[5].mxu1  ;;  %v979_v50 = vld [vmem:[#allocation5 + $0x8] sm:$0x3] }
 0x730   :  { %v877_v52 = vld [vmem:[#allocation2 + $0x6] sm:$0x3] }
 0x731   :  { %843 = vrot.lane.b32.xlu0 %v834_v51, %s4267_s20  ;;  %v837_v59 = vadd.f32 %v834_v51, %v763_v58 }
 0x732   :  { %v731_v53 = vpop.f32.mrb[4].mxu0 }
 0x733   :  { %v732_v56 = vadd.f32 %v4587_v16, %v731_v53  ;;  %v3433_v57 = vpop.f32.mrb[5].mxu0  ;;  %v838_v61 = vmul.f32 0.5, %v837_v59 }
 0x735   :  { %741 = vrot.lane.b32.xlu1 %v732_v56, %s4267_s20  ;;  %v735_v62 = vadd.f32 %v732_v56, %v661_v60  ;;  %3879 = vtanh.f32 %v838_v61 }
 0x737   :  { %v736_v63 = vmul.f32 0.5, %v735_v62 }
 0x739   :  { %3881 = vtanh.f32 %v736_v63 }
 0x73f   :  { %v3880_v2 = vpop.eup %3879 }
 0x740   :  { %v840_v3 = vadd.f32 1.0, %v3880_v2 }
 0x742   :  { %v841_v7 = vmul.f32 0.5, %v840_v3 }
 0x743   :  { %v3882_v4 = vpop.eup %3881 }
 0x744   :  { %v738_v6 = vadd.f32 1.0, %v3882_v4  ;;  %v853_v25 = vsub.f32 1.0, %v841_v7 }
 0x746   :  { %v739_v11 = vmul.f32 0.5, %v738_v6 }
 0x748   :  { %v751_v31 = vsub.f32 1.0, %v739_v11 }
 0x7a3   :  { %v844_v8 = vpop.permute.xlu0 %843 }
 0x7a4   :  { %v846_v10 = vmul.f32 %v844_v8, %v841_v7 }
 0x7a6   :  { %848 = vrot.lane.b32.xlu0 %v846_v10, %s4267_s20 }
 0x7a7   :  { %v742_v15 = vpop.permute.xlu1 %741 }
 0x7a8   :  { %v744_v17 = vmul.f32 %v742_v15, %v739_v11 }
 0x7aa   :  { %746 = vrot.lane.b32.xlu1 %v744_v17, %s4267_s20 }
 0x7ae   :  { %859 = vrot.lane.b32.xlu1 %v4651_v47, %s5188_s14 }
 0x7b2   :  { %757 = vrot.lane.b32.xlu1 %v4663_v49, %s5188_s14 }
 0x818   :  { %v849_v18 = vpop.permute.xlu0 %848 }
 0x819   :  { %v851_v19 = vadd.f32 %v849_v18, %v763_v58 }
 0x81b   :  { %3883 = vtanh.f32 %v851_v19 }
 0x81c   :  { %v747_v20 = vpop.permute.xlu1 %746 }
 0x81d   :  { %v749_v21 = vadd.f32 %v747_v20, %v661_v60 }
 0x81f   :  { %3885 = vtanh.f32 %v749_v21 }
 0x820   :  { %v860_v24 = vpop.permute.xlu1 %859 }
 0x821   :  { %v862_v27 = vmul.f32 %v860_v24, %v841_v7 }
 0x824   :  { %v758_v29 = vpop.permute.xlu1 %757 }
 0x825   :  { %v3884_v22 = vpop.eup %3883  ;;  %v760_v33 = vmul.f32 %v758_v29, %v739_v11 }
 0x826   :  { %855 = vrot.lane.b32.xlu0 %v3884_v22, %s4268_s8 }
 0x829   :  { %v3886_v23 = vpop.eup %3885 }
 0x82a   :  { %753 = vrot.lane.b32.xlu0 %v3886_v23, %s4268_s8 }
 0x898   :  { %v856_v26 = vpop.permute.xlu0 %855 }
 0x899   :  { %v858_v28 = vmul.f32 %v856_v26, %v853_v25 }
 0x89b   :  { %v863_v30 = vadd.f32 %v862_v27, %v858_v28 }
 0x89c   :  { %v754_v32 = vpop.permute.xlu0 %753 }
 0x89d   :  { %v756_v34 = vmul.f32 %v754_v32, %v751_v31  ;;  %872 = vrot.lane.b32.xlu0 %v863_v30, %s4268_s8  ;;  %v4735_v30 = vld [vmem:[#allocation8 + $0x8] sm:$0x3]  ;;  %v4738_v31 = vld [vmem:[#allocation8 + $0x6] sm:$0x3] }
 0x89e   :  { %vm1086_vm8 = vcmp.ne.f32.partialorder %v4735_v30, 0.0  ;;  %vm1080_vm9 = vcmp.ne.f32.partialorder %v4738_v31, 0.0 }
 0x89f   :  { %v761_v35 = vadd.f32 %v760_v33, %v756_v34 }
 0x8a1   :  { %866 = vrot.lane.b32.xlu1 %v761_v35, %s4268_s8 }
 0x90f   :  { %v873_v38 = vpop.permute.xlu0 %872 }
 0x910   :  { %v4697_v39 = vsel %vm870_vm6, %v873_v38, %v4651_v47 }
 0x911   :  { %3465 = vmatmul.mubr.msk.f32.vlgmr.msra.gmra.mrb[6].mxu1 %vm232_vm2, %v4697_v39 }
 0x912   :  { %3699 = vmatpush3.bf16.msra.mxu1 %v4543_v5  ;;  %3486 = vmatprep.mubr.msk.f32.mxu1 %vm4265_vm0, %v4266_v1 }
 0x913   :  { %v867_v40 = vpop.permute.xlu1 %866  ;;  %3700 = vmatprep.subr.bf16.mxu1 %v4264_v0 }
 0x914   :  { %v4709_v41 = vsel %vm864_vm7, %v867_v40, %v4663_v49 }
 0x915   :  { %3454 = vmatmul.mubr.msk.f32.vlgmr.msra.gmra.mrb[6].mxu0 %vm232_vm2, %v4709_v41 }
 0x916   :  { %3693 = vmatpush3.bf16.msra.mxu0 %v4548_v9  ;;  %3702 = vmatpush3.bf16.msra.mxu1 %v4557_v12 }
 0x917   :  { %3694 = vmatprep.subr.bf16.mxu0 %v4264_v0  ;;  %3475 = vmatprep.mubr.msk.f32.mxu0 %vm4265_vm0, %v4266_v1 }
 0x918   :  { %3709 = vmatprep.subr.bf16.mxu1 %v4264_v0 }
 0x91a   :  { %3696 = vmatpush3.bf16.msra.mxu0 %v4561_v13 }
 0x91b   :  { %3703 = vmatprep.subr.bf16.mxu0 %v4264_v0 }
 0x9e4   :  { %v1049_v42 = vpop.f32.mrb[6].mxu1 }
 0x9e5   :  { %v1050_v43 = vadd.f32 %v4582_v14, %v1049_v42  ;;  %v3466_v46 = vpop.f32.mrb[7].mxu1 }
 0x9e6   :  { %v1195_v46 = vld [vmem:[#allocation5 + $0x6] sm:$0x3] }
 0x9e7   :  { %1059 = vrot.lane.b32.xlu0 %v1050_v43, %s4267_s20  ;;  %v1053_v51 = vadd.f32 %v1050_v43, %v979_v50 }
 0x9e8   :  { %v947_v47 = vpop.f32.mrb[6].mxu0 }
 0x9e9   :  { %v948_v48 = vadd.f32 %v4587_v16, %v947_v47  ;;  %v3455_v49 = vpop.f32.mrb[7].mxu0  ;;  %v1054_v53 = vmul.f32 0.5, %v1053_v51 }
 0x9eb   :  { %957 = vrot.lane.b32.xlu1 %v948_v48, %s4267_s20  ;;  %v951_v56 = vadd.f32 %v948_v48, %v877_v52  ;;  %3887 = vtanh.f32 %v1054_v53  ;;  %v1093_v48 = vld [vmem:[#allocation2 + $0x8] sm:$0x3] }
 0x9ed   :  { %v952_v57 = vmul.f32 0.5, %v951_v56 }
 0x9ef   :  { %3889 = vtanh.f32 %v952_v57 }
 0x9f5   :  { %v3888_v58 = vpop.eup %3887 }
 0x9f6   :  { %v1056_v59 = vadd.f32 1.0, %v3888_v58 }
 0x9f8   :  { %v1057_v61 = vmul.f32 0.5, %v1056_v59 }
 0x9f9   :  { %v3890_v60 = vpop.eup %3889 }
 0x9fa   :  { %v954_v62 = vadd.f32 1.0, %v3890_v60  ;;  %v1069_v19 = vsub.f32 1.0, %v1057_v61 }
 0x9fc   :  { %v955_v3 = vmul.f32 0.5, %v954_v62 }
 0x9fe   :  { %v967_v25 = vsub.f32 1.0, %v955_v3 }
 0xa59   :  { %v1060_v63 = vpop.permute.xlu0 %1059 }
 0xa5a   :  { %v1062_v2 = vmul.f32 %v1060_v63, %v1057_v61 }
 0xa5c   :  { %1064 = vrot.lane.b32.xlu0 %v1062_v2, %s4267_s20 }
 0xa5d   :  { %v958_v4 = vpop.permute.xlu1 %957 }
 0xa5e   :  { %v960_v6 = vmul.f32 %v958_v4, %v955_v3 }
 0xa60   :  { %962 = vrot.lane.b32.xlu1 %v960_v6, %s4267_s20 }
 0xa64   :  { %1075 = vrot.lane.b32.xlu1 %v4697_v39, %s5188_s14 }
 0xa68   :  { %973 = vrot.lane.b32.xlu1 %v4709_v41, %s5188_s14 }
 0xace   :  { %v1065_v7 = vpop.permute.xlu0 %1064 }
 0xacf   :  { %v1067_v8 = vadd.f32 %v1065_v7, %v979_v50 }
 0xad1   :  { %3891 = vtanh.f32 %v1067_v8 }
 0xad2   :  { %v963_v10 = vpop.permute.xlu1 %962 }
 0xad3   :  { %v965_v11 = vadd.f32 %v963_v10, %v877_v52 }
 0xad5   :  { %3893 = vtanh.f32 %v965_v11 }
 0xad6   :  { %v1076_v18 = vpop.permute.xlu1 %1075 }
 0xad7   :  { %v1078_v21 = vmul.f32 %v1076_v18, %v1057_v61 }
 0xada   :  { %v974_v23 = vpop.permute.xlu1 %973 }
 0xadb   :  { %v3892_v15 = vpop.eup %3891  ;;  %v976_v27 = vmul.f32 %v974_v23, %v955_v3 }
 0xadc   :  { %1071 = vrot.lane.b32.xlu0 %v3892_v15, %s4268_s8 }
 0xadf   :  { %v3894_v17 = vpop.eup %3893 }
 0xae0   :  { %969 = vrot.lane.b32.xlu0 %v3894_v17, %s4268_s8 }
 0xb4e   :  { %v1072_v20 = vpop.permute.xlu0 %1071 }
 0xb4f   :  { %v1074_v22 = vmul.f32 %v1072_v20, %v1069_v19 }
 0xb51   :  { %v1079_v24 = vadd.f32 %v1078_v21, %v1074_v22 }
 0xb52   :  { %v970_v26 = vpop.permute.xlu0 %969 }
 0xb53   :  { %v972_v28 = vmul.f32 %v970_v26, %v967_v25  ;;  %1088 = vrot.lane.b32.xlu0 %v1079_v24, %s4268_s8 }
 0xb55   :  { %v977_v29 = vadd.f32 %v976_v27, %v972_v28 }
 0xb57   :  { %1082 = vrot.lane.b32.xlu1 %v977_v29, %s4268_s8 }
 0xbc5   :  { %v1089_v32 = vpop.permute.xlu0 %1088 }
 0xbc6   :  { %v4743_v33 = vsel %vm1086_vm8, %v1089_v32, %v4697_v39 }
 0xbc7   :  { %3487 = vmatmul.mubr.msk.f32.vlgmr.msra.gmra.mrb[8].mxu1 %vm232_vm2, %v4743_v33 }
 0xbc8   :  { %3711 = vmatpush3.bf16.msra.mxu1 %v4543_v5  ;;  %3508 = vmatprep.mubr.msk.f32.mxu1 %vm4265_vm0, %v4266_v1 }
 0xbc9   :  { %v1083_v34 = vpop.permute.xlu1 %1082  ;;  %3712 = vmatprep.subr.bf16.mxu1 %v4264_v0 }
 0xbca   :  { %v4755_v35 = vsel %vm1080_vm9, %v1083_v34, %v4709_v41 }
 0xbcb   :  { %3476 = vmatmul.mubr.msk.f32.vlgmr.msra.gmra.mrb[8].mxu0 %vm232_vm2, %v4755_v35 }
 0xbcc   :  { %3705 = vmatpush3.bf16.msra.mxu0 %v4548_v9  ;;  %3714 = vmatpush3.bf16.msra.mxu1 %v4557_v12 }
 0xbcd   :  { %3706 = vmatprep.subr.bf16.mxu0 %v4264_v0  ;;  %3497 = vmatprep.mubr.msk.f32.mxu0 %vm4265_vm0, %v4266_v1 }
 0xbce   :  { %3721 = vmatprep.subr.bf16.mxu1 %v4264_v0 }
 0xbd0   :  { %3708 = vmatpush3.bf16.msra.mxu0 %v4561_v13 }
 0xbd1   :  { %3715 = vmatprep.subr.bf16.mxu0 %v4264_v0 }
 0xc9a   :  { %v1265_v38 = vpop.f32.mrb[8].mxu1 }
 0xc9b   :  { %v1266_v39 = vadd.f32 %v4582_v14, %v1265_v38  ;;  %v3488_v40 = vpop.f32.mrb[9].mxu1 }
 0xc9c   :  { %v1409_v40 = vld [vmem:[#allocation5 + $0x4] sm:$0x3] }
 0xc9d   :  { %1275 = vrot.lane.b32.xlu0 %v1266_v39, %s4267_s20  ;;  %v1269_v47 = vadd.f32 %v1266_v39, %v1195_v46 }
 0xc9e   :  { %v1163_v41 = vpop.f32.mrb[8].mxu0 }
 0xc9f   :  { %v1164_v42 = vadd.f32 %v4587_v16, %v1163_v41  ;;  %v3477_v43 = vpop.f32.mrb[9].mxu0  ;;  %v1270_v49 = vmul.f32 0.5, %v1269_v47 }
 0xca1   :  { %1173 = vrot.lane.b32.xlu1 %v1164_v42, %s4267_s20  ;;  %v1167_v50 = vadd.f32 %v1164_v42, %v1093_v48  ;;  %3895 = vtanh.f32 %v1270_v49  ;;  %v1307_v42 = vld [vmem:[#allocation2 + $0xa] sm:$0x3] }
 0xca3   :  { %v1168_v51 = vmul.f32 0.5, %v1167_v50 }
 0xca5   :  { %3897 = vtanh.f32 %v1168_v51 }
 0xcab   :  { %v3896_v52 = vpop.eup %3895 }
 0xcac   :  { %v1272_v53 = vadd.f32 1.0, %v3896_v52 }
 0xcae   :  { %v1273_v57 = vmul.f32 0.5, %v1272_v53 }
 0xcaf   :  { %v3898_v56 = vpop.eup %3897 }
 0xcb0   :  { %v1170_v58 = vadd.f32 1.0, %v3898_v56  ;;  %v1285_v11 = vsub.f32 1.0, %v1273_v57 }
 0xcb2   :  { %v1171_v61 = vmul.f32 0.5, %v1170_v58 }
 0xcb4   :  { %v1183_v21 = vsub.f32 1.0, %v1171_v61 }
 0xd0f   :  { %v1276_v59 = vpop.permute.xlu0 %1275 }
 0xd10   :  { %v1278_v60 = vmul.f32 %v1276_v59, %v1273_v57 }
 0xd12   :  { %1280 = vrot.lane.b32.xlu0 %v1278_v60, %s4267_s20 }
 0xd13   :  { %v1174_v62 = vpop.permute.xlu1 %1173 }
 0xd14   :  { %v1176_v63 = vmul.f32 %v1174_v62, %v1171_v61 }
 0xd16   :  { %1178 = vrot.lane.b32.xlu1 %v1176_v63, %s4267_s20 }
 0xd1a   :  { %1291 = vrot.lane.b32.xlu1 %v4743_v33, %s5188_s14 }
 0xd1e   :  { %1189 = vrot.lane.b32.xlu1 %v4755_v35, %s5188_s14 }
 0xd84   :  { %v1281_v2 = vpop.permute.xlu0 %1280 }
 0xd85   :  { %v1283_v3 = vadd.f32 %v1281_v2, %v1195_v46 }
 0xd87   :  { %3899 = vtanh.f32 %v1283_v3 }
 0xd88   :  { %v1179_v4 = vpop.permute.xlu1 %1178 }
 0xd89   :  { %v1181_v6 = vadd.f32 %v1179_v4, %v1093_v48 }
 0xd8b   :  { %3901 = vtanh.f32 %v1181_v6 }
 0xd8c   :  { %v1292_v10 = vpop.permute.xlu1 %1291 }
 0xd8d   :  { %v1294_v17 = vmul.f32 %v1292_v10, %v1273_v57 }
 0xd90   :  { %v1190_v19 = vpop.permute.xlu1 %1189 }
 0xd91   :  { %v3900_v7 = vpop.eup %3899  ;;  %v1192_v23 = vmul.f32 %v1190_v19, %v1171_v61 }
 0xd92   :  { %1287 = vrot.lane.b32.xlu0 %v3900_v7, %s4268_s8 }
 0xd95   :  { %v3902_v8 = vpop.eup %3901 }
 0xd96   :  { %1185 = vrot.lane.b32.xlu0 %v3902_v8, %s4268_s8 }
 0xe04   :  { %v1288_v15 = vpop.permute.xlu0 %1287 }
 0xe05   :  { %v1290_v18 = vmul.f32 %v1288_v15, %v1285_v11 }
 0xe07   :  { %v1295_v20 = vadd.f32 %v1294_v17, %v1290_v18 }
 0xe08   :  { %v1186_v22 = vpop.permute.xlu0 %1185 }
 0xe09   :  { %v1188_v24 = vmul.f32 %v1186_v22, %v1183_v21  ;;  %1302 = vrot.lane.b32.xlu0 %v1295_v20, %s4268_s8 }
 0xe0b   :  { %v1193_v25 = vadd.f32 %v1192_v23, %v1188_v24 }
 0xe0d   :  { %1297 = vrot.lane.b32.xlu1 %v1193_v25, %s4268_s8 }
 0xe7b   :  { %v1303_v26 = vpop.permute.xlu0 %1302 }
 0xe7c   :  { %v4784_v27 = vsel %vm1080_vm9, %v1303_v26, %v4743_v33 }
 0xe7d   :  { %3509 = vmatmul.mubr.msk.f32.vlgmr.msra.gmra.mrb[10].mxu1 %vm232_vm2, %v4784_v27 }
 0xe7e   :  { %3723 = vmatpush3.bf16.msra.mxu1 %v4543_v5  ;;  %3530 = vmatprep.mubr.msk.f32.mxu1 %vm4265_vm0, %v4266_v1 }
 0xe7f   :  { %v1298_v28 = vpop.permute.xlu1 %1297  ;;  %3724 = vmatprep.subr.bf16.mxu1 %v4264_v0 }
 0xe80   :  { %v4795_v29 = vsel %vm1086_vm8, %v1298_v28, %v4755_v35 }
 0xe81   :  { %3498 = vmatmul.mubr.msk.f32.vlgmr.msra.gmra.mrb[10].mxu0 %vm232_vm2, %v4795_v29 }
 0xe82   :  { %3717 = vmatpush3.bf16.msra.mxu0 %v4548_v9  ;;  %3726 = vmatpush3.bf16.msra.mxu1 %v4557_v12 }
 0xe83   :  { %3718 = vmatprep.subr.bf16.mxu0 %v4264_v0  ;;  %3519 = vmatprep.mubr.msk.f32.mxu0 %vm4265_vm0, %v4266_v1 }
 0xe84   :  { %3733 = vmatprep.subr.bf16.mxu1 %v4264_v0 }
 0xe86   :  { %3720 = vmatpush3.bf16.msra.mxu0 %v4561_v13 }
 0xe87   :  { %3727 = vmatprep.subr.bf16.mxu0 %v4264_v0 }
 0xf50   :  { %v1479_v32 = vpop.f32.mrb[10].mxu1 }
 0xf51   :  { %v1480_v33 = vadd.f32 %v4582_v14, %v1479_v32  ;;  %v3510_v34 = vpop.f32.mrb[11].mxu1 }
 0xf53   :  { %1489 = vrot.lane.b32.xlu0 %v1480_v33, %s4267_s20  ;;  %v1483_v41 = vadd.f32 %v1480_v33, %v1409_v40  ;;  %v1521_v33 = vld [vmem:[#allocation2 + $0xc] sm:$0x3] }
 0xf54   :  { %v1377_v35 = vpop.f32.mrb[10].mxu0 }
 0xf55   :  { %v1378_v38 = vadd.f32 %v4587_v16, %v1377_v35  ;;  %v3499_v39 = vpop.f32.mrb[11].mxu0  ;;  %v1484_v43 = vmul.f32 0.5, %v1483_v41 }
 0xf57   :  { %1387 = vrot.lane.b32.xlu1 %v1378_v38, %s4267_s20  ;;  %v1381_v46 = vadd.f32 %v1378_v38, %v1307_v42  ;;  %3903 = vtanh.f32 %v1484_v43 }
 0xf59   :  { %v1382_v47 = vmul.f32 0.5, %v1381_v46 }
 0xf5b   :  { %3905 = vtanh.f32 %v1382_v47 }
 0xf61   :  { %v3904_v48 = vpop.eup %3903 }
 0xf62   :  { %v1486_v49 = vadd.f32 1.0, %v3904_v48 }
 0xf64   :  { %v1487_v51 = vmul.f32 0.5, %v1486_v49 }
 0xf65   :  { %v3906_v50 = vpop.eup %3905 }
 0xf66   :  { %v1384_v52 = vadd.f32 1.0, %v3906_v50  ;;  %v1499_v6 = vsub.f32 1.0, %v1487_v51 }
 0xf68   :  { %v1385_v57 = vmul.f32 0.5, %v1384_v52 }
 0xf6a   :  { %v1397_v17 = vsub.f32 1.0, %v1385_v57 }
 0xfc5   :  { %v1490_v53 = vpop.permute.xlu0 %1489 }
 0xfc6   :  { %v1492_v56 = vmul.f32 %v1490_v53, %v1487_v51 }
 0xfc8   :  { %1494 = vrot.lane.b32.xlu0 %v1492_v56, %s4267_s20 }
 0xfc9   :  { %v1388_v58 = vpop.permute.xlu1 %1387 }
 0xfca   :  { %v1390_v59 = vmul.f32 %v1388_v58, %v1385_v57 }
 0xfcc   :  { %1392 = vrot.lane.b32.xlu1 %v1390_v59, %s4267_s20 }
 0xfd0   :  { %1505 = vrot.lane.b32.xlu1 %v4784_v27, %s5188_s14 }
 0xfd4   :  { %1403 = vrot.lane.b32.xlu1 %v4795_v29, %s5188_s14 }
0x103a   :  { %v1495_v60 = vpop.permute.xlu0 %1494 }
0x103b   :  { %v1497_v61 = vadd.f32 %v1495_v60, %v1409_v40 }
0x103d   :  { %3907 = vtanh.f32 %v1497_v61 }
0x103e   :  { %v1393_v62 = vpop.permute.xlu1 %1392 }
0x103f   :  { %v1395_v63 = vadd.f32 %v1393_v62, %v1307_v42 }
0x1041   :  { %3909 = vtanh.f32 %v1395_v63 }
0x1042   :  { %v1506_v4 = vpop.permute.xlu1 %1505 }
0x1043   :  { %v1508_v8 = vmul.f32 %v1506_v4, %v1487_v51 }
0x1046   :  { %v1404_v11 = vpop.permute.xlu1 %1403 }
0x1047   :  { %v3908_v2 = vpop.eup %3907  ;;  %v1406_v19 = vmul.f32 %v1404_v11, %v1385_v57 }
0x1048   :  { %1501 = vrot.lane.b32.xlu0 %v3908_v2, %s4268_s8 }
0x104b   :  { %v3910_v3 = vpop.eup %3909 }
0x104c   :  { %1399 = vrot.lane.b32.xlu0 %v3910_v3, %s4268_s8 }
0x10ba   :  { %v1502_v7 = vpop.permute.xlu0 %1501 }
0x10bb   :  { %v1504_v10 = vmul.f32 %v1502_v7, %v1499_v6 }
0x10bd   :  { %v1509_v15 = vadd.f32 %v1508_v8, %v1504_v10 }
0x10be   :  { %v1400_v18 = vpop.permute.xlu0 %1399 }
0x10bf   :  { %v1402_v20 = vmul.f32 %v1400_v18, %v1397_v17  ;;  %1516 = vrot.lane.b32.xlu0 %v1509_v15, %s4268_s8 }
0x10c1   :  { %v1407_v21 = vadd.f32 %v1406_v19, %v1402_v20 }
0x10c3   :  { %1511 = vrot.lane.b32.xlu1 %v1407_v21, %s4268_s8 }
0x1131   :  { %v1517_v22 = vpop.permute.xlu0 %1516 }
0x1132   :  { %v4824_v23 = vsel %vm864_vm7, %v1517_v22, %v4784_v27 }
0x1133   :  { %3531 = vmatmul.mubr.msk.f32.vlgmr.msra.gmra.mrb[12].mxu1 %vm232_vm2, %v4824_v23 }
0x1134   :  { %3735 = vmatpush3.bf16.msra.mxu1 %v4543_v5  ;;  %3552 = vmatprep.mubr.msk.f32.mxu1 %vm4265_vm0, %v4266_v1 }
0x1135   :  { %v1512_v24 = vpop.permute.xlu1 %1511  ;;  %3736 = vmatprep.subr.bf16.mxu1 %v4264_v0 }
0x1136   :  { %v4835_v25 = vsel %vm870_vm6, %v1512_v24, %v4795_v29  ;;  %v1836_v24 = vld [vmem:[#allocation5] sm:$0x3] }
0x1137   :  { %3520 = vmatmul.mubr.msk.f32.vlgmr.msra.gmra.mrb[12].mxu0 %vm232_vm2, %v4835_v25 }
0x1138   :  { %3729 = vmatpush3.bf16.msra.mxu0 %v4548_v9  ;;  %3738 = vmatpush3.bf16.msra.mxu1 %v4557_v12  ;;  %v1623_v9 = vld [vmem:[#allocation5 + $0x2] sm:$0x3] }
0x1139   :  { %3730 = vmatprep.subr.bf16.mxu0 %v4264_v0  ;;  %3541 = vmatprep.mubr.msk.f32.mxu0 %vm4265_vm0, %v4266_v1 }
0x113c   :  { %3732 = vmatpush3.bf16.msra.mxu0 %v4561_v13 }
0x1206   :  { %v1693_v5 = vpop.f32.mrb[12].mxu1 }
0x1207   :  { %v1694_v26 = vadd.f32 %v4582_v14, %v1693_v5  ;;  %v3532_v27 = vpop.f32.mrb[13].mxu1  ;;  %v1735_v5 = vld [vmem:[#allocation2 + $0xe] sm:$0x3] }
0x1209   :  { %1703 = vrot.lane.b32.xlu0 %v1694_v26, %s4267_s20  ;;  %v1697_v12 = vadd.f32 %v1694_v26, %v1623_v9 }
0x120a   :  { %v1591_v28 = vpop.f32.mrb[12].mxu0 }
0x120b   :  { %v1592_v29 = vadd.f32 %v4587_v16, %v1591_v28  ;;  %v3521_v32 = vpop.f32.mrb[13].mxu0  ;;  %v1698_v34 = vmul.f32 0.5, %v1697_v12 }
0x120d   :  { %1601 = vrot.lane.b32.xlu1 %v1592_v29, %s4267_s20  ;;  %v1595_v35 = vadd.f32 %v1592_v29, %v1521_v33  ;;  %3911 = vtanh.f32 %v1698_v34 }
0x120f   :  { %v1596_v38 = vmul.f32 0.5, %v1595_v35 }
0x1211   :  { %3913 = vtanh.f32 %v1596_v38 }
0x1217   :  { %v3912_v13 = vpop.eup %3911 }
0x1218   :  { %v1700_v39 = vadd.f32 1.0, %v3912_v13 }
0x121a   :  { %v1701_v41 = vmul.f32 0.5, %v1700_v39 }
0x121b   :  { %v3914_v40 = vpop.eup %3913 }
0x121c   :  { %v1598_v42 = vadd.f32 1.0, %v3914_v40  ;;  %v1713_v59 = vsub.f32 1.0, %v1701_v41 }
0x121e   :  { %v1599_v47 = vmul.f32 0.5, %v1598_v42  ;;  %v1956_v42 = vld [vmem:[#allocation14 + $0x8] sm:$0xff] }
0x1220   :  { %v1611_v3 = vsub.f32 1.0, %v1599_v47 }
0x127b   :  { %v1704_v43 = vpop.permute.xlu0 %1703 }
0x127c   :  { %v1706_v46 = vmul.f32 %v1704_v43, %v1701_v41  ;;  %v1958_v43 = vld [vmem:[#allocation14 + $0x18] sm:$0xff] }
0x127e   :  { %1708 = vrot.lane.b32.xlu0 %v1706_v46, %s4267_s20  ;;  %v1955_v46 = vld [vmem:[#allocation14] sm:$0xff] }
0x127f   :  { %v1602_v48 = vpop.permute.xlu1 %1601 }
0x1280   :  { %v1604_v49 = vmul.f32 %v1602_v48, %v1599_v47  ;;  %v1957_v48 = vld [vmem:[#allocation14 + $0x10] sm:$0xff] }
0x1282   :  { %1606 = vrot.lane.b32.xlu1 %v1604_v49, %s4267_s20  ;;  %v1960_v49 = vld [vmem:[#allocation14 + $0x28] sm:$0xff] }
0x1286   :  { %1719 = vrot.lane.b32.xlu1 %v4824_v23, %s5188_s14 }
0x128a   :  { %1617 = vrot.lane.b32.xlu1 %v4835_v25, %s5188_s14 }
0x12f0   :  { %v1709_v50 = vpop.permute.xlu0 %1708 }
0x12f1   :  { %v1711_v51 = vadd.f32 %v1709_v50, %v1623_v9  ;;  %v1962_v50 = vld [vmem:[#allocation14 + $0x38] sm:$0xff] }
0x12f3   :  { %3915 = vtanh.f32 %v1711_v51  ;;  %v3741_v51 = vpack.c.bf16 %v1957_v48, %v1955_v46 }
0x12f4   :  { %v1607_v52 = vpop.permute.xlu1 %1606 }
0x12f5   :  { %v1609_v53 = vadd.f32 %v1607_v52, %v1521_v33  ;;  %v3743_v52 = vpack.c.bf16 %v1962_v50, %v1960_v49  ;;  %v2161_v49 = vld [vmem:[#allocation17 + $0x50] sm:$0xff] }
0x12f7   :  { %3917 = vtanh.f32 %v1609_v53  ;;  %v1959_v53 = vld [vmem:[#allocation14 + $0x20] sm:$0xff] }
0x12f8   :  { %v1720_v58 = vpop.permute.xlu1 %1719 }
0x12f9   :  { %v1722_v61 = vmul.f32 %v1720_v58, %v1701_v41 }
0x12fc   :  { %v1618_v63 = vpop.permute.xlu1 %1617 }
0x12fd   :  { %v3916_v56 = vpop.eup %3915  ;;  %v1620_v6 = vmul.f32 %v1618_v63, %v1599_v47  ;;  %v3739_v47 = vpack.c.bf16 %v1958_v43, %v1956_v42  ;;  %v1953_v42 = vld [vmem:[%s5161_s11 + $0x30] sm:$0xff] }
0x12fe   :  { %1715 = vrot.lane.b32.xlu0 %v3916_v56, %s4268_s8  ;;  %v1961_v56 = vld [vmem:[#allocation14 + $0x30] sm:$0xff] }
0x12ff   :  { %3740 = vmatprep.subr.bf16.mxu0 %v3739_v47  ;;  %v3745_v58 = vpack.c.bf16 %v1961_v56, %v1959_v53  ;;  %v2163_v56 = vld [vmem:[#allocation17 + $0x60] sm:$0xff] }
0x1301   :  { %v3918_v57 = vpop.eup %3917 }
0x1302   :  { %1613 = vrot.lane.b32.xlu0 %v3918_v57, %s4268_s8 }
0x1370   :  { %v1716_v60 = vpop.permute.xlu0 %1715 }
0x1371   :  { %v1718_v62 = vmul.f32 %v1716_v60, %v1713_v59  ;;  %v1948_v60 = vld [vmem:[%s5161_s11 + $0x8] sm:$0xff] }
0x1373   :  { %v1723_v2 = vadd.f32 %v1722_v61, %v1718_v62  ;;  %v1950_v61 = vld [vmem:[%s5161_s11 + $0x18] sm:$0xff] }
0x1374   :  { %v1614_v4 = vpop.permute.xlu0 %1613  ;;  %v3747_v62 = vpack.c.bf16 %v1950_v61, %v1948_v60  ;;  %v2167_v60 = vld [vmem:[#allocation17 + $0x80] sm:$0xff]  ;;  %v2169_v61 = vld [vmem:[#allocation17 + $0x90] sm:$0xff] }
0x1375   :  { %v1616_v7 = vmul.f32 %v1614_v4, %v1611_v3  ;;  %1730 = vrot.lane.b32.xlu0 %v1723_v2, %s4268_s8 }
0x1377   :  { %v1621_v8 = vadd.f32 %v1620_v6, %v1616_v7  ;;  %v2152_v7 = vld [vmem:[#allocation17 + $0x8] sm:$0xff] }
0x1379   :  { %1725 = vrot.lane.b32.xlu1 %v1621_v8, %s4268_s8  ;;  %v2154_v8 = vld [vmem:[#allocation17 + $0x18] sm:$0xff] }
0x13e7   :  { %v1731_v10 = vpop.permute.xlu0 %1730 }
0x13e8   :  { %v4862_v11 = vsel %vm648_vm5, %v1731_v10, %v4824_v23  ;;  %v2151_v10 = vld [vmem:[#allocation17] sm:$0xff] }
0x13e9   :  { %3553 = vmatmul.mubr.msk.f32.vlgmr.msra.gmra.mrb[14].mxu1 %vm232_vm2, %v4862_v11 }
0x13ea   :  { %2259 = vmatprep.mubr.f32.mxu1 %v4266_v1 }
0x13eb   :  { %v1726_v15 = vpop.permute.xlu1 %1725 }
0x13ec   :  { %v4870_v17 = vsel %vm654_vm4, %v1726_v15, %v4835_v25 }
0x13ed   :  { %3542 = vmatmul.mubr.msk.f32.vlgmr.msra.gmra.mrb[14].mxu0 %vm232_vm2, %v4870_v17 }
0x13ee   :  { %2030 = vmatprep.mubr.f32.mxu0 %v4266_v1  ;;  %3742 = vmatpush1.bf16.msra.mxu0 %v3741_v51  ;;  %v2164_v51 = vld [vmem:[#allocation17 + $0x68] sm:$0xff] }
0x13ef   :  { %3744 = vmatprep.subr.bf16.mxu0 %v3743_v52  ;;  %v2166_v52 = vld [vmem:[#allocation17 + $0x78] sm:$0xff] }
0x13f0   :  { %v3767_v53 = vpack.c.bf16 %v2166_v52, %v2164_v51  ;;  %v2268_v52 = vld [vmem:[%s5166_s16 + $0x10] sm:$0xff] }
0x13f2   :  { %3746 = vmatpush1.bf16.msra.mxu0 %v3745_v58 }
0x13f3   :  { %3748 = vmatprep.subr.bf16.mxu0 %v3747_v62  ;;  %v3773_v62 = vpack.c.bf16 %v2169_v61, %v2167_v60  ;;  %v4970_v60 = vld [vmem:[%s5167_s17] ss:$0 sm:$0xff] }
0x14bc   :  { %v1906_v18 = vpop.f32.mrb[14].mxu1 }
0x14bd   :  { %v1907_v19 = vadd.f32 %v4582_v14, %v1906_v18  ;;  %v3554_v20 = vpop.f32.mrb[15].mxu1  ;;  %v3755_v18 = vpack.c.bf16 %v2154_v8, %v2152_v7  ;;  %v2176_v7 = vld [vmem:[#allocation17 + $0xc8] sm:$0xff]  ;;  %v2178_v8 = vld [vmem:[#allocation17 + $0xd8] sm:$0xff] }
0x14be   :  { %v2156_v20 = vld [vmem:[#allocation17 + $0x28] sm:$0xff] }
0x14bf   :  { %1916 = vrot.lane.b32.xlu0 %v1907_v19, %s4267_s20  ;;  %v1910_v25 = vadd.f32 %v1907_v19, %v1836_v24  ;;  %v2153_v19 = vld [vmem:[#allocation17 + $0x10] sm:$0xff]  ;;  %3756 = vmatprep.subr.bf16.mxu1 %v3755_v18  ;;  %v2175_v18 = vld [vmem:[#allocation17 + $0xc0] sm:$0xff] }
0x14c0   :  { %v1805_v21 = vpop.f32.mrb[14].mxu0 }
0x14c1   :  { %v1806_v22 = vadd.f32 %v4587_v16, %v1805_v21  ;;  %v3543_v23 = vpop.f32.mrb[15].mxu0  ;;  %v1911_v26 = vmul.f32 0.5, %v1910_v25  ;;  %v2158_v21 = vld [vmem:[#allocation17 + $0x38] sm:$0xff] }
0x14c2   :  { %v3759_v25 = vpack.c.bf16 %v2158_v21, %v2156_v20  ;;  %v2180_v20 = vld [vmem:[#allocation17 + $0xe8] sm:$0xff]  ;;  %v2182_v21 = vld [vmem:[#allocation17 + $0xf8] sm:$0xff] }
0x14c3   :  { %1815 = vrot.lane.b32.xlu1 %v1806_v22, %s4267_s20  ;;  %v1809_v27 = vadd.f32 %v1806_v22, %v1735_v5  ;;  %3919 = vtanh.f32 %v1911_v26  ;;  %v2157_v26 = vld [vmem:[#allocation17 + $0x30] sm:$0xff] }
0x14c5   :  { %v1810_v28 = vmul.f32 0.5, %v1809_v27  ;;  %v2160_v27 = vld [vmem:[#allocation17 + $0x48] sm:$0xff] }
0x14c7   :  { %3921 = vtanh.f32 %v1810_v28 }
0x14cd   :  { %v3920_v29 = vpop.eup %3919 }
0x14ce   :  { %v1913_v32 = vadd.f32 1.0, %v3920_v29  ;;  %v2162_v29 = vld [vmem:[#allocation17 + $0x58] sm:$0xff] }
0x14d0   :  { %v1914_v9 = vmul.f32 0.5, %v1913_v32 }
0x14d1   :  { %v3922_v14 = vpop.eup %3921 }
0x14d2   :  { %v1812_v12 = vadd.f32 1.0, %v3922_v14  ;;  %v1926_v2 = vsub.f32 1.0, %v1914_v9 }
0x14d4   :  { %v1813_v16 = vmul.f32 0.5, %v1812_v12  ;;  %v3763_v12 = vpack.c.bf16 %v2162_v29, %v2160_v27  ;;  %v2267_v27 = vld [vmem:[%s5166_s16 + $0x8] sm:$0xff]  ;;  %v2113_v29 = vlaneseq }
0x14d6   :  { %v1825_v23 = vsub.f32 1.0, %v1813_v16 }
0x1531   :  { %v1917_v33 = vpop.permute.xlu0 %1916 }
0x1532   :  { %v1919_v34 = vmul.f32 %v1917_v33, %v1914_v9 }
0x1534   :  { %1921 = vrot.lane.b32.xlu0 %v1919_v34, %s4267_s20  ;;  %v1947_v34 = vld [vmem:[%s5161_s11] sm:$0xff] }
0x1535   :  { %v1816_v35 = vpop.permute.xlu1 %1815 }
0x1536   :  { %v1818_v38 = vmul.f32 %v1816_v35, %v1813_v16  ;;  %v1952_v35 = vld [vmem:[%s5161_s11 + $0x28] sm:$0xff] }
0x1538   :  { %1820 = vrot.lane.b32.xlu1 %v1818_v38, %s4267_s20  ;;  %v1954_v38 = vld [vmem:[%s5161_s11 + $0x38] sm:$0xff] }
0x153c   :  { %1932 = vrot.lane.b32.xlu1 %v4862_v11, %s5188_s14 }
0x1540   :  { %1831 = vrot.lane.b32.xlu1 %v4870_v17, %s5188_s14 }
0x15a6   :  { %v1922_v13 = vpop.permute.xlu0 %1921 }
0x15a7   :  { %v1924_v39 = vadd.f32 %v1922_v13, %v1836_v24  ;;  %v3757_v24 = vpack.c.bf16 %v2153_v19, %v2151_v10  ;;  %v2177_v19 = vld [vmem:[#allocation17 + $0xd0] sm:$0xff] }
0x15a9   :  { %3923 = vtanh.f32 %v1924_v39  ;;  %3758 = vmatpush1.bf16.msra.mxu1 %v3757_v24  ;;  %v2179_v24 = vld [vmem:[#allocation17 + $0xe0] sm:$0xff] }
0x15aa   :  { %v1821_v40 = vpop.permute.xlu1 %1820  ;;  %3760 = vmatprep.subr.bf16.mxu1 %v3759_v25  ;;  %v2181_v25 = vld [vmem:[#allocation17 + $0xf0] sm:$0xff] }
0x15ab   :  { %v1823_v41 = vadd.f32 %v1821_v40, %v1735_v5  ;;  %v2155_v5 = vld [vmem:[#allocation17 + $0x20] sm:$0xff]  ;;  %v3751_v40 = vpack.c.bf16 %v1954_v38, %v1952_v35 }
0x15ad   :  { %3925 = vtanh.f32 %v1823_v41  ;;  %v1951_v41 = vld [vmem:[%s5161_s11 + $0x20] sm:$0xff] }
0x15ae   :  { %v1933_v63 = vpop.permute.xlu1 %1932  ;;  %v3753_v46 = vpack.c.bf16 %v1953_v42, %v1951_v41 }
0x15af   :  { %v1935_v4 = vmul.f32 %v1933_v63, %v1914_v9  ;;  %v3761_v9 = vpack.c.bf16 %v2157_v26, %v2155_v5  ;;  %v2172_v63 = vld [vmem:[#allocation17 + $0xa8] sm:$0xff]  ;;  %v3785_v5 = vpack.c.bf16 %v2181_v25, %v2179_v24  ;;  %v2266_v26 = vld [vmem:[%s5166_s16] sm:$0xff] }
0x15b1   :  { %3762 = vmatpush1.bf16.msra.mxu1 %v3761_v9  ;;  %v2111_v9 = vld [vmem:[#allocation16] sm:$0x3] }
0x15b2   :  { %v1832_v15 = vpop.permute.xlu1 %1831  ;;  %3764 = vmatprep.subr.bf16.mxu1 %v3763_v12 }
0x15b3   :  { %v3924_v57 = vpop.eup %3923  ;;  %v1834_v32 = vmul.f32 %v1832_v15, %v1813_v16  ;;  %v1949_v16 = vld [vmem:[%s5161_s11 + $0x10] sm:$0xff]  ;;  %v3779_v15 = vpack.c.bf16 %v2178_v8, %v2176_v7  ;;  %s3214_s11 = sshll.u32 %s4270_s30, 4  ;;  %s3215_s11 = int_to_ptr.vmem [resolvable:$true] %s3214_s11 }
0x15b4   :  { %1928 = vrot.lane.b32.xlu0 %v3924_v57, %s4268_s8  ;;  %v3749_v13 = vpack.c.bf16 %v1949_v16, %v1947_v34  ;;  %v2165_v57 = vld [vmem:[#allocation17 + $0x70] sm:$0xff]  ;;  %s4211_s22 = scalar_lea.vmem %s3215_s11, 16  ;;  %s4215_s0 = scalar_lea.vmem %s3215_s11, 32 }
0x15b5   :  { %v3769_v58 = vpack.c.bf16 %v2165_v57, %v2163_v56  ;;  %v2183_v57 = vld [vmem:[#allocation19] sm:$0x3]  ;;  %p4212_p4 = scmp.ne.s32.totalorder %s3215_s11, %s4211_s22  ;;  %p4216_p5 = scmp.lt.s32.totalorder %s3215_s11, %s3215_s11 }
0x15b6   :  { %p4217_p6 = scmp.lt.s32.totalorder %s4215_s0, %s4211_s22 }
0x15b7   :  { %v3926_v59 = vpop.eup %3925 }
0x15b8   :  { %1827 = vrot.lane.b32.xlu0 %v3926_v59, %s4268_s8  ;;  %v2168_v59 = vld [vmem:[#allocation17 + $0x88] sm:$0xff]  ;;  %p4218_p7 = por %p4217_p6, %p4216_p5 }
0x15ba   :  { %p4219_p8 = pnand %p4218_p7, %p4212_p4 }
0x1626   :  { %v1929_v3 = vpop.permute.xlu0 %1928 }
0x1627   :  { %v1931_v6 = vmul.f32 %v1929_v3, %v1926_v2  ;;  %v2174_v2 = vld [vmem:[#allocation17 + $0xb8] sm:$0xff]  ;;  %v2171_v3 = vld [vmem:[#allocation17 + $0xa0] sm:$0xff] }
0x1629   :  { %v1936_v22 = vadd.f32 %v1935_v4, %v1931_v6  ;;  %v3775_v4 = vpack.c.bf16 %v2174_v2, %v2172_v63  ;;  %v2173_v6 = vld [vmem:[#allocation17 + $0xb0] sm:$0xff] }
0x162a   :  { %v1828_v28 = vpop.permute.xlu0 %1827  ;;  %v3777_v10 = vpack.c.bf16 %v2173_v6, %v2171_v3 }
0x162b   :  { %v1830_v14 = vmul.f32 %v1828_v28, %v1825_v23  ;;  %1943 = vrot.lane.b32.xlu0 %v1936_v22, %s4268_s8  ;;  %v3781_v22 = vpack.c.bf16 %v2177_v19, %v2175_v18  ;;  %v3783_v23 = vpack.c.bf16 %v2182_v21, %v2180_v20  ;;  %v4932_v28 = vpack.c.bf16 %v2267_v27, %v2266_v26 }
0x162d   :  { %v1835_v33 = vadd.f32 %v1834_v32, %v1830_v14  ;;  %v2114_v32 = vshrl.u32 %v2113_v29, 7 }
0x162f   :  { %1938 = vrot.lane.b32.xlu1 %v1835_v33, %s4268_s8  ;;  %v2119_v14 = vsub.s32 1, %v2114_v32  ;;  %v2115_v35 = vsub.s32 0, %v2114_v32 }
0x1631   :  { %v2120_v12 = vrot.slane %v2111_v9, %v2119_v14  ;;  %v2192_v2 = vrot.slane %v2183_v57, %v2119_v14 }
0x169d   :  { %v1944_v39 = vpop.permute.xlu0 %1943 }
0x169e   :  { %v1946_v43 = vsel %vm432_vm3, %v1944_v39, %v4862_v11  ;;  %v2159_v11 = vld [vmem:[#allocation17 + $0x40] sm:$0xff] }
0x169f   :  { %3244 = vmatmul.mubr.msk.f32.vlgmr.msra.gmra.mrb[16].mxu0 %vm232_vm2, %v1946_v43  ;;  %v3765_v50 = vpack.c.bf16 %v2161_v49, %v2159_v11 }
0x16a0   :  { %3750 = vmatpush1.bf16.msra.mxu0 %v3749_v13  ;;  %2104 = vmatprep.mubr.f32.mxu0 %v4266_v1 }
0x16a1   :  { %3752 = vmatprep.subr.bf16.mxu0 %v3751_v40  ;;  %v1939_v47 = vpop.permute.xlu1 %1938  ;;  %3766 = vmatpush1.bf16.msra.mxu1 %v3765_v50  ;;  %v2116_v40 = vrot.slane %v2111_v9, %v2115_v35 }
0x16a2   :  { %v1941_v48 = vsel %vm438_vm1, %v1939_v47, %v4870_v17  ;;  %3768 = vmatprep.subr.bf16.mxu1 %v3767_v53  ;;  %v3771_v17 = vpack.c.bf16 %v2170_v54, %v2168_v59  ;;  %v2269_v53 = vld [vmem:[%s5166_s16 + $0x18] sm:$0xff]  ;;  %vm3206_vm1 = vcmask 8192  }
0x16a3   :  { %v4954_v56 = vpack.c.bf16 %v2269_v53, %v2268_v52 }
0x16a4   :  { %3754 = vmatpush1.bf16.msra.mxu0 %v3753_v46  ;;  %v2128_v46 = vld [vmem:[#allocation10] sm:$0x3] }
0x16a5   :  { %3787 = vmatprep.subr.bf16.mxu0 %v4264_v0  ;;  %3770 = vmatpush1.bf16.msra.mxu1 %v3769_v58  ;;  %v2188_v58 = vrot.slane %v2183_v57, %v2115_v35 }
0x16a6   :  { %3772 = vmatprep.subr.bf16.mxu1 %v3771_v17 }
0x16a7   :  { %3245 = vmatmul.mubr.msk.f32.vlgmr.msra.gmra.mrb[16].mxu0 %vm232_vm2, %v1941_v48 }
0x16a8   :  { %3563 = vmatprep.mubr.msk.f32.mxu0 %vm4265_vm0, %v4266_v1  ;;  %3789 = vmatpush3.bf16.msra.mxu0 %v4932_v28 }
0x16a9   :  { %3774 = vmatpush1.bf16.msra.mxu1 %v3773_v62  ;;  %3790 = vmatprep.subr.bf16.mxu0 %v4264_v0 }
0x16aa   :  { %3776 = vmatprep.subr.bf16.mxu1 %v3775_v4  ;;  %v2271_v4 = vld [vmem:[#allocation7] sm:$0x3] }
0x16ac   :  { %3792 = vmatpush3.bf16.msra.mxu0 %v4954_v56 }
0x16ad   :  { %3778 = vmatpush1.bf16.msra.mxu1 %v3777_v10  ;;  %3793 = vmatprep.subr.bf16.mxu0 %v4264_v0 }
0x16ae   :  { %3780 = vmatprep.subr.bf16.mxu1 %v3779_v15 }
0x16b1   :  { %3782 = vmatpush1.bf16.msra.mxu1 %v3781_v22 }
0x16b2   :  { %3784 = vmatprep.subr.bf16.mxu1 %v3783_v23 }
0x16b5   :  { %3786 = vmatpush1.bf16.msra.mxu1 %v3785_v5 }
0x16b6   :  { %3805 = vmatprep.subr.bf16.mxu1 %v4264_v0 }
0x177a   :  { %v2106_v33 = vpop.f32.mrb[16].mxu0 }
0x177b   :  { %v2108_v34 = vpop.f32.mrb[17].mxu0  ;;  %v2123_v41 = vadd.f32 %v2116_v40, %v2106_v33  ;;  %v2272_v33 = vld [vmem:[#allocation7 + $0x2] sm:$0x3] }
0x177c   :  { %v4936_v16 = vadd.f32 %v2120_v12, %v2108_v34 }
0x177d   :  { %v2133_v42 = vmul.f32 %v2123_v41, %v2123_v41 }
0x177e   :  { %v2125_v38 = vmul.f32 0.5, %v4936_v16  ;;  %v2131_v13 = vmul.f32 1.442695, %v4936_v16 }
0x1780   :  { %v2126_v39 = vmul.f32 1.442695, %v2125_v38  ;;  %3927 = vpow2.f32 %v2131_v13 }
0x1782   :  { %3929 = vpow2.f32 %v2126_v39 }
0x178a   :  { %v3928_v43 = vpop.eup %3927 }
0x178b   :  { %v2134_v47 = vadd.f32 %v3928_v43, %v2133_v42 }
0x178c   :  { %v3930_v48 = vpop.eup %3929 }
0x178d   :  { %v2129_v11 = vmul.f32 %v3930_v48, %v2128_v46  ;;  %v4940_v49 = vadd.f32 -1.0, %v2134_v47 }
0x178f   :  { %v2130_v50 = vadd.f32 %v2129_v11, %v2123_v41  ;;  %v2136_v51 = vsub.f32 %v4940_v49, %v4936_v16 }
0x1791   :  { %2260 = vmatmul.mubr.f32.vlgmr.msra.gmra.mrb[16].mxu1 %v2130_v50 }
0x1792   :  { %3807 = vmatpush3.bf16.msra.mxu1 %v4932_v28  ;;  %3596 = vmatprep.mubr.msk.f32.mxu1 %vm4265_vm0, %v4266_v1 }
0x1793   :  { %3808 = vmatprep.subr.bf16.mxu1 %v4264_v0 }
0x1796   :  { %3810 = vmatpush3.bf16.msra.mxu1 %v4954_v56 }
0x1797   :  { %3817 = vmatprep.subr.bf16.mxu1 %v4264_v0 }
0x1864   :  { %v2261_v59 = vpop.f32.mrb[16].mxu1 }
0x1865   :  { %v2262_v54 = vadd.f32 %v2261_v59, %v2188_v58  ;;  %v2263_v17 = vpop.f32.mrb[17].mxu1 }
0x1866   :  { %v4974_v3 = vadd.f32 %v2263_v17, %v2192_v2 }
0x1867   :  { %3564 = vmatmul.mubr.msk.f32.vlgmr.msra.gmra.mrb[18].mxu0 %vm232_vm2, %v2262_v54 }
0x1868   :  { %3795 = vmatpush3.bf16.msra.mxu0 %v4932_v28  ;;  %3574 = vmatprep.mubr.msk.f32.mxu0 %vm4265_vm0, %v4266_v1  ;;  %v2278_v6 = vadd.f32 %v2271_v4, %v4974_v3  ;;  %v2279_v34 = vadd.f32 %v2272_v33, %v4974_v3 }
0x1869   :  { %3796 = vmatprep.subr.bf16.mxu0 %v4264_v0 }
0x186c   :  { %3798 = vmatpush3.bf16.msra.mxu0 %v4954_v56 }
0x186d   :  { %3799 = vmatprep.subr.bf16.mxu0 %v4264_v0 }
0x193a   :  { %v2360_v61 = vpop.f32.mrb[18].mxu0 }
0x193b   :  { %v2361_v62 = vadd.f32 %v4970_v60, %v2360_v61  ;;  %v3565_v63 = vpop.f32.mrb[19].mxu0  ;;  %v2273_v61 = vld [vmem:[#allocation7 + $0x4] sm:$0x3] }
0x193d   :  { %2370 = vrot.lane.b32.xlu0 %v2361_v62, %s4267_s20  ;;  %v2364_v7 = vadd.f32 %v2361_v62, %v2278_v6  ;;  %v2280_v62 = vadd.f32 %v2273_v61, %v4974_v3 }
0x193f   :  { %v2365_v8 = vmul.f32 0.5, %v2364_v7 }
0x1941   :  { %3931 = vtanh.f32 %v2365_v8 }
0x194b   :  { %v3932_v10 = vpop.eup %3931 }
0x194c   :  { %v2367_v15 = vadd.f32 1.0, %v3932_v10 }
0x194e   :  { %v2368_v18 = vmul.f32 0.5, %v2367_v15 }
0x1950   :  { %v2380_v25 = vsub.f32 1.0, %v2368_v18 }
0x19af   :  { %v2371_v19 = vpop.permute.xlu0 %2370 }
0x19b0   :  { %v2373_v20 = vmul.f32 %v2371_v19, %v2368_v18 }
0x19b2   :  { %2375 = vrot.lane.b32.xlu1 %v2373_v20, %s4267_s20 }
0x19b6   :  { %2386 = vrot.lane.b32.xlu1 %v2262_v54, %s5188_s14 }
0x1a24   :  { %v2376_v21 = vpop.permute.xlu1 %2375 }
0x1a25   :  { %v2378_v22 = vadd.f32 %v2376_v21, %v2278_v6 }
0x1a27   :  { %3933 = vtanh.f32 %v2378_v22 }
0x1a28   :  { %v2387_v24 = vpop.permute.xlu1 %2386 }
0x1a29   :  { %v2389_v26 = vmul.f32 %v2387_v24, %v2368_v18 }
0x1a31   :  { %v3934_v23 = vpop.eup %3933 }
0x1a32   :  { %2382 = vrot.lane.b32.xlu0 %v3934_v23, %s4268_s8 }
0x1aa4   :  { %v2383_v5 = vpop.permute.xlu0 %2382 }
0x1aa5   :  { %v2385_v27 = vmul.f32 %v2383_v5, %v2380_v25 }
0x1aa7   :  { %v2390_v29 = vadd.f32 %v2389_v26, %v2385_v27 }
0x1aa9   :  { %2392 = vrot.lane.b32.xlu0 %v2390_v29, %s4268_s8 }
0x1b1b   :  { %v2393_v32 = vpop.permute.xlu0 %2392 }
0x1b1c   :  { %v4983_v14 = vsel %vm432_vm3, %v2393_v32, %v2262_v54 }
0x1b1d   :  { %3575 = vmatmul.mubr.msk.f32.vlgmr.msra.gmra.mrb[20].mxu0 %vm232_vm2, %v4983_v14 }
0x1b1e   :  { %3801 = vmatpush3.bf16.msra.mxu0 %v4932_v28  ;;  %3585 = vmatprep.mubr.msk.f32.mxu0 %vm4265_vm0, %v4266_v1 }
0x1b1f   :  { %3802 = vmatprep.subr.bf16.mxu0 %v4264_v0 }
0x1b22   :  { %3804 = vmatpush3.bf16.msra.mxu0 %v4954_v56 }
0x1b23   :  { %3811 = vmatprep.subr.bf16.mxu0 %v4264_v0 }
0x1bf0   :  { %v2465_v9 = vpop.f32.mrb[20].mxu0 }
0x1bf1   :  { %v2466_v12 = vadd.f32 %v4970_v60, %v2465_v9  ;;  %v3576_v55 = vpop.f32.mrb[21].mxu0  ;;  %v2281_v9 = vadd.f32 %v2274_v37, %v4974_v3 }
0x1bf3   :  { %2475 = vrot.lane.b32.xlu1 %v2466_v12, %s4267_s20  ;;  %v2469_v35 = vadd.f32 %v2466_v12, %v2279_v34 }
0x1bf5   :  { %v2470_v38 = vmul.f32 0.5, %v2469_v35 }
0x1bf7   :  { %3935 = vtanh.f32 %v2470_v38 }
0x1c01   :  { %v3936_v13 = vpop.eup %3935 }
0x1c02   :  { %v2472_v39 = vadd.f32 1.0, %v3936_v13 }
0x1c04   :  { %v2473_v40 = vmul.f32 0.5, %v2472_v39 }
0x1c06   :  { %v2485_v11 = vsub.f32 1.0, %v2473_v40 }
0x1c65   :  { %v2476_v41 = vpop.permute.xlu1 %2475 }
0x1c66   :  { %v2478_v42 = vmul.f32 %v2476_v41, %v2473_v40 }
0x1c68   :  { %2480 = vrot.lane.b32.xlu0 %v2478_v42, %s4267_s20 }
0x1c6c   :  { %2491 = vrot.lane.b32.xlu0 %v4983_v14, %s5188_s14 }
0x1cda   :  { %v2481_v43 = vpop.permute.xlu0 %2480 }
0x1cdb   :  { %v2483_v46 = vadd.f32 %v2481_v43, %v2279_v34 }
0x1cdd   :  { %3937 = vtanh.f32 %v2483_v46 }
0x1cde   :  { %v2492_v48 = vpop.permute.xlu0 %2491 }
0x1cdf   :  { %v2494_v52 = vmul.f32 %v2492_v48, %v2473_v40 }
0x1ce7   :  { %v3938_v47 = vpop.eup %3937 }
0x1ce8   :  { %2487 = vrot.lane.b32.xlu1 %v3938_v47, %s4268_s8 }
0x1d5a   :  { %v2488_v50 = vpop.permute.xlu1 %2487 }
0x1d5b   :  { %v2490_v53 = vmul.f32 %v2488_v50, %v2485_v11 }
0x1d5d   :  { %v2495_v57 = vadd.f32 %v2494_v52, %v2490_v53 }
0x1d5f   :  { %2497 = vrot.lane.b32.xlu1 %v2495_v57, %s4268_s8 }
0x1dd1   :  { %v2498_v58 = vpop.permute.xlu1 %2497 }
0x1dd2   :  { %v5004_v59 = vsel %vm648_vm5, %v2498_v58, %v4983_v14 }
0x1dd3   :  { %3586 = vmatmul.mubr.msk.f32.vlgmr.msra.gmra.mrb[22].mxu0 %vm232_vm2, %v5004_v59 }
0x1dd4   :  { %3813 = vmatpush3.bf16.msra.mxu0 %v4932_v28  ;;  %3607 = vmatprep.mubr.msk.f32.mxu0 %vm4265_vm0, %v4266_v1 }
0x1dd5   :  { %3814 = vmatprep.subr.bf16.mxu0 %v4264_v0 }
0x1dd8   :  { %3816 = vmatpush3.bf16.msra.mxu0 %v4954_v56 }
0x1dd9   :  { %3823 = vmatprep.subr.bf16.mxu0 %v4264_v0 }
0x1ea6   :  { %v2570_v54 = vpop.f32.mrb[22].mxu0 }
0x1ea7   :  { %v2571_v17 = vadd.f32 %v4970_v60, %v2570_v54  ;;  %v3587_v45 = vpop.f32.mrb[23].mxu0  ;;  %v2275_v54 = vld [vmem:[#allocation7 + $0x8] sm:$0x3] }
0x1ea8   :  { %v2282_v31 = vadd.f32 %v2275_v54, %v4974_v3 }
0x1ea9   :  { %2580 = vrot.lane.b32.xlu0 %v2571_v17, %s4267_s20  ;;  %v2574_v63 = vadd.f32 %v2571_v17, %v2280_v62 }
0x1eab   :  { %v2575_v2 = vmul.f32 0.5, %v2574_v63 }
0x1ead   :  { %3939 = vtanh.f32 %v2575_v2 }
0x1eb7   :  { %v3940_v4 = vpop.eup %3939 }
0x1eb8   :  { %v2577_v6 = vadd.f32 1.0, %v3940_v4 }
0x1eba   :  { %v2578_v7 = vmul.f32 0.5, %v2577_v6 }
0x1ebc   :  { %v2590_v21 = vsub.f32 1.0, %v2578_v7 }
0x1f1b   :  { %v2581_v8 = vpop.permute.xlu0 %2580 }
0x1f1c   :  { %v2583_v10 = vmul.f32 %v2581_v8, %v2578_v7 }
0x1f1e   :  { %2585 = vrot.lane.b32.xlu1 %v2583_v10, %s4267_s20 }
0x1f22   :  { %2596 = vrot.lane.b32.xlu1 %v5004_v59, %s5188_s14 }
0x1f90   :  { %v2586_v15 = vpop.permute.xlu1 %2585 }
0x1f91   :  { %v2588_v18 = vadd.f32 %v2586_v15, %v2280_v62 }
0x1f93   :  { %3941 = vtanh.f32 %v2588_v18  ;;  %v3026_v18 = vrot.slane %v5004_v59, 6 }
0x1f94   :  { %v2597_v20 = vpop.permute.xlu1 %2596 }
0x1f95   :  { %v2599_v23 = vmul.f32 %v2597_v20, %v2578_v7 }
0x1f9d   :  { %v3942_v19 = vpop.eup %3941 }
0x1f9e   :  { %2592 = vrot.lane.b32.xlu0 %v3942_v19, %s4268_s8 }
0x2010   :  { %v2593_v22 = vpop.permute.xlu0 %2592 }
0x2011   :  { %v2595_v24 = vmul.f32 %v2593_v22, %v2590_v21  ;;  %v3037_v22 = vsel %vm2137_vm11, %v4983_v14, %v3026_v18 }
0x2013   :  { %v2600_v25 = vadd.f32 %v2599_v23, %v2595_v24 }
0x2015   :  { %2602 = vrot.lane.b32.xlu0 %v2600_v25, %s4268_s8 }
0x2087   :  { %v2603_v5 = vpop.permute.xlu0 %2602 }
0x2088   :  { %v5025_v26 = vsel %vm864_vm7, %v2603_v5, %v5004_v59 }
0x2089   :  { %3597 = vmatmul.mubr.msk.f32.vlgmr.msra.gmra.mrb[18].mxu1 %vm232_vm2, %v5025_v26  ;;  %v3028_v19 = vrot.slane %v5025_v26, 4 }
0x208a   :  { %3819 = vmatpush3.bf16.msra.mxu1 %v4932_v28  ;;  %3618 = vmatprep.mubr.msk.f32.mxu1 %vm4265_vm0, %v4266_v1 }
0x208b   :  { %3820 = vmatprep.subr.bf16.mxu1 %v4264_v0  ;;  %v3039_v24 = vsel %vm3038_vm10, %v3037_v22, %v3028_v19  ;;  %v3255_v22 = vld [vmem:[%s5169_s19] ss:$0 sm:$0xff] }
0x208e   :  { %3822 = vmatpush3.bf16.msra.mxu1 %v4954_v56 }
0x215c   :  { %v2675_v27 = vpop.f32.mrb[18].mxu1 }
0x215d   :  { %v2676_v29 = vadd.f32 %v4970_v60, %v2675_v27  ;;  %v3598_v32 = vpop.f32.mrb[19].mxu1  ;;  %v2276_v27 = vld [vmem:[#allocation7 + $0xa] sm:$0x3] }
0x215e   :  { %v2283_v14 = vadd.f32 %v2276_v27, %v4974_v3 }
0x215f   :  { %2685 = vrot.lane.b32.xlu1 %v2676_v29, %s4267_s20  ;;  %v2679_v12 = vadd.f32 %v2676_v29, %v2281_v9 }
0x2161   :  { %v2680_v55 = vmul.f32 0.5, %v2679_v12 }
0x2163   :  { %3943 = vtanh.f32 %v2680_v55 }
0x216d   :  { %v3944_v33 = vpop.eup %3943 }
0x216e   :  { %v2682_v34 = vadd.f32 1.0, %v3944_v33 }
0x2170   :  { %v2683_v35 = vmul.f32 0.5, %v2682_v34 }
0x2172   :  { %v2695_v43 = vsub.f32 1.0, %v2683_v35 }
0x21d1   :  { %v2686_v38 = vpop.permute.xlu1 %2685 }
0x21d2   :  { %v2688_v13 = vmul.f32 %v2686_v38, %v2683_v35 }
0x21d4   :  { %2690 = vrot.lane.b32.xlu0 %v2688_v13, %s4267_s20 }
0x21d8   :  { %2701 = vrot.lane.b32.xlu0 %v5025_v26, %s5188_s14 }
0x2246   :  { %v2691_v39 = vpop.permute.xlu0 %2690 }
0x2247   :  { %v2693_v40 = vadd.f32 %v2691_v39, %v2281_v9 }
0x2249   :  { %3945 = vtanh.f32 %v2693_v40 }
0x224a   :  { %v2702_v42 = vpop.permute.xlu0 %2701 }
0x224b   :  { %v2704_v47 = vmul.f32 %v2702_v42, %v2683_v35 }
0x2253   :  { %v3946_v41 = vpop.eup %3945 }
0x2254   :  { %2697 = vrot.lane.b32.xlu1 %v3946_v41, %s4268_s8 }
0x22c6   :  { %v2698_v46 = vpop.permute.xlu1 %2697 }
0x22c7   :  { %v2700_v48 = vmul.f32 %v2698_v46, %v2695_v43 }
0x22c9   :  { %v2705_v11 = vadd.f32 %v2704_v47, %v2700_v48 }
0x22cb   :  { %2707 = vrot.lane.b32.xlu1 %v2705_v11, %s4268_s8 }
0x233d   :  { %v2708_v50 = vpop.permute.xlu1 %2707 }
0x233e   :  { %v2710_v52 = vsel %vm1080_vm9, %v2708_v50, %v5025_v26  ;;  %v2277_v50 = vld [vmem:[#allocation7 + $0xc] sm:$0x3] }
0x233f   :  { %3608 = vmatmul.mubr.msk.f32.vlgmr.msra.gmra.mrb[24].mxu0 %vm232_vm2, %v2710_v52  ;;  %v3030_v20 = vrot.slane %v2710_v52, 2 }
0x2340   :  { %3825 = vmatpush3.bf16.msra.mxu0 %v4932_v28  ;;  %3629 = vmatprep.mubr.msk.f32.mxu0 %vm4265_vm0, %v4266_v1  ;;  %vm3178_vm0 = vcmask 7168  }
0x2341   :  { %3826 = vmatprep.subr.bf16.mxu0 %v4264_v0  ;;  %v3041_v59 = vsel %vm3040_vm12, %v3039_v24, %v3030_v20 }
0x2344   :  { %3828 = vmatpush3.bf16.msra.mxu0 %v4954_v56 }
0x2412   :  { %v2780_v53 = vpop.f32.mrb[24].mxu0 }
0x2413   :  { %v2781_v57 = vadd.f32 %v4970_v60, %v2780_v53  ;;  %v3609_v58 = vpop.f32.mrb[25].mxu0 }
0x2415   :  { %2790 = vrot.lane.b32.xlu0 %v2781_v57, %s4267_s20  ;;  %v2784_v17 = vadd.f32 %v2781_v57, %v2282_v31 }
0x2417   :  { %v2785_v45 = vmul.f32 0.5, %v2784_v17 }
0x2419   :  { %3947 = vtanh.f32 %v2785_v45 }
0x2423   :  { %v3948_v28 = vpop.eup %3947 }
0x2424   :  { %v2787_v61 = vadd.f32 1.0, %v3948_v28  ;;  %v3044_v28 = vld [vmem:[%s5168_s18] sm:$0xff] }
0x2426   :  { %v2788_v62 = vmul.f32 0.5, %v2787_v61 }
0x2428   :  { %v2800_v6 = vsub.f32 1.0, %v2788_v62 }
0x2487   :  { %v2791_v1 = vpop.permute.xlu0 %2790 }
0x2488   :  { %v2793_v63 = vmul.f32 %v2791_v1, %v2788_v62  ;;  %v3046_v1 = vld [vmem:[%s5168_s18 + $0x10] sm:$0xff] }
0x248a   :  { %2795 = vrot.lane.b32.xlu1 %v2793_v63, %s4267_s20  ;;  %v3047_v63 = vld [vmem:[%s5168_s18 + $0x18] sm:$0xff] }
0x248e   :  { %2806 = vrot.lane.b32.xlu1 %v2710_v52, %s5188_s14 }
0x24fc   :  { %v2796_v0 = vpop.permute.xlu1 %2795 }
0x24fd   :  { %v2798_v56 = vadd.f32 %v2796_v0, %v2282_v31  ;;  %v3833_v0 = vpack.c.bf16 %v3047_v63, %v3046_v1 }
0x24ff   :  { %3949 = vtanh.f32 %v2798_v56 }
0x2500   :  { %v2807_v4 = vpop.permute.xlu1 %2806 }
0x2501   :  { %v2809_v8 = vmul.f32 %v2807_v4, %v2788_v62 }
0x2509   :  { %v3950_v2 = vpop.eup %3949 }
0x250a   :  { %2802 = vrot.lane.b32.xlu0 %v3950_v2, %s4268_s8 }
0x257c   :  { %v2803_v7 = vpop.permute.xlu0 %2802 }
0x257d   :  { %v2805_v10 = vmul.f32 %v2803_v7, %v2800_v6 }
0x257f   :  { %v2810_v15 = vadd.f32 %v2809_v8, %v2805_v10 }
0x2581   :  { %2812 = vrot.lane.b32.xlu0 %v2810_v15, %s4268_s8 }
0x25f3   :  { %v2813_v21 = vpop.permute.xlu0 %2812 }
0x25f4   :  { %v5064_v23 = vsel %vm1086_vm8, %v2813_v21, %v2710_v52  ;;  %v2284_v52 = vadd.f32 %v2277_v50, %v4974_v3  ;;  %v3045_v3 = vld [vmem:[%s5168_s18 + $0x8] sm:$0xff] }
0x25f5   :  { %3619 = vmatmul.mubr.msk.f32.vlgmr.msra.gmra.mrb[20].mxu1 %vm232_vm2, %v5064_v23  ;;  %v3829_v61 = vpack.c.bf16 %v3045_v3, %v3044_v28 }
0x25f6   :  { %3640 = vmatprep.mubr.msk.f32.mxu1 %vm232_vm2, %v3041_v59 }
0x25f7   :  { %3830 = vmatprep.subr.bf16.mxu1 %v3829_v61 }
0x25f8   :  { %3832 = vmatpush3.bf16.msra.mxu1 %v3829_v61 }
0x25f9   :  { %3834 = vmatprep.subr.bf16.mxu1 %v3833_v0 }
0x25fc   :  { %3836 = vmatpush3.bf16.msra.mxu1 %v3833_v0 }
0x26c8   :  { %v2885_v25 = vpop.f32.mrb[20].mxu1 }
0x26c9   :  { %v2886_v5 = vadd.f32 %v4970_v60, %v2885_v25  ;;  %v3620_v26 = vpop.f32.mrb[21].mxu1 }
0x26cb   :  { %2895 = vrot.lane.b32.xlu1 %v2886_v5, %s4267_s20  ;;  %v2889_v30 = vadd.f32 %v2886_v5, %v2283_v14 }
0x26cd   :  { %v2890_v29 = vmul.f32 0.5, %v2889_v30 }
0x26cf   :  { %3951 = vtanh.f32 %v2890_v29 }
0x26d9   :  { %v3952_v32 = vpop.eup %3951 }
0x26da   :  { %v2892_v37 = vadd.f32 1.0, %v3952_v32 }
0x26dc   :  { %v2893_v9 = vmul.f32 0.5, %v2892_v37  ;;  %v3163_v37 = vld [vmem:[%s5190_s26 + $0x8] sm:$0x3f] }
0x26de   :  { %v2905_v13 = vsub.f32 1.0, %v2893_v9 }
0x273d   :  { %v2896_v12 = vpop.permute.xlu1 %2895 }
0x273e   :  { %v2898_v55 = vmul.f32 %v2896_v12, %v2893_v9 }
0x2740   :  { %2900 = vrot.lane.b32.xlu0 %v2898_v55, %s4267_s20 }
0x2744   :  { %2911 = vrot.lane.b32.xlu0 %v5064_v23, %s5188_s14 }
0x27b2   :  { %v2901_v33 = vpop.permute.xlu0 %2900 }
0x27b3   :  { %v2903_v34 = vadd.f32 %v2901_v33, %v2283_v14 }
0x27b5   :  { %3953 = vtanh.f32 %v2903_v34 }
0x27b6   :  { %v2912_v38 = vpop.permute.xlu0 %2911 }
0x27b7   :  { %v2914_v40 = vmul.f32 %v2912_v38, %v2893_v9  ;;  %v3162_v9 = vld [vmem:[%s5190_s26] sm:$0xff] }
0x27bf   :  { %v3954_v35 = vpop.eup %3953 }
0x27c0   :  { %2907 = vrot.lane.b32.xlu1 %v3954_v35, %s4268_s8 }
0x2832   :  { %v2908_v39 = vpop.permute.xlu1 %2907 }
0x2833   :  { %v2910_v41 = vmul.f32 %v2908_v39, %v2905_v13 }
0x2835   :  { %v2915_v42 = vadd.f32 %v2914_v40, %v2910_v41  ;;  %v2138_v40 = vsel %vm2137_vm11, %v2136_v51, 0.0  ;;  %v3173_v41 = vld [vmem:[%s5155_s5 + $0x8] sm:$0x3f] }
0x2837   :  { %2917 = vrot.lane.b32.xlu1 %v2915_v42, %s4268_s8  ;;  %v3172_v42 = vld [vmem:[%s5155_s5] sm:$0xff]  ;;  %s4269_s5 = smov 1  }
0x28a9   :  { %v2918_v43 = vpop.permute.xlu1 %2917 }
0x28aa   :  { %v2920_v46 = vsel %vm870_vm6, %v2918_v43, %v5064_v23  ;;  %v3190_v43 = vsel %vm3180_vm15, %v3173_v41, 0.0 }
0x28ab   :  { %3630 = vmatmul.mubr.msk.f32.vlgmr.msra.gmra.mrb[26].mxu0 %vm232_vm2, %v2920_v46  ;;  %v3032_v10 = vrot.slane %v2920_v46, 6 }
0x28ad   :  { %v3042_v20 = vsel %vm2137_vm11, %v5064_v23, %v3032_v10 }
0x297e   :  { %v2990_v47 = vpop.f32.mrb[26].mxu0 }
0x297f   :  { %v2991_v48 = vadd.f32 %v4970_v60, %v2990_v47  ;;  %v3631_v11 = vpop.f32.mrb[27].mxu0 }
0x2981   :  { %3000 = vrot.lane.b32.xlu0 %v2991_v48, %s4267_s20  ;;  %v2994_v53 = vadd.f32 %v2991_v48, %v2284_v52 }
0x2983   :  { %v2995_v57 = vmul.f32 0.5, %v2994_v53 }
0x2985   :  { %3955 = vtanh.f32 %v2995_v57 }
0x298f   :  { %v3956_v58 = vpop.eup %3955 }
0x2990   :  { %v2997_v54 = vadd.f32 1.0, %v3956_v58 }
0x2992   :  { %v2998_v31 = vmul.f32 0.5, %v2997_v54 }
0x2994   :  { %v3010_v2 = vsub.f32 1.0, %v2998_v31 }
0x29f3   :  { %v3001_v17 = vpop.permute.xlu0 %3000 }
0x29f4   :  { %v3003_v36 = vmul.f32 %v3001_v17, %v2998_v31 }
0x29f6   :  { %3005 = vrot.lane.b32.xlu1 %v3003_v36, %s4267_s20 }
0x29fa   :  { %3016 = vrot.lane.b32.xlu1 %v2920_v46, %s5188_s14 }
0x2a68   :  { %v3006_v45 = vpop.permute.xlu1 %3005 }
0x2a69   :  { %v3008_v60 = vadd.f32 %v3006_v45, %v2284_v52 }
0x2a6b   :  { %3957 = vtanh.f32 %v3008_v60 }
0x2a6c   :  { %v3017_v56 = vpop.permute.xlu1 %3016 }
0x2a6d   :  { %v3019_v6 = vmul.f32 %v3017_v56, %v2998_v31 }
0x2a75   :  { %v3958_v62 = vpop.eup %3957 }
0x2a76   :  { %3012 = vrot.lane.b32.xlu0 %v3958_v62, %s4268_s8 }
0x2ae8   :  { %v3013_v4 = vpop.permute.xlu0 %3012 }
0x2ae9   :  { %v3015_v7 = vmul.f32 %v3013_v4, %v3010_v2 }
0x2aeb   :  { %v3020_v8 = vadd.f32 %v3019_v6, %v3015_v7 }
0x2aed   :  { %3022 = vrot.lane.b32.xlu0 %v3020_v8, %s4268_s8 }
0x2b5f   :  { %v3023_v15 = vpop.permute.xlu0 %3022 }
0x2b60   :  { %v3025_v18 = vsel %vm654_vm4, %v3023_v15, %v2920_v46  ;;  %v3189_v46 = vsel %vm3178_vm0, %v3172_v42, 0.0 }
0x2b61   :  { %v3035_v19 = vrot.slane %v3025_v18, 4  ;;  %v3191_v47 = vadd.f32 %v3190_v43, %v3189_v46 }
0x2b63   :  { %v3043_v21 = vsel %vm3038_vm10, %v3042_v20, %v3035_v19  ;;  %v3192_v48 = vrot.slane %v3191_v47, 4 }
0x2b64   :  { %3641 = vmatmul.mubr.msk.f32.vlgmr.msra.gmra.mrb[22].mxu1 %vm232_vm2, %v3043_v21 }
0x2b65   :  { %v3193_v16 = vadd.f32 %v3192_v48, %v3191_v47 }
0x2b67   :  { %v3194_v11 = vrot.slane %v3193_v16, 2 }
0x2b69   :  { %v3195_v50 = vadd.f32 %v3194_v11, %v3193_v16 }
0x2b6b   :  { %v3196_v53 = vrot.slane %v3195_v50, 1 }
0x2b6d   :  { %v3197_v45 = vadd.f32 %v3196_v53, %v3195_v50 }
0x2b6f   :  { %v3198_v62 = vmax.f32 %v3197_v45, 1.0 }
0x2c37   :  { %v3642_v24 = vpop.f32.mrb[22].mxu1 }
0x2c38   :  { %v3133_v59 = vadd.f32 %v3642_v24, %v3255_v22  ;;  %v3127_v25 = vpop.f32.mrb[23].mxu1 }
0x2c39   :  { %v3128_v5 = vadd.f32 %v3255_v22, %v3127_v25 }
0x2c3a   :  { %v3141_v44 = vsel %vm3140_vm13, %v3133_v59, -inf  ;;  %v3165_v34 = vmul.f32 %v3163_v37, %v3133_v59 }
0x2c3b   :  { %3142 = vmax.xlane.f32.xlu0 %v3141_v44  ;;  %v3137_v26 = vsel %vm3136_vm14, %v3128_v5, -inf  ;;  %v3164_v38 = vmul.f32 %v3162_v9, %v3128_v5 }
0x2c3c   :  { %3138 = vmax.xlane.f32.xlu1 %v3137_v26  ;;  %v3169_v13 = vsel %vm3140_vm13, %v3165_v34, 0.0 }
0x2c3d   :  { %v3166_v39 = vsel %vm3136_vm14, %v3164_v38, 0.0 }
0x2cc8   :  { %v3143_v23 = vpop.xlane.xlu0 %3142 }
0x2cc9   :  { %v3145_v27 = vsub.f32 %v3133_v59, %v3143_v23  ;;  %v3139_v14 = vpop.xlane.xlu1 %3138 }
0x2cca   :  { %v3144_v30 = vsub.f32 %v3128_v5, %v3139_v14 }
0x2ccb   :  { %v3148_v29 = vmul.f32 1.442695, %v3145_v27 }
0x2ccc   :  { %v3146_v32 = vmul.f32 1.442695, %v3144_v30 }
0x2ccd   :  { %3959 = vpow2.f32 %v3148_v29 }
0x2cce   :  { %3961 = vpow2.f32 %v3146_v32 }
0x2cd7   :  { %v3960_v12 = vpop.eup %3959 }
0x2cd8   :  { %v3962_v55 = vpop.eup %3961  ;;  %v3153_v33 = vsel %vm3140_vm13, %v3960_v12, 0.0 }
0x2cd9   :  { %3154 = vadd.xlane.f32.xlu1 %v3153_v33  ;;  %v3150_v35 = vsel %vm3136_vm14, %v3962_v55, 0.0 }
0x2cda   :  { %3151 = vadd.xlane.f32.xlu0 %v3150_v35 }
0x2cdd   :  { %3170 = vadd.xlane.f32.xlu1 %v3169_v13 }
0x2cde   :  { %3167 = vadd.xlane.f32.xlu0 %v3166_v39 }
0x2ce2   :  { %2139 = vadd.xlane.f32.xlu0 %v2138_v40 }
0x2d66   :  { %v3155_v49 = vpop.xlane.xlu1 %3154 }
0x2d67   :  { %3963 = vlog2.f32 %v3155_v49  ;;  %v3152_v51 = vpop.xlane.xlu0 %3151 }
0x2d68   :  { %3965 = vlog2.f32 %v3152_v51 }
0x2d69   :  { %3967 = vrcp.f32 %v3198_v62 }
0x2d6a   :  { %v3171_v17 = vpop.xlane.xlu1 %3170 }
0x2d6b   :  { %v3168_v28 = vpop.xlane.xlu0 %3167 }
0x2d6f   :  { %v2140_v19 = vpop.xlane.xlu0 %2139 }
0x2d70   :  { %v2141_v20 = vsel %vm2137_vm11, %v2140_v19, 0.0 }
0x2d71   :  { %v3964_v52 = vpop.eup %3963  ;;  %v2142_v21 = vrot.slane %v2141_v20, 4 }
0x2d72   :  { %v3966_v57 = vpop.eup %3965  ;;  %v3159_v58 = vmul.f32 0.6931472, %v3964_v52 }
0x2d73   :  { %v3157_v54 = vmul.f32 0.6931472, %v3966_v57  ;;  %v3968_v10 = vpop.eup %3967  ;;  %v2143_v22 = vadd.f32 %v2142_v21, %v2141_v20 }
0x2d74   :  { %v3161_v31 = vadd.f32 %v3159_v58, %v3143_v23 }
0x2d75   :  { %v3160_v36 = vadd.f32 %v3157_v54, %v3139_v14  ;;  %v2144_v24 = vrot.slane %v2143_v22, 2 }
0x2d76   :  { %v3175_v60 = vsub.f32 %v3161_v31, %v3171_v17 }
0x2d77   :  { %v3174_v3 = vsub.f32 %v3160_v36, %v3168_v28  ;;  %v2145_v59 = vadd.f32 %v2144_v24, %v2143_v22 }
0x2d78   :  { %v3177_v61 = vmul.f32 %v3175_v60, %v3173_v41 }
0x2d79   :  { %v3176_v1 = vmul.f32 %v3174_v3, %v3172_v42  ;;  %v2146_v25 = vrot.slane %v2145_v59, 1 }
0x2d7a   :  { %v3181_v63 = vsel %vm3180_vm15, %v3177_v61, 0.0 }
0x2d7b   :  { %v3179_v0 = vsel %vm3178_vm0, %v3176_v1, 0.0  ;;  %v2147_v5 = vadd.f32 %v2146_v25, %v2145_v59 }
0x2d7c   :  { %v3182_v56 = vadd.f32 %v3181_v63, %v3179_v0 }
0x2d7d   :  { %v2149_v44 = vmul.f32 0.5, %v2147_v5 }
0x2d7e   :  { %v3183_v2 = vrot.slane %v3182_v56, 4 }
0x2d7f   :  { %v2150_v26 = vmul.f32 0.5, %v2149_v44 }
0x2d80   :  { %v3184_v4 = vadd.f32 %v3183_v2, %v3182_v56 }
0x2d82   :  { %v3185_v6 = vrot.slane %v3184_v4, 2 }
0x2d84   :  { %v3186_v7 = vadd.f32 %v3185_v6, %v3184_v4 }
0x2d86   :  { %v3187_v8 = vrot.slane %v3186_v7, 1 }
0x2d88   :  { %v3188_v15 = vadd.f32 %v3187_v8, %v3186_v7 }
0x2d8a   :  { %v3200_v18 = vmul.f32 %v3968_v10, %v3188_v15 }
0x2d8c   :  { %3202 = vrot.lane.b32.xlu1 %v3200_v18, %s4269_s5 }
0x2dfe   :  { %v3203_v23 = vpop.permute.xlu1 %3202 }
0x2dff   :  { %v3205_v27 = vsel %vm3178_vm0, %v2150_v26, %v3203_v23 }
0x2e00   :  { %3207 = vst.msk [vmem:[#allocation20] sm:$0x1] %vm3206_vm1, %v3205_v27 }
0x2e01   :  { %4222 = shalt.err (!%p4219_p8)
}
0x2e02   :  { %s5191_s7 = sld [smem:[#allocation33_spill]] }
0x2e08   :  { %s4223_s10 = scalar_lea.hbm %s5191_s7, 16 }
0x2e09   :  { %p4224_p9 = scmp.ne.s32.totalorder %s5191_s7, %s4223_s10  ;;  %p4227_p10 = scmp.lt.u32.totalorder %s4223_s10, %s5191_s7 }
0x2e0b   :  { %p4229_p11 = pnand %p4227_p10, %p4224_p9 }
0x2e0d   :  { %4232 = shalt.err (!%p4229_p11)
}
0x2e0e   :  { %3217 = dma.vmem_to_hbm [thread:$0]  %s3215_s11, 16, %s5191_s7, [#allocation4]  }
0x2e0f   :  { %4245 = dma.done.wait [#allocation4], 16  }
0x2e10   :  { %4246 = vsyncadd [#allocation4], 4294967280 }
0x2e11   :  { %3221 = vsyncpa [#allocation3], 1 }
0x2e12   :  { %3222 = vsyncpa [#allocation6], 1 }
0x2e13   :  { %3223 = vsyncpa [#allocation9], 1 }
0x2e14   :  { %3224 = vsyncpa [#allocation12], 1 }
0x2e15   :  { %3225 = vsyncpa [#allocation15], 1 }
0x2e16   :  { %3226 = vsyncpa [#allocation18], 1 }
0x2e17   :  { %3227 = vsyncpa [#allocation4], 1 }

</bundles_post_ra>
